<compile_context>
chip_gen: v7x
topology: tpu7x:2x2x1
jax: 0.10.0
libtpu: 0.0.40
codegen_flags: <defaults>
</compile_context>

<pallas_src>
import numpy as np
import jax
import jax.numpy as jnp
from jax.experimental import pallas as pl
from jax.experimental.pallas import tpu as pltpu


# ----------------------------------------------------------------------------
# Kernel
# ----------------------------------------------------------------------------
def make_nicer_kernel(num_coupling: int, num_lin: int):
    """Kernel over packed parameter slabs.

    Ref signature:
      (z, w_in, w_hid, w_out, b_hid, b_out, vecs, out)

      z      : (B_TILE, D)                       activations
      w_in   : (2C, D, H)                        first Linear of each MLP
      w_hid  : (2C*(L-2), H, H)                  hidden Linears
      w_out  : (2C, H, D)                        last Linear of each MLP
      b_hid  : (2C*(L-1), H)                     biases of all non-final Linears
      b_out  : (2C, D)                           biases of the final Linears
      vecs   : (4C+1, D)                         per layer: m0, m0+m1, m1, m2;
                                                 last row: log_scale_vector
    """
    assert num_lin >= 3, "packing assumes at least one hidden Linear"
    nh = num_lin - 2   # hidden Linears per MLP
    nb = num_lin - 1   # H-sized biases per MLP

    def kernel(z_ref, w_in_ref, w_hid_ref, w_out_ref,
               b_hid_ref, b_out_ref, vecs_ref, o_ref):
        x = z_ref[...]                                        # (Bt, D) f32

        def mlp(h, m):
            # Linear(D->H) + LeakyReLU(0.2)
            h = jnp.dot(h, w_in_ref[m], preferred_element_type=jnp.float32)
            h = h + b_hid_ref[m * nb:m * nb + 1, :]
            h = jnp.where(h > 0, h, 0.2 * h)
            # (num_lin - 2) x [Linear(H->H) + LeakyReLU(0.2)]
            for j in range(nh):
                h = jnp.dot(h, w_hid_ref[m * nh + j],
                            preferred_element_type=jnp.float32)
                h = h + b_hid_ref[m * nb + 1 + j:m * nb + 2 + j, :]
                h = jnp.where(h > 0, h, 0.2 * h)
            # Linear(H->D), no activation
            h = jnp.dot(h, w_out_ref[m], preferred_element_type=jnp.float32)
            h = h + b_out_ref[m:m + 1, :]
            return h

        for c in range(num_coupling):
            m0 = vecs_ref[4 * c + 0:4 * c + 1, :]             # (1, D)
            m01 = vecs_ref[4 * c + 1:4 * c + 2, :]            # m0 + m1
            m1 = vecs_ref[4 * c + 2:4 * c + 3, :]
            m2 = vecs_ref[4 * c + 3:4 * c + 4, :]
            # Since m0 + m1 + m2 == 1 (disjoint partition), the original
            #   x_A + x_B + x_C recomposition collapses to:
            x = x + m1 * mlp(m0 * x, 2 * c) + m2 * mlp(m01 * x, 2 * c + 1)

        # ScalingLayer: exp(log_scale_vector) * x   (exp -> EUP, cheap)
        log_scale = vecs_ref[4 * num_coupling:4 * num_coupling + 1, :]
        x = jnp.exp(log_scale) * x

        o_ref[...] = x.astype(o_ref.dtype)

    return kernel


# ----------------------------------------------------------------------------
# Wrapper
# ----------------------------------------------------------------------------
def nicer_forward(z, packed, num_coupling, num_lin, b_tile=128):
    B, D = z.shape
    bt = min(b_tile, B)
    assert bt % 8 == 0 and B % bt == 0, "batch tile must be a multiple of 8 and divide B"
    grid = (B // bt,)

    kernel = make_nicer_kernel(num_coupling, num_lin)

    def const_spec(arr):
        nd = arr.ndim
        return pl.BlockSpec(arr.shape, lambda i, _nd=nd: (0,) * _nd)

    return pl.pallas_call(
        kernel,
        out_shape=jax.ShapeDtypeStruct(z.shape, z.dtype),
        grid=grid,
        in_specs=[
            pl.BlockSpec((bt, D), lambda i: (i, 0)),   # activations: tiled over batch
            const_spec(packed["w_in"]),                # parameters: fetched once,
            const_spec(packed["w_hid"]),               # VMEM-resident across steps
            const_spec(packed["w_out"]),
            const_spec(packed["b_hid"]),
            const_spec(packed["b_out"]),
            const_spec(packed["vecs"]),
        ],
        out_specs=pl.BlockSpec((bt, D), lambda i: (i, 0)),
        compiler_params=pltpu.CompilerParams(
            dimension_semantics=("parallel",)),        # batch axis -> both TCs on v7x
    )(z, packed["w_in"], packed["w_hid"], packed["w_out"],
      packed["b_hid"], packed["b_out"], packed["vecs"])


# ----------------------------------------------------------------------------
# Parameter construction (PyTorch-layout flat list) and host-side packing
# ----------------------------------------------------------------------------
def get_masks(dim: int, shift: int) -> np.ndarray:
    """Port of NICER._get_masks."""
    shift = shift % 3
    mask = np.zeros((3, dim), dtype=np.float32)
    for i in range(3):
        mask[i, (shift + i) % 3::3] = 1.0
    return mask


def init_params(key, input_dim, hidden_dim, num_coupling, num_lin):
    """Flat parameter list matching the PyTorch module layout.

    Per coupling layer: mask(3,D), then m-MLP (W,b)*num_lin, then l-MLP
    (W,b)*num_lin; finally the (1,D) log_scale_vector.  W stored (in,out).
    """
    params = []
    dims = [input_dim] + [hidden_dim] * (num_lin - 1) + [input_dim]
    for i in range(num_coupling):
        shift = 1 if (i % 3 == 0) else 0  # torch: shift = (i % 3 == 0)
        params.append(jnp.asarray(get_masks(input_dim, shift)))
        for _ in range(2):                # m MLP then l MLP
            for li in range(num_lin):
                key, kw, kb = jax.random.split(key, 3)
                fan_in = dims[li]
                w = jax.random.normal(kw, (dims[li], dims[li + 1]), jnp.float32)
                w = w * (1.0 / np.sqrt(fan_in))
                b = jax.random.normal(kb, (1, dims[li + 1]), jnp.float32) * 0.01
                params.append(w)
                params.append(b)
    key, ks = jax.random.split(key)
    params.append(jax.random.normal(ks, (1, input_dim), jnp.float32))  # log_scale
    return params


def pack_params(params, input_dim, hidden_dim, num_coupling, num_lin):
    """Pack the flat parameter list into a few contiguous slabs for the kernel."""
    it = iter(params)
    w_in, w_hid, w_out, b_hid, b_out, vec_rows = [], [], [], [], [], []
    for _ in range(num_coupling):
        mask = next(it)                               # (3, D)
        m0, m1, m2 = mask[0], mask[1], mask[2]
        vec_rows += [m0, m0 + m1, m1, m2]             # pre-combined masks
        for _mlp in range(2):
            for li in range(num_lin):
                w = next(it)
                b = next(it)
                if li == 0:
                    w_in.append(w); b_hid.append(b[0])
                elif li == num_lin - 1:
                    w_out.append(w); b_out.append(b[0])
                else:
                    w_hid.append(w); b_hid.append(b[0])
    log_scale = next(it)                              # (1, D)
    vec_rows.append(log_scale[0])
    return dict(
        w_in=jnp.stack(w_in),     # (2C, D, H)
        w_hid=jnp.stack(w_hid),   # (2C*(L-2), H, H)
        w_out=jnp.stack(w_out),   # (2C, H, D)
        b_hid=jnp.stack(b_hid),   # (2C*(L-1), H)
        b_out=jnp.stack(b_out),   # (2C, D)
        vecs=jnp.stack(vec_rows), # (4C+1, D)
    )


# ----------------------------------------------------------------------------
# Pure-JAX reference (mirrors the PyTorch forward) for correctness check
# ----------------------------------------------------------------------------
def nicer_forward_ref(z, params, num_coupling, num_lin):
    it = iter(params)
    x = z
    for _ in range(num_coupling):
        mask = next(it)
        m_ws = [(next(it), next(it)) for _ in range(num_lin)]
        l_ws = [(next(it), next(it)) for _ in range(num_lin)]

        def mlp(h, ws):
            for li, (w, b) in enumerate(ws):
                h = h @ w + b
                if li < len(ws) - 1:
                    h = jnp.where(h > 0, h, 0.2 * h)
            return h

        m0, m1, m2 = mask[0:1], mask[1:2], mask[2:3]
        z_A, z_B, z_C = m0 * x, m1 * x, m2 * x
        x = z_A + (z_B + mlp(z_A, m_ws) * m1) + (z_C + mlp(z_A + z_B, l_ws) * m2)
    log_scale = next(it)
    return jnp.exp(log_scale) * x


# ----------------------------------------------------------------------------
if __name__ == "__main__":
    # Small shapes consistent with the module: batch of flat feature vectors.
    batch = 256               # multiple batch tiles -> exercises the grid
    input_dim = 16
    hidden_dim = 32
    num_coupling_layers = 3
    num_layers = 4            # 4 Linears per MLP: D->H, H->H, H->H, H->D

    key = jax.random.PRNGKey(0)
    key, kz = jax.random.split(key)
    z = jax.random.normal(kz, (batch, input_dim), jnp.float32)

    params = init_params(key, input_dim, hidden_dim,
                         num_coupling_layers, num_layers)
    packed = pack_params(params, input_dim, hidden_dim,
                         num_coupling_layers, num_layers)

    out = nicer_forward(z, packed, num_coupling_layers, num_layers, b_tile=128)
    out = jax.block_until_ready(out)

    ref = nicer_forward_ref(z, params, num_coupling_layers, num_layers)
    np.testing.assert_allclose(np.asarray(out), np.asarray(ref),
                               rtol=1e-4, atol=1e-4)

    print("KERNEL_OK")
</pallas_src>

<mosaic_0001>
module attributes {stable_mosaic.version = 11 : i64} {
  func.func @kernel(%arg0: i32, %arg1: memref<128x16xf32, #tpu.memory_space<vmem>>, %arg2: memref<6x16x32xf32, #tpu.memory_space<vmem>>, %arg3: memref<12x32x32xf32, #tpu.memory_space<vmem>>, %arg4: memref<6x32x16xf32, #tpu.memory_space<vmem>>, %arg5: memref<18x32xf32, #tpu.memory_space<vmem>>, %arg6: memref<6x16xf32, #tpu.memory_space<vmem>>, %arg7: memref<13x16xf32, #tpu.memory_space<vmem>>, %arg8: memref<128x16xf32, #tpu.memory_space<vmem>>) attributes {dimension_semantics = [#tpu.dimension_semantics<parallel>], iteration_bounds = array<i64: 2>, scalar_prefetch = 0 : i64, scratch_operands = 0 : i64, tpu.core_type = #tpu.core_type<tc>, window_params = [{transform_indices = @transform_0, window_bounds = array<i64: 128, 16>}, {pipeline_mode = #tpu.pipeline_mode<synchronous>, transform_indices = @transform_1, window_bounds = array<i64: 6, 16, 32>}, {pipeline_mode = #tpu.pipeline_mode<synchronous>, transform_indices = @transform_2, window_bounds = array<i64: 12, 32, 32>}, {pipeline_mode = #tpu.pipeline_mode<synchronous>, transform_indices = @transform_3, window_bounds = array<i64: 6, 32, 16>}, {pipeline_mode = #tpu.pipeline_mode<synchronous>, transform_indices = @transform_4, window_bounds = array<i64: 18, 32>}, {pipeline_mode = #tpu.pipeline_mode<synchronous>, transform_indices = @transform_5, window_bounds = array<i64: 6, 16>}, {pipeline_mode = #tpu.pipeline_mode<synchronous>, transform_indices = @transform_6, window_bounds = array<i64: 13, 16>}, {transform_indices = @transform_7, window_bounds = array<i64: 128, 16>}]} {
    %c0 = arith.constant 0 : index
    %c0_0 = arith.constant 0 : index
    %0 = vector.load %arg1[%c0, %c0_0] : memref<128x16xf32, #tpu.memory_space<vmem>>, vector<128x16xf32>
    %c0_1 = arith.constant 0 : index
    %c0_2 = arith.constant 0 : index
    %1 = vector.load %arg7[%c0_1, %c0_2] : memref<13x16xf32, #tpu.memory_space<vmem>>, vector<1x16xf32>
    %c1 = arith.constant 1 : index
    %c0_3 = arith.constant 0 : index
    %2 = vector.load %arg7[%c1, %c0_3] : memref<13x16xf32, #tpu.memory_space<vmem>>, vector<1x16xf32>
    %c2 = arith.constant 2 : index
    %c0_4 = arith.constant 0 : index
    %3 = vector.load %arg7[%c2, %c0_4] : memref<13x16xf32, #tpu.memory_space<vmem>>, vector<1x16xf32>
    %c3 = arith.constant 3 : index
    %c0_5 = arith.constant 0 : index
    %4 = vector.load %arg7[%c3, %c0_5] : memref<13x16xf32, #tpu.memory_space<vmem>>, vector<1x16xf32>
    %5 = vector.broadcast %1 : vector<1x16xf32> to vector<128x16xf32>
    %6 = arith.mulf %5, %0 : vector<128x16xf32>
    %c0_6 = arith.constant 0 : index
    %c0_7 = arith.constant 0 : index
    %c0_8 = arith.constant 0 : index
    %7 = vector.load %arg2[%c0_6, %c0_7, %c0_8] : memref<6x16x32xf32, #tpu.memory_space<vmem>>, vector<1x16x32xf32>
    %8 = vector.shape_cast %7 : vector<1x16x32xf32> to vector<16x32xf32>
    %cst = arith.constant dense<0.000000e+00> : vector<128x32xf32>
    %9 = tpu.matmul %6, %8, %cst {dimension_numbers = #tpu.dot_dimension_numbers<[1], [0], [0], [1], [0, 0, 1, 1], [], []>} : vector<128x16xf32>, vector<16x32xf32>, vector<128x32xf32> -> vector<128x32xf32>
    %c0_9 = arith.constant 0 : index
    %c0_10 = arith.constant 0 : index
    %10 = vector.load %arg5[%c0_9, %c0_10] : memref<18x32xf32, #tpu.memory_space<vmem>>, vector<1x32xf32>
    %11 = vector.broadcast %10 : vector<1x32xf32> to vector<128x32xf32>
    %12 = arith.addf %9, %11 : vector<128x32xf32>
    %cst_11 = arith.constant 0.000000e+00 : f32
    %13 = vector.broadcast %cst_11 : f32 to vector<128x32xf32>
    %14 = arith.cmpf ogt, %12, %13 : vector<128x32xf32>
    %cst_12 = arith.constant 2.000000e-01 : f32
    %15 = vector.broadcast %cst_12 : f32 to vector<128x32xf32>
    %16 = arith.mulf %15, %12 : vector<128x32xf32>
    %17 = arith.select %14, %12, %16 : vector<128x32xi1>, vector<128x32xf32>
    %c0_13 = arith.constant 0 : index
    %c0_14 = arith.constant 0 : index
    %c0_15 = arith.constant 0 : index
    %18 = vector.load %arg3[%c0_13, %c0_14, %c0_15] : memref<12x32x32xf32, #tpu.memory_space<vmem>>, vector<1x32x32xf32>
    %19 = vector.shape_cast %18 : vector<1x32x32xf32> to vector<32x32xf32>
    %cst_16 = arith.constant dense<0.000000e+00> : vector<128x32xf32>
    %20 = tpu.matmul %17, %19, %cst_16 {dimension_numbers = #tpu.dot_dimension_numbers<[1], [0], [0], [1], [0, 0, 1, 1], [], []>} : vector<128x32xf32>, vector<32x32xf32>, vector<128x32xf32> -> vector<128x32xf32>
    %c1_17 = arith.constant 1 : index
    %c0_18 = arith.constant 0 : index
    %21 = vector.load %arg5[%c1_17, %c0_18] : memref<18x32xf32, #tpu.memory_space<vmem>>, vector<1x32xf32>
    %22 = vector.broadcast %21 : vector<1x32xf32> to vector<128x32xf32>
    %23 = arith.addf %20, %22 : vector<128x32xf32>
    %cst_19 = arith.constant 0.000000e+00 : f32
    %24 = vector.broadcast %cst_19 : f32 to vector<128x32xf32>
    %25 = arith.cmpf ogt, %23, %24 : vector<128x32xf32>
    %cst_20 = arith.constant 2.000000e-01 : f32
    %26 = vector.broadcast %cst_20 : f32 to vector<128x32xf32>
    %27 = arith.mulf %26, %23 : vector<128x32xf32>
    %28 = arith.select %25, %23, %27 : vector<128x32xi1>, vector<128x32xf32>
    %c1_21 = arith.constant 1 : index
    %c0_22 = arith.constant 0 : index
    %c0_23 = arith.constant 0 : index
    %29 = vector.load %arg3[%c1_21, %c0_22, %c0_23] : memref<12x32x32xf32, #tpu.memory_space<vmem>>, vector<1x32x32xf32>
    %30 = vector.shape_cast %29 : vector<1x32x32xf32> to vector<32x32xf32>
    %cst_24 = arith.constant dense<0.000000e+00> : vector<128x32xf32>
    %31 = tpu.matmul %28, %30, %cst_24 {dimension_numbers = #tpu.dot_dimension_numbers<[1], [0], [0], [1], [0, 0, 1, 1], [], []>} : vector<128x32xf32>, vector<32x32xf32>, vector<128x32xf32> -> vector<128x32xf32>
    %c2_25 = arith.constant 2 : index
    %c0_26 = arith.constant 0 : index
    %32 = vector.load %arg5[%c2_25, %c0_26] : memref<18x32xf32, #tpu.memory_space<vmem>>, vector<1x32xf32>
    %33 = vector.broadcast %32 : vector<1x32xf32> to vector<128x32xf32>
    %34 = arith.addf %31, %33 : vector<128x32xf32>
    %cst_27 = arith.constant 0.000000e+00 : f32
    %35 = vector.broadcast %cst_27 : f32 to vector<128x32xf32>
    %36 = arith.cmpf ogt, %34, %35 : vector<128x32xf32>
    %cst_28 = arith.constant 2.000000e-01 : f32
    %37 = vector.broadcast %cst_28 : f32 to vector<128x32xf32>
    %38 = arith.mulf %37, %34 : vector<128x32xf32>
    %39 = arith.select %36, %34, %38 : vector<128x32xi1>, vector<128x32xf32>
    %c0_29 = arith.constant 0 : index
    %c0_30 = arith.constant 0 : index
    %c0_31 = arith.constant 0 : index
    %40 = vector.load %arg4[%c0_29, %c0_30, %c0_31] : memref<6x32x16xf32, #tpu.memory_space<vmem>>, vector<1x32x16xf32>
    %41 = vector.shape_cast %40 : vector<1x32x16xf32> to vector<32x16xf32>
    %cst_32 = arith.constant dense<0.000000e+00> : vector<128x16xf32>
    %42 = tpu.matmul %39, %41, %cst_32 {dimension_numbers = #tpu.dot_dimension_numbers<[1], [0], [0], [1], [0, 0, 1, 1], [], []>} : vector<128x32xf32>, vector<32x16xf32>, vector<128x16xf32> -> vector<128x16xf32>
    %c0_33 = arith.constant 0 : index
    %c0_34 = arith.constant 0 : index
    %43 = vector.load %arg6[%c0_33, %c0_34] : memref<6x16xf32, #tpu.memory_space<vmem>>, vector<1x16xf32>
    %44 = vector.broadcast %43 : vector<1x16xf32> to vector<128x16xf32>
    %45 = arith.addf %42, %44 : vector<128x16xf32>
    %46 = vector.broadcast %3 : vector<1x16xf32> to vector<128x16xf32>
    %47 = arith.mulf %46, %45 : vector<128x16xf32>
    %48 = arith.addf %0, %47 : vector<128x16xf32>
    %49 = vector.broadcast %2 : vector<1x16xf32> to vector<128x16xf32>
    %50 = arith.mulf %49, %0 : vector<128x16xf32>
    %c1_35 = arith.constant 1 : index
    %c0_36 = arith.constant 0 : index
    %c0_37 = arith.constant 0 : index
    %51 = vector.load %arg2[%c1_35, %c0_36, %c0_37] : memref<6x16x32xf32, #tpu.memory_space<vmem>>, vector<1x16x32xf32>
    %52 = vector.shape_cast %51 : vector<1x16x32xf32> to vector<16x32xf32>
    %cst_38 = arith.constant dense<0.000000e+00> : vector<128x32xf32>
    %53 = tpu.matmul %50, %52, %cst_38 {dimension_numbers = #tpu.dot_dimension_numbers<[1], [0], [0], [1], [0, 0, 1, 1], [], []>} : vector<128x16xf32>, vector<16x32xf32>, vector<128x32xf32> -> vector<128x32xf32>
    %c3_39 = arith.constant 3 : index
    %c0_40 = arith.constant 0 : index
    %54 = vector.load %arg5[%c3_39, %c0_40] : memref<18x32xf32, #tpu.memory_space<vmem>>, vector<1x32xf32>
    %55 = vector.broadcast %54 : vector<1x32xf32> to vector<128x32xf32>
    %56 = arith.addf %53, %55 : vector<128x32xf32>
    %cst_41 = arith.constant 0.000000e+00 : f32
    %57 = vector.broadcast %cst_41 : f32 to vector<128x32xf32>
    %58 = arith.cmpf ogt, %56, %57 : vector<128x32xf32>
    %cst_42 = arith.constant 2.000000e-01 : f32
    %59 = vector.broadcast %cst_42 : f32 to vector<128x32xf32>
    %60 = arith.mulf %59, %56 : vector<128x32xf32>
    %61 = arith.select %58, %56, %60 : vector<128x32xi1>, vector<128x32xf32>
    %c2_43 = arith.constant 2 : index
    %c0_44 = arith.constant 0 : index
    %c0_45 = arith.constant 0 : index
    %62 = vector.load %arg3[%c2_43, %c0_44, %c0_45] : memref<12x32x32xf32, #tpu.memory_space<vmem>>, vector<1x32x32xf32>
    %63 = vector.shape_cast %62 : vector<1x32x32xf32> to vector<32x32xf32>
    %cst_46 = arith.constant dense<0.000000e+00> : vector<128x32xf32>
    %64 = tpu.matmul %61, %63, %cst_46 {dimension_numbers = #tpu.dot_dimension_numbers<[1], [0], [0], [1], [0, 0, 1, 1], [], []>} : vector<128x32xf32>, vector<32x32xf32>, vector<128x32xf32> -> vector<128x32xf32>
    %c4 = arith.constant 4 : index
    %c0_47 = arith.constant 0 : index
    %65 = vector.load %arg5[%c4, %c0_47] : memref<18x32xf32, #tpu.memory_space<vmem>>, vector<1x32xf32>
    %66 = vector.broadcast %65 : vector<1x32xf32> to vector<128x32xf32>
    %67 = arith.addf %64, %66 : vector<128x32xf32>
    %cst_48 = arith.constant 0.000000e+00 : f32
    %68 = vector.broadcast %cst_48 : f32 to vector<128x32xf32>
    %69 = arith.cmpf ogt, %67, %68 : vector<128x32xf32>
    %cst_49 = arith.constant 2.000000e-01 : f32
    %70 = vector.broadcast %cst_49 : f32 to vector<128x32xf32>
    %71 = arith.mulf %70, %67 : vector<128x32xf32>
    %72 = arith.select %69, %67, %71 : vector<128x32xi1>, vector<128x32xf32>
    %c3_50 = arith.constant 3 : index
    %c0_51 = arith.constant 0 : index
    %c0_52 = arith.constant 0 : index
    %73 = vector.load %arg3[%c3_50, %c0_51, %c0_52] : memref<12x32x32xf32, #tpu.memory_space<vmem>>, vector<1x32x32xf32>
    %74 = vector.shape_cast %73 : vector<1x32x32xf32> to vector<32x32xf32>
    %cst_53 = arith.constant dense<0.000000e+00> : vector<128x32xf32>
    %75 = tpu.matmul %72, %74, %cst_53 {dimension_numbers = #tpu.dot_dimension_numbers<[1], [0], [0], [1], [0, 0, 1, 1], [], []>} : vector<128x32xf32>, vector<32x32xf32>, vector<128x32xf32> -> vector<128x32xf32>
    %c5 = arith.constant 5 : index
    %c0_54 = arith.constant 0 : index
    %76 = vector.load %arg5[%c5, %c0_54] : memref<18x32xf32, #tpu.memory_space<vmem>>, vector<1x32xf32>
    %77 = vector.broadcast %76 : vector<1x32xf32> to vector<128x32xf32>
    %78 = arith.addf %75, %77 : vector<128x32xf32>
    %cst_55 = arith.constant 0.000000e+00 : f32
    %79 = vector.broadcast %cst_55 : f32 to vector<128x32xf32>
    %80 = arith.cmpf ogt, %78, %79 : vector<128x32xf32>
    %cst_56 = arith.constant 2.000000e-01 : f32
    %81 = vector.broadcast %cst_56 : f32 to vector<128x32xf32>
    %82 = arith.mulf %81, %78 : vector<128x32xf32>
    %83 = arith.select %80, %78, %82 : vector<128x32xi1>, vector<128x32xf32>
    %c1_57 = arith.constant 1 : index
    %c0_58 = arith.constant 0 : index
    %c0_59 = arith.constant 0 : index
    %84 = vector.load %arg4[%c1_57, %c0_58, %c0_59] : memref<6x32x16xf32, #tpu.memory_space<vmem>>, vector<1x32x16xf32>
    %85 = vector.shape_cast %84 : vector<1x32x16xf32> to vector<32x16xf32>
    %cst_60 = arith.constant dense<0.000000e+00> : vector<128x16xf32>
    %86 = tpu.matmul %83, %85, %cst_60 {dimension_numbers = #tpu.dot_dimension_numbers<[1], [0], [0], [1], [0, 0, 1, 1], [], []>} : vector<128x32xf32>, vector<32x16xf32>, vector<128x16xf32> -> vector<128x16xf32>
    %c1_61 = arith.constant 1 : index
    %c0_62 = arith.constant 0 : index
    %87 = vector.load %arg6[%c1_61, %c0_62] : memref<6x16xf32, #tpu.memory_space<vmem>>, vector<1x16xf32>
    %88 = vector.broadcast %87 : vector<1x16xf32> to vector<128x16xf32>
    %89 = arith.addf %86, %88 : vector<128x16xf32>
    %90 = vector.broadcast %4 : vector<1x16xf32> to vector<128x16xf32>
    %91 = arith.mulf %90, %89 : vector<128x16xf32>
    %92 = arith.addf %48, %91 : vector<128x16xf32>
    %c4_63 = arith.constant 4 : index
    %c0_64 = arith.constant 0 : index
    %93 = vector.load %arg7[%c4_63, %c0_64] : memref<13x16xf32, #tpu.memory_space<vmem>>, vector<1x16xf32>
    %c5_65 = arith.constant 5 : index
    %c0_66 = arith.constant 0 : index
    %94 = vector.load %arg7[%c5_65, %c0_66] : memref<13x16xf32, #tpu.memory_space<vmem>>, vector<1x16xf32>
    %c6 = arith.constant 6 : index
    %c0_67 = arith.constant 0 : index
    %95 = vector.load %arg7[%c6, %c0_67] : memref<13x16xf32, #tpu.memory_space<vmem>>, vector<1x16xf32>
    %c7 = arith.constant 7 : index
    %c0_68 = arith.constant 0 : index
    %96 = vector.load %arg7[%c7, %c0_68] : memref<13x16xf32, #tpu.memory_space<vmem>>, vector<1x16xf32>
    %97 = vector.broadcast %93 : vector<1x16xf32> to vector<128x16xf32>
    %98 = arith.mulf %97, %92 : vector<128x16xf32>
    %c2_69 = arith.constant 2 : index
    %c0_70 = arith.constant 0 : index
    %c0_71 = arith.constant 0 : index
    %99 = vector.load %arg2[%c2_69, %c0_70, %c0_71] : memref<6x16x32xf32, #tpu.memory_space<vmem>>, vector<1x16x32xf32>
    %100 = vector.shape_cast %99 : vector<1x16x32xf32> to vector<16x32xf32>
    %cst_72 = arith.constant dense<0.000000e+00> : vector<128x32xf32>
    %101 = tpu.matmul %98, %100, %cst_72 {dimension_numbers = #tpu.dot_dimension_numbers<[1], [0], [0], [1], [0, 0, 1, 1], [], []>} : vector<128x16xf32>, vector<16x32xf32>, vector<128x32xf32> -> vector<128x32xf32>
    %c6_73 = arith.constant 6 : index
    %c0_74 = arith.constant 0 : index
    %102 = vector.load %arg5[%c6_73, %c0_74] : memref<18x32xf32, #tpu.memory_space<vmem>>, vector<1x32xf32>
    %103 = vector.broadcast %102 : vector<1x32xf32> to vector<128x32xf32>
    %104 = arith.addf %101, %103 : vector<128x32xf32>
    %cst_75 = arith.constant 0.000000e+00 : f32
    %105 = vector.broadcast %cst_75 : f32 to vector<128x32xf32>
    %106 = arith.cmpf ogt, %104, %105 : vector<128x32xf32>
    %cst_76 = arith.constant 2.000000e-01 : f32
    %107 = vector.broadcast %cst_76 : f32 to vector<128x32xf32>
    %108 = arith.mulf %107, %104 : vector<128x32xf32>
    %109 = arith.select %106, %104, %108 : vector<128x32xi1>, vector<128x32xf32>
    %c4_77 = arith.constant 4 : index
    %c0_78 = arith.constant 0 : index
    %c0_79 = arith.constant 0 : index
    %110 = vector.load %arg3[%c4_77, %c0_78, %c0_79] : memref<12x32x32xf32, #tpu.memory_space<vmem>>, vector<1x32x32xf32>
    %111 = vector.shape_cast %110 : vector<1x32x32xf32> to vector<32x32xf32>
    %cst_80 = arith.constant dense<0.000000e+00> : vector<128x32xf32>
    %112 = tpu.matmul %109, %111, %cst_80 {dimension_numbers = #tpu.dot_dimension_numbers<[1], [0], [0], [1], [0, 0, 1, 1], [], []>} : vector<128x32xf32>, vector<32x32xf32>, vector<128x32xf32> -> vector<128x32xf32>
    %c7_81 = arith.constant 7 : index
    %c0_82 = arith.constant 0 : index
    %113 = vector.load %arg5[%c7_81, %c0_82] : memref<18x32xf32, #tpu.memory_space<vmem>>, vector<1x32xf32>
    %114 = vector.broadcast %113 : vector<1x32xf32> to vector<128x32xf32>
    %115 = arith.addf %112, %114 : vector<128x32xf32>
    %cst_83 = arith.constant 0.000000e+00 : f32
    %116 = vector.broadcast %cst_83 : f32 to vector<128x32xf32>
    %117 = arith.cmpf ogt, %115, %116 : vector<128x32xf32>
    %cst_84 = arith.constant 2.000000e-01 : f32
    %118 = vector.broadcast %cst_84 : f32 to vector<128x32xf32>
    %119 = arith.mulf %118, %115 : vector<128x32xf32>
    %120 = arith.select %117, %115, %119 : vector<128x32xi1>, vector<128x32xf32>
    %c5_85 = arith.constant 5 : index
    %c0_86 = arith.constant 0 : index
    %c0_87 = arith.constant 0 : index
    %121 = vector.load %arg3[%c5_85, %c0_86, %c0_87] : memref<12x32x32xf32, #tpu.memory_space<vmem>>, vector<1x32x32xf32>
    %122 = vector.shape_cast %121 : vector<1x32x32xf32> to vector<32x32xf32>
    %cst_88 = arith.constant dense<0.000000e+00> : vector<128x32xf32>
    %123 = tpu.matmul %120, %122, %cst_88 {dimension_numbers = #tpu.dot_dimension_numbers<[1], [0], [0], [1], [0, 0, 1, 1], [], []>} : vector<128x32xf32>, vector<32x32xf32>, vector<128x32xf32> -> vector<128x32xf32>
    %c8 = arith.constant 8 : index
    %c0_89 = arith.constant 0 : index
    %124 = vector.load %arg5[%c8, %c0_89] : memref<18x32xf32, #tpu.memory_space<vmem>>, vector<1x32xf32>
    %125 = vector.broadcast %124 : vector<1x32xf32> to vector<128x32xf32>
    %126 = arith.addf %123, %125 : vector<128x32xf32>
    %cst_90 = arith.constant 0.000000e+00 : f32
    %127 = vector.broadcast %cst_90 : f32 to vector<128x32xf32>
    %128 = arith.cmpf ogt, %126, %127 : vector<128x32xf32>
    %cst_91 = arith.constant 2.000000e-01 : f32
    %129 = vector.broadcast %cst_91 : f32 to vector<128x32xf32>
    %130 = arith.mulf %129, %126 : vector<128x32xf32>
    %131 = arith.select %128, %126, %130 : vector<128x32xi1>, vector<128x32xf32>
    %c2_92 = arith.constant 2 : index
    %c0_93 = arith.constant 0 : index
    %c0_94 = arith.constant 0 : index
    %132 = vector.load %arg4[%c2_92, %c0_93, %c0_94] : memref<6x32x16xf32, #tpu.memory_space<vmem>>, vector<1x32x16xf32>
    %133 = vector.shape_cast %132 : vector<1x32x16xf32> to vector<32x16xf32>
    %cst_95 = arith.constant dense<0.000000e+00> : vector<128x16xf32>
    %134 = tpu.matmul %131, %133, %cst_95 {dimension_numbers = #tpu.dot_dimension_numbers<[1], [0], [0], [1], [0, 0, 1, 1], [], []>} : vector<128x32xf32>, vector<32x16xf32>, vector<128x16xf32> -> vector<128x16xf32>
    %c2_96 = arith.constant 2 : index
    %c0_97 = arith.constant 0 : index
    %135 = vector.load %arg6[%c2_96, %c0_97] : memref<6x16xf32, #tpu.memory_space<vmem>>, vector<1x16xf32>
    %136 = vector.broadcast %135 : vector<1x16xf32> to vector<128x16xf32>
    %137 = arith.addf %134, %136 : vector<128x16xf32>
    %138 = vector.broadcast %95 : vector<1x16xf32> to vector<128x16xf32>
    %139 = arith.mulf %138, %137 : vector<128x16xf32>
    %140 = arith.addf %92, %139 : vector<128x16xf32>
    %141 = vector.broadcast %94 : vector<1x16xf32> to vector<128x16xf32>
    %142 = arith.mulf %141, %92 : vector<128x16xf32>
    %c3_98 = arith.constant 3 : index
    %c0_99 = arith.constant 0 : index
    %c0_100 = arith.constant 0 : index
    %143 = vector.load %arg2[%c3_98, %c0_99, %c0_100] : memref<6x16x32xf32, #tpu.memory_space<vmem>>, vector<1x16x32xf32>
    %144 = vector.shape_cast %143 : vector<1x16x32xf32> to vector<16x32xf32>
    %cst_101 = arith.constant dense<0.000000e+00> : vector<128x32xf32>
    %145 = tpu.matmul %142, %144, %cst_101 {dimension_numbers = #tpu.dot_dimension_numbers<[1], [0], [0], [1], [0, 0, 1, 1], [], []>} : vector<128x16xf32>, vector<16x32xf32>, vector<128x32xf32> -> vector<128x32xf32>
    %c9 = arith.constant 9 : index
    %c0_102 = arith.constant 0 : index
    %146 = vector.load %arg5[%c9, %c0_102] : memref<18x32xf32, #tpu.memory_space<vmem>>, vector<1x32xf32>
    %147 = vector.broadcast %146 : vector<1x32xf32> to vector<128x32xf32>
    %148 = arith.addf %145, %147 : vector<128x32xf32>
    %cst_103 = arith.constant 0.000000e+00 : f32
    %149 = vector.broadcast %cst_103 : f32 to vector<128x32xf32>
    %150 = arith.cmpf ogt, %148, %149 : vector<128x32xf32>
    %cst_104 = arith.constant 2.000000e-01 : f32
    %151 = vector.broadcast %cst_104 : f32 to vector<128x32xf32>
    %152 = arith.mulf %151, %148 : vector<128x32xf32>
    %153 = arith.select %150, %148, %152 : vector<128x32xi1>, vector<128x32xf32>
    %c6_105 = arith.constant 6 : index
    %c0_106 = arith.constant 0 : index
    %c0_107 = arith.constant 0 : index
    %154 = vector.load %arg3[%c6_105, %c0_106, %c0_107] : memref<12x32x32xf32, #tpu.memory_space<vmem>>, vector<1x32x32xf32>
    %155 = vector.shape_cast %154 : vector<1x32x32xf32> to vector<32x32xf32>
    %cst_108 = arith.constant dense<0.000000e+00> : vector<128x32xf32>
    %156 = tpu.matmul %153, %155, %cst_108 {dimension_numbers = #tpu.dot_dimension_numbers<[1], [0], [0], [1], [0, 0, 1, 1], [], []>} : vector<128x32xf32>, vector<32x32xf32>, vector<128x32xf32> -> vector<128x32xf32>
    %c10 = arith.constant 10 : index
    %c0_109 = arith.constant 0 : index
    %157 = vector.load %arg5[%c10, %c0_109] : memref<18x32xf32, #tpu.memory_space<vmem>>, vector<1x32xf32>
    %158 = vector.broadcast %157 : vector<1x32xf32> to vector<128x32xf32>
    %159 = arith.addf %156, %158 : vector<128x32xf32>
    %cst_110 = arith.constant 0.000000e+00 : f32
    %160 = vector.broadcast %cst_110 : f32 to vector<128x32xf32>
    %161 = arith.cmpf ogt, %159, %160 : vector<128x32xf32>
    %cst_111 = arith.constant 2.000000e-01 : f32
    %162 = vector.broadcast %cst_111 : f32 to vector<128x32xf32>
    %163 = arith.mulf %162, %159 : vector<128x32xf32>
    %164 = arith.select %161, %159, %163 : vector<128x32xi1>, vector<128x32xf32>
    %c7_112 = arith.constant 7 : index
    %c0_113 = arith.constant 0 : index
    %c0_114 = arith.constant 0 : index
    %165 = vector.load %arg3[%c7_112, %c0_113, %c0_114] : memref<12x32x32xf32, #tpu.memory_space<vmem>>, vector<1x32x32xf32>
    %166 = vector.shape_cast %165 : vector<1x32x32xf32> to vector<32x32xf32>
    %cst_115 = arith.constant dense<0.000000e+00> : vector<128x32xf32>
    %167 = tpu.matmul %164, %166, %cst_115 {dimension_numbers = #tpu.dot_dimension_numbers<[1], [0], [0], [1], [0, 0, 1, 1], [], []>} : vector<128x32xf32>, vector<32x32xf32>, vector<128x32xf32> -> vector<128x32xf32>
    %c11 = arith.constant 11 : index
    %c0_116 = arith.constant 0 : index
    %168 = vector.load %arg5[%c11, %c0_116] : memref<18x32xf32, #tpu.memory_space<vmem>>, vector<1x32xf32>
    %169 = vector.broadcast %168 : vector<1x32xf32> to vector<128x32xf32>
    %170 = arith.addf %167, %169 : vector<128x32xf32>
    %cst_117 = arith.constant 0.000000e+00 : f32
    %171 = vector.broadcast %cst_117 : f32 to vector<128x32xf32>
    %172 = arith.cmpf ogt, %170, %171 : vector<128x32xf32>
    %cst_118 = arith.constant 2.000000e-01 : f32
    %173 = vector.broadcast %cst_118 : f32 to vector<128x32xf32>
    %174 = arith.mulf %173, %170 : vector<128x32xf32>
    %175 = arith.select %172, %170, %174 : vector<128x32xi1>, vector<128x32xf32>
    %c3_119 = arith.constant 3 : index
    %c0_120 = arith.constant 0 : index
    %c0_121 = arith.constant 0 : index
    %176 = vector.load %arg4[%c3_119, %c0_120, %c0_121] : memref<6x32x16xf32, #tpu.memory_space<vmem>>, vector<1x32x16xf32>
    %177 = vector.shape_cast %176 : vector<1x32x16xf32> to vector<32x16xf32>
    %cst_122 = arith.constant dense<0.000000e+00> : vector<128x16xf32>
    %178 = tpu.matmul %175, %177, %cst_122 {dimension_numbers = #tpu.dot_dimension_numbers<[1], [0], [0], [1], [0, 0, 1, 1], [], []>} : vector<128x32xf32>, vector<32x16xf32>, vector<128x16xf32> -> vector<128x16xf32>
    %c3_123 = arith.constant 3 : index
    %c0_124 = arith.constant 0 : index
    %179 = vector.load %arg6[%c3_123, %c0_124] : memref<6x16xf32, #tpu.memory_space<vmem>>, vector<1x16xf32>
    %180 = vector.broadcast %179 : vector<1x16xf32> to vector<128x16xf32>
    %181 = arith.addf %178, %180 : vector<128x16xf32>
    %182 = vector.broadcast %96 : vector<1x16xf32> to vector<128x16xf32>
    %183 = arith.mulf %182, %181 : vector<128x16xf32>
    %184 = arith.addf %140, %183 : vector<128x16xf32>
    %c8_125 = arith.constant 8 : index
    %c0_126 = arith.constant 0 : index
    %185 = vector.load %arg7[%c8_125, %c0_126] : memref<13x16xf32, #tpu.memory_space<vmem>>, vector<1x16xf32>
    %c9_127 = arith.constant 9 : index
    %c0_128 = arith.constant 0 : index
    %186 = vector.load %arg7[%c9_127, %c0_128] : memref<13x16xf32, #tpu.memory_space<vmem>>, vector<1x16xf32>
    %c10_129 = arith.constant 10 : index
    %c0_130 = arith.constant 0 : index
    %187 = vector.load %arg7[%c10_129, %c0_130] : memref<13x16xf32, #tpu.memory_space<vmem>>, vector<1x16xf32>
    %c11_131 = arith.constant 11 : index
    %c0_132 = arith.constant 0 : index
    %188 = vector.load %arg7[%c11_131, %c0_132] : memref<13x16xf32, #tpu.memory_space<vmem>>, vector<1x16xf32>
    %189 = vector.broadcast %185 : vector<1x16xf32> to vector<128x16xf32>
    %190 = arith.mulf %189, %184 : vector<128x16xf32>
    %c4_133 = arith.constant 4 : index
    %c0_134 = arith.constant 0 : index
    %c0_135 = arith.constant 0 : index
    %191 = vector.load %arg2[%c4_133, %c0_134, %c0_135] : memref<6x16x32xf32, #tpu.memory_space<vmem>>, vector<1x16x32xf32>
    %192 = vector.shape_cast %191 : vector<1x16x32xf32> to vector<16x32xf32>
    %cst_136 = arith.constant dense<0.000000e+00> : vector<128x32xf32>
    %193 = tpu.matmul %190, %192, %cst_136 {dimension_numbers = #tpu.dot_dimension_numbers<[1], [0], [0], [1], [0, 0, 1, 1], [], []>} : vector<128x16xf32>, vector<16x32xf32>, vector<128x32xf32> -> vector<128x32xf32>
    %c12 = arith.constant 12 : index
    %c0_137 = arith.constant 0 : index
    %194 = vector.load %arg5[%c12, %c0_137] : memref<18x32xf32, #tpu.memory_space<vmem>>, vector<1x32xf32>
    %195 = vector.broadcast %194 : vector<1x32xf32> to vector<128x32xf32>
    %196 = arith.addf %193, %195 : vector<128x32xf32>
    %cst_138 = arith.constant 0.000000e+00 : f32
    %197 = vector.broadcast %cst_138 : f32 to vector<128x32xf32>
    %198 = arith.cmpf ogt, %196, %197 : vector<128x32xf32>
    %cst_139 = arith.constant 2.000000e-01 : f32
    %199 = vector.broadcast %cst_139 : f32 to vector<128x32xf32>
    %200 = arith.mulf %199, %196 : vector<128x32xf32>
    %201 = arith.select %198, %196, %200 : vector<128x32xi1>, vector<128x32xf32>
    %c8_140 = arith.constant 8 : index
    %c0_141 = arith.constant 0 : index
    %c0_142 = arith.constant 0 : index
    %202 = vector.load %arg3[%c8_140, %c0_141, %c0_142] : memref<12x32x32xf32, #tpu.memory_space<vmem>>, vector<1x32x32xf32>
    %203 = vector.shape_cast %202 : vector<1x32x32xf32> to vector<32x32xf32>
    %cst_143 = arith.constant dense<0.000000e+00> : vector<128x32xf32>
    %204 = tpu.matmul %201, %203, %cst_143 {dimension_numbers = #tpu.dot_dimension_numbers<[1], [0], [0], [1], [0, 0, 1, 1], [], []>} : vector<128x32xf32>, vector<32x32xf32>, vector<128x32xf32> -> vector<128x32xf32>
    %c13 = arith.constant 13 : index
    %c0_144 = arith.constant 0 : index
    %205 = vector.load %arg5[%c13, %c0_144] : memref<18x32xf32, #tpu.memory_space<vmem>>, vector<1x32xf32>
    %206 = vector.broadcast %205 : vector<1x32xf32> to vector<128x32xf32>
    %207 = arith.addf %204, %206 : vector<128x32xf32>
    %cst_145 = arith.constant 0.000000e+00 : f32
    %208 = vector.broadcast %cst_145 : f32 to vector<128x32xf32>
    %209 = arith.cmpf ogt, %207, %208 : vector<128x32xf32>
    %cst_146 = arith.constant 2.000000e-01 : f32
    %210 = vector.broadcast %cst_146 : f32 to vector<128x32xf32>
    %211 = arith.mulf %210, %207 : vector<128x32xf32>
    %212 = arith.select %209, %207, %211 : vector<128x32xi1>, vector<128x32xf32>
    %c9_147 = arith.constant 9 : index
    %c0_148 = arith.constant 0 : index
    %c0_149 = arith.constant 0 : index
    %213 = vector.load %arg3[%c9_147, %c0_148, %c0_149] : memref<12x32x32xf32, #tpu.memory_space<vmem>>, vector<1x32x32xf32>
    %214 = vector.shape_cast %213 : vector<1x32x32xf32> to vector<32x32xf32>
    %cst_150 = arith.constant dense<0.000000e+00> : vector<128x32xf32>
    %215 = tpu.matmul %212, %214, %cst_150 {dimension_numbers = #tpu.dot_dimension_numbers<[1], [0], [0], [1], [0, 0, 1, 1], [], []>} : vector<128x32xf32>, vector<32x32xf32>, vector<128x32xf32> -> vector<128x32xf32>
    %c14 = arith.constant 14 : index
    %c0_151 = arith.constant 0 : index
    %216 = vector.load %arg5[%c14, %c0_151] : memref<18x32xf32, #tpu.memory_space<vmem>>, vector<1x32xf32>
    %217 = vector.broadcast %216 : vector<1x32xf32> to vector<128x32xf32>
    %218 = arith.addf %215, %217 : vector<128x32xf32>
    %cst_152 = arith.constant 0.000000e+00 : f32
    %219 = vector.broadcast %cst_152 : f32 to vector<128x32xf32>
    %220 = arith.cmpf ogt, %218, %219 : vector<128x32xf32>
    %cst_153 = arith.constant 2.000000e-01 : f32
    %221 = vector.broadcast %cst_153 : f32 to vector<128x32xf32>
    %222 = arith.mulf %221, %218 : vector<128x32xf32>
    %223 = arith.select %220, %218, %222 : vector<128x32xi1>, vector<128x32xf32>
    %c4_154 = arith.constant 4 : index
    %c0_155 = arith.constant 0 : index
    %c0_156 = arith.constant 0 : index
    %224 = vector.load %arg4[%c4_154, %c0_155, %c0_156] : memref<6x32x16xf32, #tpu.memory_space<vmem>>, vector<1x32x16xf32>
    %225 = vector.shape_cast %224 : vector<1x32x16xf32> to vector<32x16xf32>
    %cst_157 = arith.constant dense<0.000000e+00> : vector<128x16xf32>
    %226 = tpu.matmul %223, %225, %cst_157 {dimension_numbers = #tpu.dot_dimension_numbers<[1], [0], [0], [1], [0, 0, 1, 1], [], []>} : vector<128x32xf32>, vector<32x16xf32>, vector<128x16xf32> -> vector<128x16xf32>
    %c4_158 = arith.constant 4 : index
    %c0_159 = arith.constant 0 : index
    %227 = vector.load %arg6[%c4_158, %c0_159] : memref<6x16xf32, #tpu.memory_space<vmem>>, vector<1x16xf32>
    %228 = vector.broadcast %227 : vector<1x16xf32> to vector<128x16xf32>
    %229 = arith.addf %226, %228 : vector<128x16xf32>
    %230 = vector.broadcast %187 : vector<1x16xf32> to vector<128x16xf32>
    %231 = arith.mulf %230, %229 : vector<128x16xf32>
    %232 = arith.addf %184, %231 : vector<128x16xf32>
    %233 = vector.broadcast %186 : vector<1x16xf32> to vector<128x16xf32>
    %234 = arith.mulf %233, %184 : vector<128x16xf32>
    %c5_160 = arith.constant 5 : index
    %c0_161 = arith.constant 0 : index
    %c0_162 = arith.constant 0 : index
    %235 = vector.load %arg2[%c5_160, %c0_161, %c0_162] : memref<6x16x32xf32, #tpu.memory_space<vmem>>, vector<1x16x32xf32>
    %236 = vector.shape_cast %235 : vector<1x16x32xf32> to vector<16x32xf32>
    %cst_163 = arith.constant dense<0.000000e+00> : vector<128x32xf32>
    %237 = tpu.matmul %234, %236, %cst_163 {dimension_numbers = #tpu.dot_dimension_numbers<[1], [0], [0], [1], [0, 0, 1, 1], [], []>} : vector<128x16xf32>, vector<16x32xf32>, vector<128x32xf32> -> vector<128x32xf32>
    %c15 = arith.constant 15 : index
    %c0_164 = arith.constant 0 : index
    %238 = vector.load %arg5[%c15, %c0_164] : memref<18x32xf32, #tpu.memory_space<vmem>>, vector<1x32xf32>
    %239 = vector.broadcast %238 : vector<1x32xf32> to vector<128x32xf32>
    %240 = arith.addf %237, %239 : vector<128x32xf32>
    %cst_165 = arith.constant 0.000000e+00 : f32
    %241 = vector.broadcast %cst_165 : f32 to vector<128x32xf32>
    %242 = arith.cmpf ogt, %240, %241 : vector<128x32xf32>
    %cst_166 = arith.constant 2.000000e-01 : f32
    %243 = vector.broadcast %cst_166 : f32 to vector<128x32xf32>
    %244 = arith.mulf %243, %240 : vector<128x32xf32>
    %245 = arith.select %242, %240, %244 : vector<128x32xi1>, vector<128x32xf32>
    %c10_167 = arith.constant 10 : index
    %c0_168 = arith.constant 0 : index
    %c0_169 = arith.constant 0 : index
    %246 = vector.load %arg3[%c10_167, %c0_168, %c0_169] : memref<12x32x32xf32, #tpu.memory_space<vmem>>, vector<1x32x32xf32>
    %247 = vector.shape_cast %246 : vector<1x32x32xf32> to vector<32x32xf32>
    %cst_170 = arith.constant dense<0.000000e+00> : vector<128x32xf32>
    %248 = tpu.matmul %245, %247, %cst_170 {dimension_numbers = #tpu.dot_dimension_numbers<[1], [0], [0], [1], [0, 0, 1, 1], [], []>} : vector<128x32xf32>, vector<32x32xf32>, vector<128x32xf32> -> vector<128x32xf32>
    %c16 = arith.constant 16 : index
    %c0_171 = arith.constant 0 : index
    %249 = vector.load %arg5[%c16, %c0_171] : memref<18x32xf32, #tpu.memory_space<vmem>>, vector<1x32xf32>
    %250 = vector.broadcast %249 : vector<1x32xf32> to vector<128x32xf32>
    %251 = arith.addf %248, %250 : vector<128x32xf32>
    %cst_172 = arith.constant 0.000000e+00 : f32
    %252 = vector.broadcast %cst_172 : f32 to vector<128x32xf32>
    %253 = arith.cmpf ogt, %251, %252 : vector<128x32xf32>
    %cst_173 = arith.constant 2.000000e-01 : f32
    %254 = vector.broadcast %cst_173 : f32 to vector<128x32xf32>
    %255 = arith.mulf %254, %251 : vector<128x32xf32>
    %256 = arith.select %253, %251, %255 : vector<128x32xi1>, vector<128x32xf32>
    %c11_174 = arith.constant 11 : index
    %c0_175 = arith.constant 0 : index
    %c0_176 = arith.constant 0 : index
    %257 = vector.load %arg3[%c11_174, %c0_175, %c0_176] : memref<12x32x32xf32, #tpu.memory_space<vmem>>, vector<1x32x32xf32>
    %258 = vector.shape_cast %257 : vector<1x32x32xf32> to vector<32x32xf32>
    %cst_177 = arith.constant dense<0.000000e+00> : vector<128x32xf32>
    %259 = tpu.matmul %256, %258, %cst_177 {dimension_numbers = #tpu.dot_dimension_numbers<[1], [0], [0], [1], [0, 0, 1, 1], [], []>} : vector<128x32xf32>, vector<32x32xf32>, vector<128x32xf32> -> vector<128x32xf32>
    %c17 = arith.constant 17 : index
    %c0_178 = arith.constant 0 : index
    %260 = vector.load %arg5[%c17, %c0_178] : memref<18x32xf32, #tpu.memory_space<vmem>>, vector<1x32xf32>
    %261 = vector.broadcast %260 : vector<1x32xf32> to vector<128x32xf32>
    %262 = arith.addf %259, %261 : vector<128x32xf32>
    %cst_179 = arith.constant 0.000000e+00 : f32
    %263 = vector.broadcast %cst_179 : f32 to vector<128x32xf32>
    %264 = arith.cmpf ogt, %262, %263 : vector<128x32xf32>
    %cst_180 = arith.constant 2.000000e-01 : f32
    %265 = vector.broadcast %cst_180 : f32 to vector<128x32xf32>
    %266 = arith.mulf %265, %262 : vector<128x32xf32>
    %267 = arith.select %264, %262, %266 : vector<128x32xi1>, vector<128x32xf32>
    %c5_181 = arith.constant 5 : index
    %c0_182 = arith.constant 0 : index
    %c0_183 = arith.constant 0 : index
    %268 = vector.load %arg4[%c5_181, %c0_182, %c0_183] : memref<6x32x16xf32, #tpu.memory_space<vmem>>, vector<1x32x16xf32>
    %269 = vector.shape_cast %268 : vector<1x32x16xf32> to vector<32x16xf32>
    %cst_184 = arith.constant dense<0.000000e+00> : vector<128x16xf32>
    %270 = tpu.matmul %267, %269, %cst_184 {dimension_numbers = #tpu.dot_dimension_numbers<[1], [0], [0], [1], [0, 0, 1, 1], [], []>} : vector<128x32xf32>, vector<32x16xf32>, vector<128x16xf32> -> vector<128x16xf32>
    %c5_185 = arith.constant 5 : index
    %c0_186 = arith.constant 0 : index
    %271 = vector.load %arg6[%c5_185, %c0_186] : memref<6x16xf32, #tpu.memory_space<vmem>>, vector<1x16xf32>
    %272 = vector.broadcast %271 : vector<1x16xf32> to vector<128x16xf32>
    %273 = arith.addf %270, %272 : vector<128x16xf32>
    %274 = vector.broadcast %188 : vector<1x16xf32> to vector<128x16xf32>
    %275 = arith.mulf %274, %273 : vector<128x16xf32>
    %276 = arith.addf %232, %275 : vector<128x16xf32>
    %c12_187 = arith.constant 12 : index
    %c0_188 = arith.constant 0 : index
    %277 = vector.load %arg7[%c12_187, %c0_188] : memref<13x16xf32, #tpu.memory_space<vmem>>, vector<1x16xf32>
    %278 = math.exp %277 : vector<1x16xf32>
    %279 = vector.broadcast %278 : vector<1x16xf32> to vector<128x16xf32>
    %280 = arith.mulf %279, %276 : vector<128x16xf32>
    %c0_189 = arith.constant 0 : index
    %c0_190 = arith.constant 0 : index
    %281 = vector.load %arg8[%c0_189, %c0_190] : memref<128x16xf32, #tpu.memory_space<vmem>>, vector<128x16xf32>
    tpu.vector_store %arg8[%c0_189, %c0_190], %280 {strides = array<i32>} : memref<128x16xf32, #tpu.memory_space<vmem>>, vector<128x16xf32>,
    return
  }
  func.func @transform_0(%arg0: i32) -> (i32, i32) {
    %c0_i32 = arith.constant 0 : i32
    %c0_i32_0 = arith.constant 0 : i32
    return %arg0, %c0_i32 : i32, i32
  }
  func.func @transform_1(%arg0: i32) -> (i32, i32, i32) {
    %c0_i32 = arith.constant 0 : i32
    %c0_i32_0 = arith.constant 0 : i32
    %c0_i32_1 = arith.constant 0 : i32
    %c0_i32_2 = arith.constant 0 : i32
    return %c0_i32, %c0_i32_0, %c0_i32_1 : i32, i32, i32
  }
  func.func @transform_2(%arg0: i32) -> (i32, i32, i32) {
    %c0_i32 = arith.constant 0 : i32
    %c0_i32_0 = arith.constant 0 : i32
    %c0_i32_1 = arith.constant 0 : i32
    %c0_i32_2 = arith.constant 0 : i32
    return %c0_i32, %c0_i32_0, %c0_i32_1 : i32, i32, i32
  }
  func.func @transform_3(%arg0: i32) -> (i32, i32, i32) {
    %c0_i32 = arith.constant 0 : i32
    %c0_i32_0 = arith.constant 0 : i32
    %c0_i32_1 = arith.constant 0 : i32
    %c0_i32_2 = arith.constant 0 : i32
    return %c0_i32, %c0_i32_0, %c0_i32_1 : i32, i32, i32
  }
  func.func @transform_4(%arg0: i32) -> (i32, i32) {
    %c0_i32 = arith.constant 0 : i32
    %c0_i32_0 = arith.constant 0 : i32
    %c0_i32_1 = arith.constant 0 : i32
    return %c0_i32, %c0_i32_0 : i32, i32
  }
  func.func @transform_5(%arg0: i32) -> (i32, i32) {
    %c0_i32 = arith.constant 0 : i32
    %c0_i32_0 = arith.constant 0 : i32
    %c0_i32_1 = arith.constant 0 : i32
    return %c0_i32, %c0_i32_0 : i32, i32
  }
  func.func @transform_6(%arg0: i32) -> (i32, i32) {
    %c0_i32 = arith.constant 0 : i32
    %c0_i32_0 = arith.constant 0 : i32
    %c0_i32_1 = arith.constant 0 : i32
    return %c0_i32, %c0_i32_0 : i32, i32
  }
  func.func @transform_7(%arg0: i32) -> (i32, i32) {
    %c0_i32 = arith.constant 0 : i32
    %c0_i32_0 = arith.constant 0 : i32
    return %arg0, %c0_i32 : i32, i32
  }
}

</mosaic_0001>

<bundles_post_ra>
// kernel: tpu_custom_call.1
= control target key start
LH: loop header
LB: loop body
LE: loop exit
PB: predicated region body
PF: predicated region fallthrough
CT: control target
= control target key end

     0   :  { %s8423_s24 = smov 0   ;;  %s10224_s0 = inlined_call_operand.vmem [shape: f32[256,16], index: 0, kind: input, shape index: {}]   ;;  %s10225_s1 = inlined_call_operand.vmem [shape: f32[6,16,32], index: 1, kind: input, shape index: {}]   ;;  %s10226_s2 = inlined_call_operand.vmem [shape: f32[12,32,32], index: 2, kind: input, shape index: {}]   ;;  %s10227_s3 = inlined_call_operand.vmem [shape: f32[6,32,16], index: 3, kind: input, shape index: {}]   ;;  %s10228_s4 = inlined_call_operand.vmem [shape: f32[18,32], index: 4, kind: input, shape index: {}]   ;;  %s10229_s5 = inlined_call_operand.vmem [shape: f32[6,16], index: 5, kind: input, shape index: {}]   ;;  %s10230_s6 = inlined_call_operand.vmem [shape: f32[13,16], index: 6, kind: input, shape index: {}]   ;;  %s10231_s7 = inlined_call_operand.vmem [shape: f32[256,16], index: 7, kind: output, shape index: {}]  }
   0x1 LB: > { %s6464_s25 = sadd.s32 4294967295, %s8381_s24   ;;  %p6468_p0 = scmp.ge.s32.totalorder %s8381_s24, 1  ;;  %s8381_s24 = sphi %s8423_s24, %s17_s24  }
   0x2   : > { %p238_p1 = scmp.lt.s32.totalorder %s8381_s24, 3 }
   0x4   : > { %p239_p2 = pnand %p6468_p0, %p238_p1 }
   0x5   : > { %v322_v0 = vld [vmem:[%s10225_s1] sm:$0xff] (!%p239_p2)  ;;  %v323_v1 = vld [vmem:[%s10225_s1 + $0x8] sm:$0xff] (!%p239_p2)  ;;  %s6469_s30 = sshll.u32 (!%p239_p2), %s6464_s25, 4  ;;  %vm329_vm0 = vcmask (!%p239_p2), 130048   ;;  %v573_v39 = vld [vmem:[%s10226_s2 + $0x10] sm:$0xff] (!%p239_p2)  ;;  %vm580_vm3 = vcmask (!%p239_p2), 261120  }
   0x6   : > { %242 = sbr.rel (%p239_p2) target bundleno = 4095 (0xfff), region = 48  ;;  %v8181_v2 = vpack.c.bf16 (!%p239_p2), %v323_v1, %v322_v0  ;;  %p271_p3 = scmp.lt.s32.totalorder (!%p239_p2), %s6469_s30, 31  ;;  %v6473_v3 = vld [vmem:[%s10230_s6] ss:$0 sm:$0xff] (!%p239_p2)  ;;  %v572_v37 = vld [vmem:[%s10226_s2 + $0x8] sm:$0xff] (!%p239_p2)  ;;  %v574_v40 = vld [vmem:[%s10226_s2 + $0x18] sm:$0xff] (!%p239_p2) }
   0x7   : > { %v571_v36 = vld [vmem:[%s10226_s2] sm:$0xff] (!%p239_p2)  ;;  %v8189_v41 = vpack.c.bf16 (!%p239_p2), %v574_v40, %v573_v39  ;;  %v6509_v43 = vld [vmem:[%s10226_s2 + $0x28] sm:$0xff] (!%p239_p2)  ;;  %v6510_v44 = vld [vmem:[%s10226_s2 + $0x30] sm:$0xff] (!%p239_p2) }
   0x8   : > { %8182 = vmatprep.subr.bf16.mxu0 (!%p239_p2), %v8181_v2  ;;  %v8185_v38 = vpack.c.bf16 (!%p239_p2), %v572_v37, %v571_v36  ;;  %v6508_v42 = vld [vmem:[%s10226_s2 + $0x20] sm:$0xff] (!%p239_p2)  ;;  %v6511_v46 = vld [vmem:[%s10226_s2 + $0x38] sm:$0xff] (!%p239_p2) }
   0x9   : > { %8184 = vmatpush3.bf16.msra.mxu0 (!%p239_p2), %v8181_v2  ;;  %v8193_v45 = vpack.c.bf16 (!%p239_p2), %v6509_v43, %v6508_v42  ;;  %v8197_v47 = vpack.c.bf16 (!%p239_p2), %v6511_v46, %v6510_v44  ;;  %v8557_v48 = vld [vmem:[%s10228_s4] ss:$0 sm:$0xff] (!%p239_p2) }
   0xa   : > { %8186 = vmatprep.subr.bf16.mxu1 (!%p239_p2), %v8185_v38 }
   0xb   : > { %8188 = vmatpush3.bf16.msra.mxu1 (!%p239_p2), %v8185_v38  ;;  %8194 = vmatprep.subr.bf16.mxu0 (!%p239_p2), %v8193_v45 }
   0xc   : > { %8190 = vmatprep.subr.bf16.mxu1 (!%p239_p2), %v8189_v41 }
   0xd   : > { %s10233_s30 = smov (!%p271_p3, %s6469_s30), 31 }
   0xe   : > { %s6470_s8 = sshll.u32 %s10233_s30, 3 }
   0xf   : > { %s8448_s13 = scalar_lea.vmem %s10224_s0, %s6470_s8  ;;  %8192 = vmatpush3.bf16.msra.mxu1 %v8189_v41  ;;  %s10098_s16 = scalar_lea.vmem %s10231_s7, %s6470_s8 }
  0x10   : > { %v8451_v4 = vld [vmem:[%s8448_s13] sm:$0xff]  ;;  %v8454_v5 = vld [vmem:[%s8448_s13 + $0x8] sm:$0xff]  ;;  %v8457_v6 = vld [vmem:[%s8448_s13 + $0x10] sm:$0xff] }
  0x11   : > { %v306_v7 = vmul.f32 %v6473_v3, %v8451_v4  ;;  %v307_v8 = vmul.f32 %v6473_v3, %v8454_v5  ;;  %v8462_v9 = vld [vmem:[%s8448_s13 + $0x18] sm:$0xff]  ;;  %v308_v10 = vmul.f32 %v6473_v3, %v8457_v6  ;;  %v8466_v11 = vld [vmem:[%s8448_s13 + $0x20] sm:$0xff]  ;;  %v8474_v14 = vld [vmem:[%s8448_s13 + $0x28] sm:$0xff] }
  0x12   : > { %v309_v12 = vmul.f32 %v6473_v3, %v8462_v9  ;;  %v310_v13 = vmul.f32 %v6473_v3, %v8466_v11  ;;  %v8477_v15 = vld [vmem:[%s8448_s13 + $0x30] sm:$0xff]  ;;  %v311_v16 = vmul.f32 %v6473_v3, %v8474_v14  ;;  %v8484_v18 = vld [vmem:[%s8448_s13 + $0x38] sm:$0xff]  ;;  %v8487_v19 = vld [vmem:[%s8448_s13 + $0x40] sm:$0xff] }
  0x13   : > { %7441 = vmatprep.mubr.msk.f32.mxu0 %vm329_vm0, %v306_v7  ;;  %v312_v17 = vmul.f32 %v6473_v3, %v8477_v15  ;;  %v313_v20 = vmul.f32 %v6473_v3, %v8484_v18  ;;  %v314_v21 = vmul.f32 %v6473_v3, %v8487_v19  ;;  %v8494_v22 = vld [vmem:[%s8448_s13 + $0x48] sm:$0xff]  ;;  %v8497_v23 = vld [vmem:[%s8448_s13 + $0x50] sm:$0xff]  ;;  %v8504_v26 = vld [vmem:[%s8448_s13 + $0x58] sm:$0xff] }
  0x14   : > { %7442 = vmatmul.mubr.msk.f32.vlgmr.msra.gmra.mrb[0].mxu0 %vm329_vm0, %v307_v8  ;;  %v315_v24 = vmul.f32 %v6473_v3, %v8494_v22  ;;  %v316_v25 = vmul.f32 %v6473_v3, %v8497_v23  ;;  %v8507_v27 = vld [vmem:[%s8448_s13 + $0x60] sm:$0xff]  ;;  %v317_v28 = vmul.f32 %v6473_v3, %v8504_v26  ;;  %v8514_v30 = vld [vmem:[%s8448_s13 + $0x68] sm:$0xff]  ;;  %v8517_v31 = vld [vmem:[%s8448_s13 + $0x70] sm:$0xff] }
  0x15   : > { %7444 = vmatprep.mubr.msk.f32.mxu0 %vm329_vm0, %v308_v10  ;;  %v318_v29 = vmul.f32 %v6473_v3, %v8507_v27  ;;  %v319_v32 = vmul.f32 %v6473_v3, %v8514_v30  ;;  %v320_v33 = vmul.f32 %v6473_v3, %v8517_v31  ;;  %v8524_v34 = vld [vmem:[%s8448_s13 + $0x78] sm:$0xff]  ;;  %8196 = vmatpush3.bf16.msra.mxu0 %v8193_v45 }
  0x16   : > { %v321_v35 = vmul.f32 %v6473_v3, %v8524_v34  ;;  %8198 = vmatprep.subr.bf16.mxu0 %v8197_v47 }
  0x18   : > { %7445 = vmatmul.mubr.msk.f32.gmra.mrb[2].mxu0 %vm329_vm0, %v309_v12 }
  0x19   : > { %7447 = vmatprep.mubr.msk.f32.mxu0 %vm329_vm0, %v310_v13  ;;  %8200 = vmatpush3.bf16.msra.mxu0 %v8197_v47 }
  0x1c   : > { %7448 = vmatmul.mubr.msk.f32.gmra.mrb[4].mxu0 %vm329_vm0, %v311_v16 }
  0x1d   : > { %7450 = vmatprep.mubr.msk.f32.mxu0 %vm329_vm0, %v312_v17 }
  0x20   : > { %7451 = vmatmul.mubr.msk.f32.gmra.mrb[6].mxu0 %vm329_vm0, %v313_v20 }
  0x21   : > { %7453 = vmatprep.mubr.msk.f32.mxu0 %vm329_vm0, %v314_v21 }
  0x24   : > { %7454 = vmatmul.mubr.msk.f32.gmra.mrb[8].mxu0 %vm329_vm0, %v315_v24 }
  0x25   : > { %7456 = vmatprep.mubr.msk.f32.mxu0 %vm329_vm0, %v316_v25 }
  0x28   : > { %7457 = vmatmul.mubr.msk.f32.gmra.mrb[10].mxu0 %vm329_vm0, %v317_v28 }
  0x29   : > { %7459 = vmatprep.mubr.msk.f32.mxu0 %vm329_vm0, %v318_v29 }
  0x2c   : > { %7460 = vmatmul.mubr.msk.f32.gmra.mrb[12].mxu0 %vm329_vm0, %v319_v32 }
  0x2d   : > { %7462 = vmatprep.mubr.msk.f32.mxu0 %vm329_vm0, %v320_v33 }
  0x30   : > { %7463 = vmatmul.mubr.msk.f32.gmra.mrb[14].mxu0 %vm329_vm0, %v321_v35 }
  0xe7   : > { %v7443_v49 = vpop.f32.mrb[0].mxu0 }
  0xe8   : > { %v450_v50 = vadd.f32 %v7443_v49, %v8557_v48  ;;  %v444_v51 = vpop.f32.mrb[1].mxu0 }
  0xe9   : > { %v445_v52 = vadd.f32 %v8557_v48, %v444_v51 }
  0xea   : > { %v540_v53 = vmul.f32 0.2, %v450_v50  ;;  %vm524_vm1 = vcmp.gt.f32.partialorder %v450_v50, 0.0 }
  0xeb   : > { %v7446_v54 = vpop.f32.mrb[2].mxu0  ;;  %vm523_vm2 = vcmp.gt.f32.partialorder %v445_v52, 0.0  ;;  %v539_v55 = vmul.f32 0.2, %v445_v52 }
  0xec   : > { %v460_v56 = vadd.f32 %v7446_v54, %v8557_v48  ;;  %v454_v57 = vpop.f32.mrb[3].mxu0  ;;  %v556_v61 = vsel %vm524_vm1, %v450_v50, %v540_v53 }
  0xed   : > { %v455_v58 = vadd.f32 %v8557_v48, %v454_v57  ;;  %v555_v59 = vsel %vm523_vm2, %v445_v52, %v539_v55 }
  0xee   : > { %v542_v60 = vmul.f32 0.2, %v460_v56  ;;  %7473 = vmatprep.mubr.msk.f32.mxu1 %vm580_vm3, %v555_v59  ;;  %vm526_vm4 = vcmp.gt.f32.partialorder %v460_v56, 0.0 }
  0xef   : > { %vm525_vm5 = vcmp.gt.f32.partialorder %v455_v58, 0.0  ;;  %v541_v62 = vmul.f32 0.2, %v455_v58  ;;  %v7449_v63 = vpop.f32.mrb[4].mxu0  ;;  %7474 = vmatmul.mubr.msk.f32.vlgmr.msra.gmra.mrb[0].mxu1 %vm580_vm3, %v556_v61 }
  0xf0   : > { %v470_v0 = vadd.f32 %v7449_v63, %v8557_v48  ;;  %v464_v1 = vpop.f32.mrb[5].mxu0  ;;  %v558_v8 = vsel %vm526_vm4, %v460_v56, %v542_v60 }
  0xf1   : > { %v465_v2 = vadd.f32 %v8557_v48, %v464_v1  ;;  %v557_v3 = vsel %vm525_vm5, %v455_v58, %v541_v62 }
  0xf2   : > { %v544_v7 = vmul.f32 0.2, %v470_v0  ;;  %7476 = vmatprep.mubr.msk.f32.mxu1 %vm580_vm3, %v557_v3  ;;  %vm528_vm6 = vcmp.gt.f32.partialorder %v470_v0, 0.0 }
  0xf3   : > { %vm527_vm7 = vcmp.gt.f32.partialorder %v465_v2, 0.0  ;;  %v543_v10 = vmul.f32 0.2, %v465_v2  ;;  %v7452_v12 = vpop.f32.mrb[6].mxu0  ;;  %7477 = vmatmul.mubr.msk.f32.gmra.mrb[2].mxu1 %vm580_vm3, %v558_v8  ;;  %v1074_v8 = vld [vmem:[%s10227_s3 + $0x8] sm:$0xff] }
  0xf4   : > { %v480_v13 = vadd.f32 %v7452_v12, %v8557_v48  ;;  %v474_v16 = vpop.f32.mrb[7].mxu0  ;;  %v560_v24 = vsel %vm528_vm6, %v470_v0, %v544_v7  ;;  %v1073_v7 = vld [vmem:[%s10227_s3] sm:$0xff] }
  0xf5   : > { %v475_v17 = vadd.f32 %v8557_v48, %v474_v16  ;;  %v559_v20 = vsel %vm527_vm7, %v465_v2, %v543_v10  ;;  %v6549_v2 = vld [vmem:[%s10225_s1 + $0x18] sm:$0xff]  ;;  %v1075_v10 = vld [vmem:[%s10227_s3 + $0x10] sm:$0xff]  ;;  %v8201_v12 = vpack.c.bf16 %v1074_v8, %v1073_v7 }
  0xf6   : > { %v546_v21 = vmul.f32 0.2, %v480_v13  ;;  %7479 = vmatprep.mubr.msk.f32.mxu1 %vm580_vm3, %v559_v20  ;;  %vm530_vm8 = vcmp.gt.f32.partialorder %v480_v13, 0.0 }
  0xf7   : > { %vm529_vm9 = vcmp.gt.f32.partialorder %v475_v17, 0.0  ;;  %v545_v25 = vmul.f32 0.2, %v475_v17  ;;  %v7455_v28 = vpop.f32.mrb[8].mxu0  ;;  %7480 = vmatmul.mubr.msk.f32.gmra.mrb[4].mxu1 %vm580_vm3, %v560_v24  ;;  %8202 = vmatprep.subr.bf16.mxu1 %v8201_v12 }
  0xf8   : > { %v490_v29 = vadd.f32 %v7455_v28, %v8557_v48  ;;  %v484_v32 = vpop.f32.mrb[9].mxu0  ;;  %v562_v37 = vsel %vm530_vm8, %v480_v13, %v546_v21  ;;  %v1076_v13 = vld [vmem:[%s10227_s3 + $0x18] sm:$0xff]  ;;  %8204 = vmatpush3.bf16.msra.mxu1 %v8201_v12 }
  0xf9   : > { %v485_v33 = vadd.f32 %v8557_v48, %v484_v32  ;;  %v561_v35 = vsel %vm529_vm9, %v475_v17, %v545_v25  ;;  %v8205_v16 = vpack.c.bf16 %v1076_v13, %v1075_v10  ;;  %v8612_v17 = vld [vmem:[%s10228_s4 + $0x1] ss:$0 sm:$0xff] }
  0xfa   : > { %v548_v36 = vmul.f32 0.2, %v490_v29  ;;  %7482 = vmatprep.mubr.msk.f32.mxu1 %vm580_vm3, %v561_v35  ;;  %vm532_vm10 = vcmp.gt.f32.partialorder %v490_v29, 0.0 }
  0xfb   : > { %vm531_vm11 = vcmp.gt.f32.partialorder %v485_v33, 0.0  ;;  %v547_v38 = vmul.f32 0.2, %v485_v33  ;;  %v7458_v39 = vpop.f32.mrb[10].mxu0  ;;  %7483 = vmatmul.mubr.msk.f32.gmra.mrb[6].mxu1 %vm580_vm3, %v562_v37  ;;  %8206 = vmatprep.subr.bf16.mxu1 %v8205_v16 }
  0xfc   : > { %v500_v40 = vadd.f32 %v7458_v39, %v8557_v48  ;;  %v494_v41 = vpop.f32.mrb[11].mxu0  ;;  %v564_v45 = vsel %vm532_vm10, %v490_v29, %v548_v36  ;;  %8208 = vmatpush3.bf16.msra.mxu1 %v8205_v16 }
  0xfd   : > { %v495_v42 = vadd.f32 %v8557_v48, %v494_v41  ;;  %v563_v43 = vsel %vm531_vm11, %v485_v33, %v547_v38 }
  0xfe   : > { %v550_v44 = vmul.f32 0.2, %v500_v40  ;;  %7485 = vmatprep.mubr.msk.f32.mxu1 %vm580_vm3, %v563_v43  ;;  %vm534_vm12 = vcmp.gt.f32.partialorder %v500_v40, 0.0 }
  0xff   : > { %vm533_vm13 = vcmp.gt.f32.partialorder %v495_v42, 0.0  ;;  %v549_v46 = vmul.f32 0.2, %v495_v42  ;;  %v7461_v47 = vpop.f32.mrb[12].mxu0  ;;  %7486 = vmatmul.mubr.msk.f32.gmra.mrb[8].mxu1 %vm580_vm3, %v564_v45 }
 0x100   : > { %v510_v49 = vadd.f32 %v7461_v47, %v8557_v48  ;;  %v504_v50 = vpop.f32.mrb[13].mxu0  ;;  %v566_v54 = vsel %vm534_vm12, %v500_v40, %v550_v44 }
 0x101   : > { %v505_v51 = vadd.f32 %v8557_v48, %v504_v50  ;;  %v565_v52 = vsel %vm533_vm13, %v495_v42, %v549_v46 }
 0x102   : > { %v552_v53 = vmul.f32 0.2, %v510_v49  ;;  %7488 = vmatprep.mubr.msk.f32.mxu1 %vm580_vm3, %v565_v52  ;;  %vm536_vm14 = vcmp.gt.f32.partialorder %v510_v49, 0.0 }
 0x103   : > { %vm535_vm15 = vcmp.gt.f32.partialorder %v505_v51, 0.0  ;;  %v551_v55 = vmul.f32 0.2, %v505_v51  ;;  %v7464_v56 = vpop.f32.mrb[14].mxu0  ;;  %7489 = vmatmul.mubr.msk.f32.gmra.mrb[10].mxu1 %vm580_vm3, %v566_v54 }
 0x104   : > { %v520_v57 = vadd.f32 %v7464_v56, %v8557_v48  ;;  %v514_v58 = vpop.f32.mrb[15].mxu0  ;;  %v568_v62 = vsel %vm536_vm14, %v510_v49, %v552_v53 }
 0x105   : > { %v515_v59 = vadd.f32 %v8557_v48, %v514_v58  ;;  %v567_v60 = vsel %vm535_vm15, %v505_v51, %v551_v55  ;;  %v6548_v48 = vld [vmem:[%s10225_s1 + $0x10] sm:$0xff] }
 0x106   : > { %v554_v61 = vmul.f32 0.2, %v520_v57  ;;  %7491 = vmatprep.mubr.msk.f32.mxu1 %vm580_vm3, %v567_v60  ;;  %vm538_vm1 = vcmp.gt.f32.partialorder %v520_v57, 0.0  ;;  %v8209_v3 = vpack.c.bf16 %v6549_v2, %v6548_v48 }
 0x107   : > { %vm537_vm2 = vcmp.gt.f32.partialorder %v515_v59, 0.0  ;;  %v553_v63 = vmul.f32 0.2, %v515_v59  ;;  %7492 = vmatmul.mubr.msk.f32.gmra.mrb[12].mxu1 %vm580_vm3, %v568_v62 }
 0x108   : > { %v570_v1 = vsel %vm538_vm1, %v520_v57, %v554_v61  ;;  %8210 = vmatprep.subr.bf16.mxu0 %v8209_v3 }
 0x109   : > { %v569_v0 = vsel %vm537_vm2, %v515_v59, %v553_v63 }
 0x10a   : > { %7494 = vmatprep.mubr.msk.f32.mxu1 %vm580_vm3, %v569_v0 }
 0x10b   : > { %7495 = vmatmul.mubr.msk.f32.gmra.mrb[14].mxu1 %vm580_vm3, %v570_v1 }
 0x1c2   : > { %v7475_v20 = vpop.f32.mrb[0].mxu1 }
 0x1c3   : > { %v701_v21 = vadd.f32 %v7475_v20, %v8612_v17  ;;  %v695_v24 = vpop.f32.mrb[1].mxu1 }
 0x1c4   : > { %v696_v25 = vadd.f32 %v8612_v17, %v695_v24 }
 0x1c5   : > { %v791_v28 = vmul.f32 0.2, %v701_v21  ;;  %vm775_vm4 = vcmp.gt.f32.partialorder %v701_v21, 0.0 }
 0x1c6   : > { %vm774_vm5 = vcmp.gt.f32.partialorder %v696_v25, 0.0  ;;  %v790_v29 = vmul.f32 0.2, %v696_v25  ;;  %v7478_v32 = vpop.f32.mrb[2].mxu1 }
 0x1c7   : > { %v711_v33 = vadd.f32 %v7478_v32, %v8612_v17  ;;  %v705_v35 = vpop.f32.mrb[3].mxu1  ;;  %v807_v38 = vsel %vm775_vm4, %v701_v21, %v791_v28 }
 0x1c8   : > { %v706_v36 = vadd.f32 %v8612_v17, %v705_v35  ;;  %v806_v37 = vsel %vm774_vm5, %v696_v25, %v790_v29 }
 0x1c9   : > { %v793_v39 = vmul.f32 0.2, %v711_v33  ;;  %7505 = vmatprep.mubr.msk.f32.mxu0 %vm580_vm3, %v806_v37  ;;  %vm777_vm6 = vcmp.gt.f32.partialorder %v711_v33, 0.0  ;;  %v6547_v37 = vld [vmem:[%s10230_s6 + $0x1] ss:$0 sm:$0xff] }
 0x1ca   : > { %vm776_vm7 = vcmp.gt.f32.partialorder %v706_v36, 0.0  ;;  %v792_v40 = vmul.f32 0.2, %v706_v36  ;;  %v7481_v41 = vpop.f32.mrb[4].mxu1  ;;  %7506 = vmatmul.mubr.msk.f32.vlgmr.msra.gmra.mrb[16].mxu0 %vm580_vm3, %v807_v38 }
 0x1cb   : > { %v721_v42 = vadd.f32 %v7481_v41, %v8612_v17  ;;  %8212 = vmatpush3.bf16.msra.mxu0 %v8209_v3  ;;  %v715_v43 = vpop.f32.mrb[5].mxu1  ;;  %v809_v47 = vsel %vm777_vm6, %v711_v33, %v793_v39 }
 0x1cc   : > { %v716_v44 = vadd.f32 %v8612_v17, %v715_v43  ;;  %v808_v45 = vsel %vm776_vm7, %v706_v36, %v792_v40  ;;  %v1315_v43 = vmul.f32 %v6547_v37, %v8451_v4  ;;  %v1319_v4 = vmul.f32 %v6547_v37, %v8466_v11 }
 0x1cd   : > { %v795_v46 = vmul.f32 0.2, %v721_v42  ;;  %7508 = vmatprep.mubr.msk.f32.mxu0 %vm580_vm3, %v808_v45  ;;  %vm779_vm8 = vcmp.gt.f32.partialorder %v721_v42, 0.0  ;;  %v1324_v11 = vmul.f32 %v6547_v37, %v8494_v22  ;;  %v1329_v22 = vmul.f32 %v6547_v37, %v8517_v31  ;;  %v8690_v31 = vld [vmem:[%s10228_s4 + $0x2] ss:$0 sm:$0xff] }
 0x1ce   : > { %vm778_vm9 = vcmp.gt.f32.partialorder %v716_v44, 0.0  ;;  %v794_v49 = vmul.f32 0.2, %v716_v44  ;;  %v7484_v50 = vpop.f32.mrb[6].mxu1  ;;  %7509 = vmatmul.mubr.msk.f32.gmra.mrb[18].mxu0 %vm580_vm3, %v809_v47  ;;  %v1318_v47 = vmul.f32 %v6547_v37, %v8462_v9  ;;  %v1323_v9 = vmul.f32 %v6547_v37, %v8487_v19 }
 0x1cf   : > { %v731_v51 = vadd.f32 %v7484_v50, %v8612_v17  ;;  %v725_v52 = vpop.f32.mrb[7].mxu1  ;;  %v811_v56 = vsel %vm779_vm8, %v721_v42, %v795_v46  ;;  %v1316_v46 = vmul.f32 %v6547_v37, %v8454_v5  ;;  %v1321_v5 = vmul.f32 %v6547_v37, %v8477_v15 }
 0x1d0   : > { %v726_v53 = vadd.f32 %v8612_v17, %v725_v52  ;;  %v810_v54 = vsel %vm778_vm9, %v716_v44, %v794_v49  ;;  %v1320_v49 = vmul.f32 %v6547_v37, %v8474_v14  ;;  %v1325_v14 = vmul.f32 %v6547_v37, %v8497_v23 }
 0x1d1   : > { %v797_v55 = vmul.f32 0.2, %v731_v51  ;;  %7511 = vmatprep.mubr.msk.f32.mxu0 %vm580_vm3, %v810_v54  ;;  %vm781_vm10 = vcmp.gt.f32.partialorder %v731_v51, 0.0  ;;  %v1326_v15 = vmul.f32 %v6547_v37, %v8504_v26  ;;  %v1328_v19 = vmul.f32 %v6547_v37, %v8514_v30  ;;  %v6567_v26 = vld [vmem:[%s10226_s2 + $0x40] sm:$0xff]  ;;  %v6569_v54 = vld [vmem:[%s10226_s2 + $0x50] sm:$0xff] }
 0x1d2   : > { %vm780_vm11 = vcmp.gt.f32.partialorder %v726_v53, 0.0  ;;  %v796_v57 = vmul.f32 0.2, %v726_v53  ;;  %v7487_v58 = vpop.f32.mrb[8].mxu1  ;;  %7512 = vmatmul.mubr.msk.f32.gmra.mrb[20].mxu0 %vm580_vm3, %v811_v56  ;;  %v1330_v23 = vmul.f32 %v6547_v37, %v8524_v34 }
 0x1d3   : > { %v741_v59 = vadd.f32 %v7487_v58, %v8612_v17  ;;  %v735_v60 = vpop.f32.mrb[9].mxu1  ;;  %v813_v0 = vsel %vm781_vm10, %v731_v51, %v797_v55  ;;  %v6570_v55 = vld [vmem:[%s10226_s2 + $0x58] sm:$0xff] }
 0x1d4   : > { %v736_v61 = vadd.f32 %v8612_v17, %v735_v60  ;;  %v812_v62 = vsel %vm780_vm11, %v726_v53, %v796_v57 }
 0x1d5   : > { %v799_v63 = vmul.f32 0.2, %v741_v59  ;;  %7514 = vmatprep.mubr.msk.f32.mxu0 %vm580_vm3, %v812_v62  ;;  %vm783_vm12 = vcmp.gt.f32.partialorder %v741_v59, 0.0  ;;  %v8217_v62 = vpack.c.bf16 %v6570_v55, %v6569_v54 }
 0x1d6   : > { %vm782_vm13 = vcmp.gt.f32.partialorder %v736_v61, 0.0  ;;  %v798_v1 = vmul.f32 0.2, %v736_v61  ;;  %v7490_v48 = vpop.f32.mrb[10].mxu1  ;;  %7515 = vmatmul.mubr.msk.f32.gmra.mrb[22].mxu0 %vm580_vm3, %v813_v0 }
 0x1d7   : > { %v751_v2 = vadd.f32 %v7490_v48, %v8612_v17  ;;  %v745_v3 = vpop.f32.mrb[11].mxu1  ;;  %v815_v12 = vsel %vm783_vm12, %v741_v59, %v799_v63 }
 0x1d8   : > { %v746_v7 = vadd.f32 %v8612_v17, %v745_v3  ;;  %v814_v8 = vsel %vm782_vm13, %v736_v61, %v798_v1 }
 0x1d9   : > { %v801_v10 = vmul.f32 0.2, %v751_v2  ;;  %7517 = vmatprep.mubr.msk.f32.mxu0 %vm580_vm3, %v814_v8  ;;  %vm785_vm14 = vcmp.gt.f32.partialorder %v751_v2, 0.0 }
 0x1da   : > { %vm784_vm15 = vcmp.gt.f32.partialorder %v746_v7, 0.0  ;;  %v800_v13 = vmul.f32 0.2, %v746_v7  ;;  %v7493_v16 = vpop.f32.mrb[12].mxu1  ;;  %7518 = vmatmul.mubr.msk.f32.gmra.mrb[24].mxu0 %vm580_vm3, %v815_v12 }
 0x1db   : > { %v761_v20 = vadd.f32 %v7493_v16, %v8612_v17  ;;  %v755_v21 = vpop.f32.mrb[13].mxu1  ;;  %v817_v29 = vsel %vm785_vm14, %v751_v2, %v801_v10 }
 0x1dc   : > { %v756_v24 = vadd.f32 %v8612_v17, %v755_v21  ;;  %v816_v25 = vsel %vm784_vm15, %v746_v7, %v800_v13 }
 0x1dd   : > { %v803_v28 = vmul.f32 0.2, %v761_v20  ;;  %7520 = vmatprep.mubr.msk.f32.mxu0 %vm580_vm3, %v816_v25  ;;  %vm787_vm1 = vcmp.gt.f32.partialorder %v761_v20, 0.0 }
 0x1de   : > { %vm786_vm2 = vcmp.gt.f32.partialorder %v756_v24, 0.0  ;;  %v802_v32 = vmul.f32 0.2, %v756_v24  ;;  %v7496_v33 = vpop.f32.mrb[14].mxu1  ;;  %7521 = vmatmul.mubr.msk.f32.gmra.mrb[26].mxu0 %vm580_vm3, %v817_v29 }
 0x1df   : > { %v771_v35 = vadd.f32 %v7496_v33, %v8612_v17  ;;  %v765_v36 = vpop.f32.mrb[15].mxu1  ;;  %v819_v41 = vsel %vm787_vm1, %v761_v20, %v803_v28 }
 0x1e0   : > { %v766_v38 = vadd.f32 %v8612_v17, %v765_v36  ;;  %v818_v39 = vsel %vm786_vm2, %v756_v24, %v802_v32  ;;  %v1317_v17 = vmul.f32 %v6547_v37, %v8457_v6  ;;  %v1322_v6 = vmul.f32 %v6547_v37, %v8484_v18 }
 0x1e1   : > { %v805_v40 = vmul.f32 0.2, %v771_v35  ;;  %7523 = vmatprep.mubr.msk.f32.mxu0 %vm580_vm3, %v818_v39  ;;  %vm789_vm4 = vcmp.gt.f32.partialorder %v771_v35, 0.0  ;;  %v1327_v18 = vmul.f32 %v6547_v37, %v8507_v27  ;;  %v6568_v27 = vld [vmem:[%s10226_s2 + $0x48] sm:$0xff] }
 0x1e2   : > { %vm788_vm5 = vcmp.gt.f32.partialorder %v766_v38, 0.0  ;;  %v804_v42 = vmul.f32 0.2, %v766_v38  ;;  %7524 = vmatmul.mubr.msk.f32.gmra.mrb[28].mxu0 %vm580_vm3, %v819_v41  ;;  %v8213_v30 = vpack.c.bf16 %v6568_v27, %v6567_v26 }
 0x1e3   : > { %v821_v45 = vsel %vm789_vm4, %v771_v35, %v805_v40 }
 0x1e4   : > { %v820_v44 = vsel %vm788_vm5, %v766_v38, %v804_v42  ;;  %8214 = vmatprep.subr.bf16.mxu1 %v8213_v30 }
 0x1e5   : > { %7526 = vmatprep.mubr.msk.f32.mxu0 %vm580_vm3, %v820_v44 }
 0x1e6   : > { %7527 = vmatmul.mubr.msk.f32.gmra.mrb[30].mxu0 %vm580_vm3, %v821_v45 }
 0x1e7   : > { %7565 = vmatprep.mubr.msk.f32.mxu0 %vm329_vm0, %v1315_v43 }
 0x1ea   : > { %7566 = vmatmul.mubr.msk.f32.vlgmr.msra.gmra.mrb[32].mxu0 %vm329_vm0, %v1316_v46 }
 0x1eb   : > { %7568 = vmatprep.mubr.msk.f32.mxu0 %vm329_vm0, %v1317_v17 }
 0x1ee   : > { %7569 = vmatmul.mubr.msk.f32.gmra.mrb[34].mxu0 %vm329_vm0, %v1318_v47 }
 0x1ef   : > { %7571 = vmatprep.mubr.msk.f32.mxu0 %vm329_vm0, %v1319_v4 }
 0x1f2   : > { %7572 = vmatmul.mubr.msk.f32.gmra.mrb[36].mxu0 %vm329_vm0, %v1320_v49 }
 0x1f3   : > { %7574 = vmatprep.mubr.msk.f32.mxu0 %vm329_vm0, %v1321_v5 }
 0x1f6   : > { %7575 = vmatmul.mubr.msk.f32.gmra.mrb[38].mxu0 %vm329_vm0, %v1322_v6 }
 0x1f7   : > { %7577 = vmatprep.mubr.msk.f32.mxu0 %vm329_vm0, %v1323_v9 }
 0x1fa   : > { %7578 = vmatmul.mubr.msk.f32.gmra.mrb[40].mxu0 %vm329_vm0, %v1324_v11 }
 0x1fb   : > { %7580 = vmatprep.mubr.msk.f32.mxu0 %vm329_vm0, %v1325_v14 }
 0x1fe   : > { %7581 = vmatmul.mubr.msk.f32.gmra.mrb[42].mxu0 %vm329_vm0, %v1326_v15 }
 0x1ff   : > { %7583 = vmatprep.mubr.msk.f32.mxu0 %vm329_vm0, %v1327_v18 }
 0x202   : > { %7584 = vmatmul.mubr.msk.f32.gmra.mrb[44].mxu0 %vm329_vm0, %v1328_v19 }
 0x203   : > { %7586 = vmatprep.mubr.msk.f32.mxu0 %vm329_vm0, %v1329_v22 }
 0x206   : > { %7587 = vmatmul.mubr.msk.f32.gmra.mrb[46].mxu0 %vm329_vm0, %v1330_v23 }
 0x29d   : > { %v7507_v34 = vpop.f32.mrb[16].mxu0 }
 0x29e   : > { %v952_v50 = vadd.f32 %v7507_v34, %v8690_v31  ;;  %v946_v51 = vpop.f32.mrb[17].mxu0 }
 0x29f   : > { %v947_v52 = vadd.f32 %v8690_v31, %v946_v51 }
 0x2a0   : > { %v1042_v53 = vmul.f32 0.2, %v952_v50  ;;  %vm1026_vm6 = vcmp.gt.f32.partialorder %v952_v50, 0.0 }
 0x2a1   : > { %vm1025_vm7 = vcmp.gt.f32.partialorder %v947_v52, 0.0  ;;  %v1041_v56 = vmul.f32 0.2, %v947_v52  ;;  %v7510_v57 = vpop.f32.mrb[18].mxu0 }
 0x2a2   : > { %v962_v58 = vadd.f32 %v7510_v57, %v8690_v31  ;;  %v956_v59 = vpop.f32.mrb[19].mxu0  ;;  %v1058_v63 = vsel %vm1026_vm6, %v952_v50, %v1042_v53 }
 0x2a3   : > { %v957_v60 = vadd.f32 %v8690_v31, %v956_v59  ;;  %v1057_v61 = vsel %vm1025_vm7, %v947_v52, %v1041_v56 }
 0x2a4   : > { %v1044_v0 = vmul.f32 0.2, %v962_v58  ;;  %7537 = vmatprep.mubr.msk.f32.mxu1 %vm580_vm3, %v1057_v61  ;;  %vm1028_vm8 = vcmp.gt.f32.partialorder %v962_v58, 0.0 }
 0x2a5   : > { %vm1027_vm9 = vcmp.gt.f32.partialorder %v957_v60, 0.0  ;;  %v1043_v1 = vmul.f32 0.2, %v957_v60  ;;  %v7513_v48 = vpop.f32.mrb[20].mxu0  ;;  %7538 = vmatmul.mubr.msk.f32.vlgmr.msra.gmra.mrb[16].mxu1 %vm580_vm3, %v1058_v63 }
 0x2a6   : > { %v972_v2 = vadd.f32 %v7513_v48, %v8690_v31  ;;  %8216 = vmatpush3.bf16.msra.mxu1 %v8213_v30  ;;  %v966_v3 = vpop.f32.mrb[21].mxu0  ;;  %v1060_v12 = vsel %vm1028_vm8, %v962_v58, %v1044_v0  ;;  %v8729_v30 = vld [vmem:[%s10228_s4 + $0x3] ss:$0 sm:$0xff] }
 0x2a7   : > { %v967_v7 = vadd.f32 %v8690_v31, %v966_v3  ;;  %v1059_v8 = vsel %vm1027_vm9, %v957_v60, %v1043_v1  ;;  %8218 = vmatprep.subr.bf16.mxu1 %v8217_v62 }
 0x2a8   : > { %v1046_v10 = vmul.f32 0.2, %v972_v2  ;;  %7540 = vmatprep.mubr.msk.f32.mxu1 %vm580_vm3, %v1059_v8  ;;  %vm1030_vm10 = vcmp.gt.f32.partialorder %v972_v2, 0.0 }
 0x2a9   : > { %vm1029_vm11 = vcmp.gt.f32.partialorder %v967_v7, 0.0  ;;  %v1045_v13 = vmul.f32 0.2, %v967_v7  ;;  %v7516_v16 = vpop.f32.mrb[22].mxu0  ;;  %7541 = vmatmul.mubr.msk.f32.gmra.mrb[18].mxu1 %vm580_vm3, %v1060_v12 }
 0x2aa   : > { %v982_v20 = vadd.f32 %v7516_v16, %v8690_v31  ;;  %v976_v21 = vpop.f32.mrb[23].mxu0  ;;  %8220 = vmatpush3.bf16.msra.mxu1 %v8217_v62  ;;  %v1062_v29 = vsel %vm1030_vm10, %v972_v2, %v1046_v10 }
 0x2ab   : > { %v977_v24 = vadd.f32 %v8690_v31, %v976_v21  ;;  %v1061_v25 = vsel %vm1029_vm11, %v967_v7, %v1045_v13 }
 0x2ac   : > { %v1048_v28 = vmul.f32 0.2, %v982_v20  ;;  %7543 = vmatprep.mubr.msk.f32.mxu1 %vm580_vm3, %v1061_v25  ;;  %vm1032_vm12 = vcmp.gt.f32.partialorder %v982_v20, 0.0 }
 0x2ad   : > { %vm1031_vm13 = vcmp.gt.f32.partialorder %v977_v24, 0.0  ;;  %v1047_v32 = vmul.f32 0.2, %v977_v24  ;;  %v7519_v33 = vpop.f32.mrb[24].mxu0  ;;  %7544 = vmatmul.mubr.msk.f32.gmra.mrb[20].mxu1 %vm580_vm3, %v1062_v29 }
 0x2ae   : > { %v992_v35 = vadd.f32 %v7519_v33, %v8690_v31  ;;  %v986_v36 = vpop.f32.mrb[25].mxu0  ;;  %v1064_v40 = vsel %vm1032_vm12, %v982_v20, %v1048_v28 }
 0x2af   : > { %v987_v37 = vadd.f32 %v8690_v31, %v986_v36  ;;  %v1063_v38 = vsel %vm1031_vm13, %v977_v24, %v1047_v32 }
 0x2b0   : > { %v1050_v39 = vmul.f32 0.2, %v992_v35  ;;  %7546 = vmatprep.mubr.msk.f32.mxu1 %vm580_vm3, %v1063_v38  ;;  %vm1034_vm14 = vcmp.gt.f32.partialorder %v992_v35, 0.0 }
 0x2b1   : > { %vm1033_vm15 = vcmp.gt.f32.partialorder %v987_v37, 0.0  ;;  %v1049_v41 = vmul.f32 0.2, %v987_v37  ;;  %v7522_v42 = vpop.f32.mrb[26].mxu0  ;;  %7547 = vmatmul.mubr.msk.f32.gmra.mrb[22].mxu1 %vm580_vm3, %v1064_v40 }
 0x2b2   : > { %v1002_v43 = vadd.f32 %v7522_v42, %v8690_v31  ;;  %v996_v44 = vpop.f32.mrb[27].mxu0  ;;  %v1066_v47 = vsel %vm1034_vm14, %v992_v35, %v1050_v39 }
 0x2b3   : > { %v997_v45 = vadd.f32 %v8690_v31, %v996_v44  ;;  %v1065_v46 = vsel %vm1033_vm15, %v987_v37, %v1049_v41 }
 0x2b4   : > { %v1052_v17 = vmul.f32 0.2, %v1002_v43  ;;  %7549 = vmatprep.mubr.msk.f32.mxu1 %vm580_vm3, %v1065_v46  ;;  %vm1036_vm1 = vcmp.gt.f32.partialorder %v1002_v43, 0.0 }
 0x2b5   : > { %vm1035_vm2 = vcmp.gt.f32.partialorder %v997_v45, 0.0  ;;  %v1051_v4 = vmul.f32 0.2, %v997_v45  ;;  %v7525_v49 = vpop.f32.mrb[28].mxu0  ;;  %7550 = vmatmul.mubr.msk.f32.gmra.mrb[24].mxu1 %vm580_vm3, %v1066_v47 }
 0x2b6   : > { %v1012_v5 = vadd.f32 %v7525_v49, %v8690_v31  ;;  %v1006_v6 = vpop.f32.mrb[29].mxu0  ;;  %v1068_v15 = vsel %vm1036_vm1, %v1002_v43, %v1052_v17 }
 0x2b7   : > { %v1007_v9 = vadd.f32 %v8690_v31, %v1006_v6  ;;  %v1067_v11 = vsel %vm1035_vm2, %v997_v45, %v1051_v4 }
 0x2b8   : > { %v1054_v14 = vmul.f32 0.2, %v1012_v5  ;;  %7552 = vmatprep.mubr.msk.f32.mxu1 %vm580_vm3, %v1067_v11  ;;  %vm1038_vm4 = vcmp.gt.f32.partialorder %v1012_v5, 0.0 }
 0x2b9   : > { %vm1037_vm5 = vcmp.gt.f32.partialorder %v1007_v9, 0.0  ;;  %v1053_v18 = vmul.f32 0.2, %v1007_v9  ;;  %v7528_v19 = vpop.f32.mrb[30].mxu0  ;;  %7553 = vmatmul.mubr.msk.f32.gmra.mrb[26].mxu1 %vm580_vm3, %v1068_v15 }
 0x2ba   : > { %v1022_v22 = vadd.f32 %v7528_v19, %v8690_v31  ;;  %v1016_v23 = vpop.f32.mrb[31].mxu0  ;;  %v1070_v50 = vsel %vm1038_vm4, %v1012_v5, %v1054_v14 }
 0x2bb   : > { %v1017_v26 = vadd.f32 %v8690_v31, %v1016_v23  ;;  %v1069_v27 = vsel %vm1037_vm5, %v1007_v9, %v1053_v18 }
 0x2bc   : > { %v1056_v34 = vmul.f32 0.2, %v1022_v22  ;;  %7555 = vmatprep.mubr.msk.f32.mxu1 %vm580_vm3, %v1069_v27  ;;  %vm1040_vm6 = vcmp.gt.f32.partialorder %v1022_v22, 0.0 }
 0x2bd   : > { %vm1039_vm7 = vcmp.gt.f32.partialorder %v1017_v26, 0.0  ;;  %v1055_v51 = vmul.f32 0.2, %v1017_v26  ;;  %7556 = vmatmul.mubr.msk.f32.gmra.mrb[28].mxu1 %vm580_vm3, %v1070_v50  ;;  %v7567_v52 = vpop.f32.mrb[32].mxu0 }
 0x2be   : > { %v1459_v53 = vadd.f32 %v7567_v52, %v8729_v30  ;;  %v1453_v54 = vpop.f32.mrb[33].mxu0  ;;  %v1072_v57 = vsel %vm1040_vm6, %v1022_v22, %v1056_v34 }
 0x2bf   : > { %v1454_v31 = vadd.f32 %v8729_v30, %v1453_v54  ;;  %v1071_v55 = vsel %vm1039_vm7, %v1017_v26, %v1055_v51 }
 0x2c0   : > { %v1549_v56 = vmul.f32 0.2, %v1459_v53  ;;  %7558 = vmatprep.mubr.msk.f32.mxu1 %vm580_vm3, %v1071_v55  ;;  %vm1533_vm8 = vcmp.gt.f32.partialorder %v1459_v53, 0.0 }
 0x2c1   : > { %vm1532_vm9 = vcmp.gt.f32.partialorder %v1454_v31, 0.0  ;;  %v1548_v58 = vmul.f32 0.2, %v1454_v31  ;;  %7559 = vmatmul.mubr.msk.f32.gmra.mrb[30].mxu1 %vm580_vm3, %v1072_v57  ;;  %v7570_v59 = vpop.f32.mrb[34].mxu0  ;;  %v6591_v57 = vld [vmem:[%s10226_s2 + $0x78] sm:$0xff] }
 0x2c2   : > { %v1469_v60 = vadd.f32 %v7570_v59, %v8729_v30  ;;  %v1463_v61 = vpop.f32.mrb[35].mxu0  ;;  %v1565_v0 = vsel %vm1533_vm8, %v1459_v53, %v1549_v56  ;;  %v6590_v56 = vld [vmem:[%s10226_s2 + $0x70] sm:$0xff]  ;;  %v6609_v59 = vld [vmem:[%s10227_s3 + $0x20] sm:$0xff] }
 0x2c3   : > { %v1464_v62 = vadd.f32 %v8729_v30, %v1463_v61  ;;  %v1564_v63 = vsel %vm1532_vm9, %v1454_v31, %v1548_v58  ;;  %v6589_v31 = vld [vmem:[%s10226_s2 + $0x68] sm:$0xff]  ;;  %v8225_v58 = vpack.c.bf16 %v6591_v57, %v6590_v56  ;;  %v6611_v61 = vld [vmem:[%s10227_s3 + $0x30] sm:$0xff] }
 0x2c4   : > { %v1551_v1 = vmul.f32 0.2, %v1469_v60  ;;  %7597 = vmatprep.mubr.msk.f32.mxu1 %vm580_vm3, %v1564_v63  ;;  %vm1535_vm10 = vcmp.gt.f32.partialorder %v1469_v60, 0.0  ;;  %v6612_v63 = vld [vmem:[%s10227_s3 + $0x38] sm:$0xff] }
 0x2c5   : > { %vm1534_vm11 = vcmp.gt.f32.partialorder %v1464_v62, 0.0  ;;  %v1550_v48 = vmul.f32 0.2, %v1464_v62  ;;  %v7573_v2 = vpop.f32.mrb[36].mxu0  ;;  %7598 = vmatmul.mubr.msk.f32.vlgmr.msra.gmra.mrb[32].mxu1 %vm580_vm3, %v1565_v0  ;;  %v8233_v0 = vpack.c.bf16 %v6612_v63, %v6611_v61 }
 0x2c6   : > { %v1479_v3 = vadd.f32 %v7573_v2, %v8729_v30  ;;  %v1473_v7 = vpop.f32.mrb[37].mxu0  ;;  %v1567_v13 = vsel %vm1535_vm10, %v1469_v60, %v1551_v1  ;;  %v6610_v60 = vld [vmem:[%s10227_s3 + $0x28] sm:$0xff] }
 0x2c7   : > { %v1474_v8 = vadd.f32 %v8729_v30, %v1473_v7  ;;  %v1566_v10 = vsel %vm1534_vm11, %v1464_v62, %v1550_v48  ;;  %v8229_v62 = vpack.c.bf16 %v6610_v60, %v6609_v59 }
 0x2c8   : > { %v1553_v12 = vmul.f32 0.2, %v1479_v3  ;;  %7600 = vmatprep.mubr.msk.f32.mxu1 %vm580_vm3, %v1566_v10  ;;  %vm1537_vm12 = vcmp.gt.f32.partialorder %v1479_v3, 0.0 }
 0x2c9   : > { %vm1536_vm13 = vcmp.gt.f32.partialorder %v1474_v8, 0.0  ;;  %v1552_v16 = vmul.f32 0.2, %v1474_v8  ;;  %v7576_v20 = vpop.f32.mrb[38].mxu0  ;;  %7601 = vmatmul.mubr.msk.f32.gmra.mrb[34].mxu1 %vm580_vm3, %v1567_v13  ;;  %8230 = vmatprep.subr.bf16.mxu1 %v8229_v62 }
 0x2ca   : > { %v1489_v21 = vadd.f32 %v7576_v20, %v8729_v30  ;;  %v1483_v24 = vpop.f32.mrb[39].mxu0  ;;  %v1569_v32 = vsel %vm1537_vm12, %v1479_v3, %v1553_v12  ;;  %8232 = vmatpush3.bf16.msra.mxu1 %v8229_v62 }
 0x2cb   : > { %v1484_v25 = vadd.f32 %v8729_v30, %v1483_v24  ;;  %v1568_v28 = vsel %vm1536_vm13, %v1474_v8, %v1552_v16  ;;  %8234 = vmatprep.subr.bf16.mxu1 %v8233_v0 }
 0x2cc   : > { %v1555_v29 = vmul.f32 0.2, %v1489_v21  ;;  %7603 = vmatprep.mubr.msk.f32.mxu1 %vm580_vm3, %v1568_v28  ;;  %vm1539_vm14 = vcmp.gt.f32.partialorder %v1489_v21, 0.0 }
 0x2cd   : > { %vm1538_vm15 = vcmp.gt.f32.partialorder %v1484_v25, 0.0  ;;  %v1554_v33 = vmul.f32 0.2, %v1484_v25  ;;  %v7579_v35 = vpop.f32.mrb[40].mxu0  ;;  %7604 = vmatmul.mubr.msk.f32.gmra.mrb[36].mxu1 %vm580_vm3, %v1569_v32  ;;  %v8826_v32 = vld [vmem:[%s10228_s4 + $0x4] ss:$0 sm:$0xff] }
 0x2ce   : > { %v1499_v36 = vadd.f32 %v7579_v35, %v8729_v30  ;;  %v1493_v37 = vpop.f32.mrb[41].mxu0  ;;  %v1571_v41 = vsel %vm1539_vm14, %v1489_v21, %v1555_v29  ;;  %8236 = vmatpush3.bf16.msra.mxu1 %v8233_v0 }
 0x2cf   : > { %v1494_v38 = vadd.f32 %v8729_v30, %v1493_v37  ;;  %v1570_v39 = vsel %vm1538_vm15, %v1484_v25, %v1554_v33 }
 0x2d0   : > { %v1557_v40 = vmul.f32 0.2, %v1499_v36  ;;  %7606 = vmatprep.mubr.msk.f32.mxu1 %vm580_vm3, %v1570_v39  ;;  %vm1541_vm1 = vcmp.gt.f32.partialorder %v1499_v36, 0.0 }
 0x2d1   : > { %vm1540_vm2 = vcmp.gt.f32.partialorder %v1494_v38, 0.0  ;;  %v1556_v42 = vmul.f32 0.2, %v1494_v38  ;;  %v7582_v43 = vpop.f32.mrb[42].mxu0  ;;  %7607 = vmatmul.mubr.msk.f32.gmra.mrb[38].mxu1 %vm580_vm3, %v1571_v41 }
 0x2d2   : > { %v1509_v44 = vadd.f32 %v7582_v43, %v8729_v30  ;;  %v1503_v45 = vpop.f32.mrb[43].mxu0  ;;  %v1573_v4 = vsel %vm1541_vm1, %v1499_v36, %v1557_v40 }
 0x2d3   : > { %v1504_v46 = vadd.f32 %v8729_v30, %v1503_v45  ;;  %v1572_v17 = vsel %vm1540_vm2, %v1494_v38, %v1556_v42 }
 0x2d4   : > { %v1559_v47 = vmul.f32 0.2, %v1509_v44  ;;  %7609 = vmatprep.mubr.msk.f32.mxu1 %vm580_vm3, %v1572_v17  ;;  %vm1543_vm4 = vcmp.gt.f32.partialorder %v1509_v44, 0.0 }
 0x2d5   : > { %vm1542_vm5 = vcmp.gt.f32.partialorder %v1504_v46, 0.0  ;;  %v1558_v49 = vmul.f32 0.2, %v1504_v46  ;;  %v7585_v5 = vpop.f32.mrb[44].mxu0  ;;  %7610 = vmatmul.mubr.msk.f32.gmra.mrb[40].mxu1 %vm580_vm3, %v1573_v4 }
 0x2d6   : > { %v1519_v6 = vadd.f32 %v7585_v5, %v8729_v30  ;;  %v1513_v9 = vpop.f32.mrb[45].mxu0  ;;  %v1575_v18 = vsel %vm1543_vm4, %v1509_v44, %v1559_v47 }
 0x2d7   : > { %v1514_v11 = vadd.f32 %v8729_v30, %v1513_v9  ;;  %v1574_v14 = vsel %vm1542_vm5, %v1504_v46, %v1558_v49 }
 0x2d8   : > { %v1561_v15 = vmul.f32 0.2, %v1519_v6  ;;  %7612 = vmatprep.mubr.msk.f32.mxu1 %vm580_vm3, %v1574_v14  ;;  %vm1545_vm6 = vcmp.gt.f32.partialorder %v1519_v6, 0.0 }
 0x2d9   : > { %vm1544_vm7 = vcmp.gt.f32.partialorder %v1514_v11, 0.0  ;;  %v1560_v19 = vmul.f32 0.2, %v1514_v11  ;;  %v7588_v22 = vpop.f32.mrb[46].mxu0  ;;  %7613 = vmatmul.mubr.msk.f32.gmra.mrb[42].mxu1 %vm580_vm3, %v1575_v18 }
 0x2da   : > { %v1529_v23 = vadd.f32 %v7588_v22, %v8729_v30  ;;  %v1523_v26 = vpop.f32.mrb[47].mxu0  ;;  %v1577_v51 = vsel %vm1545_vm6, %v1519_v6, %v1561_v15 }
 0x2db   : > { %v1524_v27 = vadd.f32 %v8729_v30, %v1523_v26  ;;  %v1576_v34 = vsel %vm1544_vm7, %v1514_v11, %v1560_v19  ;;  %v6588_v30 = vld [vmem:[%s10226_s2 + $0x60] sm:$0xff] }
 0x2dc   : > { %v1563_v50 = vmul.f32 0.2, %v1529_v23  ;;  %7615 = vmatprep.mubr.msk.f32.mxu1 %vm580_vm3, %v1576_v34  ;;  %vm1547_vm8 = vcmp.gt.f32.partialorder %v1529_v23, 0.0  ;;  %v8221_v55 = vpack.c.bf16 %v6589_v31, %v6588_v30 }
 0x2dd   : > { %vm1546_vm9 = vcmp.gt.f32.partialorder %v1524_v27, 0.0  ;;  %v1562_v52 = vmul.f32 0.2, %v1524_v27  ;;  %7616 = vmatmul.mubr.msk.f32.gmra.mrb[44].mxu1 %vm580_vm3, %v1577_v51 }
 0x2de   : > { %v1579_v54 = vsel %vm1547_vm8, %v1529_v23, %v1563_v50  ;;  %8222 = vmatprep.subr.bf16.mxu0 %v8221_v55 }
 0x2df   : > { %v1578_v53 = vsel %vm1546_vm9, %v1524_v27, %v1562_v52  ;;  %8224 = vmatpush3.bf16.msra.mxu0 %v8221_v55 }
 0x2e0   : > { %7618 = vmatprep.mubr.msk.f32.mxu1 %vm580_vm3, %v1578_v53  ;;  %8226 = vmatprep.subr.bf16.mxu0 %v8225_v58 }
 0x2e1   : > { %7619 = vmatmul.mubr.msk.f32.gmra.mrb[46].mxu1 %vm580_vm3, %v1579_v54 }
 0x2e3   : > { %8228 = vmatpush3.bf16.msra.mxu0 %v8225_v58 }
 0x378   : > { %v8791_v1 = vpop.f32.mrb[16].mxu1 }
 0x379   : > { %v8793_v48 = vpop.f32.mrb[17].mxu1 }
 0x37c   : > { %v8795_v2 = vpop.f32.mrb[18].mxu1 }
 0x37d   : > { %v8797_v3 = vpop.f32.mrb[19].mxu1 }
 0x380   : > { %v8799_v7 = vpop.f32.mrb[20].mxu1 }
 0x381   : > { %v8801_v8 = vpop.f32.mrb[21].mxu1 }
 0x384   : > { %v8803_v10 = vpop.f32.mrb[22].mxu1 }
 0x385   : > { %v8805_v12 = vpop.f32.mrb[23].mxu1 }
 0x388   : > { %v8807_v13 = vpop.f32.mrb[24].mxu1 }
 0x389   : > { %v8809_v16 = vpop.f32.mrb[25].mxu1 }
 0x38c   : > { %v8811_v20 = vpop.f32.mrb[26].mxu1 }
 0x38d   : > { %v8813_v21 = vpop.f32.mrb[27].mxu1 }
 0x390   : > { %v8815_v24 = vpop.f32.mrb[28].mxu1 }
 0x391   : > { %v8817_v25 = vpop.f32.mrb[29].mxu1 }
 0x394   : > { %v8819_v28 = vpop.f32.mrb[30].mxu1 }
 0x395   : > { %v8821_v29 = vpop.f32.mrb[31].mxu1 }
 0x398   : > { %v7599_v33 = vpop.f32.mrb[32].mxu1 }
 0x399   : > { %v1710_v35 = vadd.f32 %v7599_v33, %v8826_v32  ;;  %v1704_v36 = vpop.f32.mrb[33].mxu1 }
 0x39a   : > { %v1705_v37 = vadd.f32 %v8826_v32, %v1704_v36 }
 0x39b   : > { %v1800_v38 = vmul.f32 0.2, %v1710_v35  ;;  %vm1784_vm10 = vcmp.gt.f32.partialorder %v1710_v35, 0.0 }
 0x39c   : > { %vm1783_vm11 = vcmp.gt.f32.partialorder %v1705_v37, 0.0  ;;  %v1799_v39 = vmul.f32 0.2, %v1705_v37  ;;  %v7602_v40 = vpop.f32.mrb[34].mxu1 }
 0x39d   : > { %v1720_v41 = vadd.f32 %v7602_v40, %v8826_v32  ;;  %v1714_v42 = vpop.f32.mrb[35].mxu1  ;;  %v1816_v45 = vsel %vm1784_vm10, %v1710_v35, %v1800_v38 }
 0x39e   : > { %v1715_v43 = vadd.f32 %v8826_v32, %v1714_v42  ;;  %v1815_v44 = vsel %vm1783_vm11, %v1705_v37, %v1799_v39 }
 0x39f   : > { %v1802_v46 = vmul.f32 0.2, %v1720_v41  ;;  %7629 = vmatprep.mubr.msk.f32.mxu0 %vm580_vm3, %v1815_v44  ;;  %vm1786_vm12 = vcmp.gt.f32.partialorder %v1720_v41, 0.0 }
 0x3a0   : > { %vm1785_vm13 = vcmp.gt.f32.partialorder %v1715_v43, 0.0  ;;  %v1801_v17 = vmul.f32 0.2, %v1715_v43  ;;  %v7605_v47 = vpop.f32.mrb[36].mxu1  ;;  %7630 = vmatmul.mubr.msk.f32.vlgmr.msra.gmra.mrb[48].mxu0 %vm580_vm3, %v1816_v45 }
 0x3a1   : > { %v1730_v4 = vadd.f32 %v7605_v47, %v8826_v32  ;;  %v1724_v49 = vpop.f32.mrb[37].mxu1  ;;  %v1818_v11 = vsel %vm1786_vm12, %v1720_v41, %v1802_v46 }
 0x3a2   : > { %v1725_v5 = vadd.f32 %v8826_v32, %v1724_v49  ;;  %v1817_v6 = vsel %vm1785_vm13, %v1715_v43, %v1801_v17 }
 0x3a3   : > { %v1804_v9 = vmul.f32 0.2, %v1730_v4  ;;  %7632 = vmatprep.mubr.msk.f32.mxu0 %vm580_vm3, %v1817_v6  ;;  %vm1788_vm14 = vcmp.gt.f32.partialorder %v1730_v4, 0.0 }
 0x3a4   : > { %vm1787_vm15 = vcmp.gt.f32.partialorder %v1725_v5, 0.0  ;;  %v1803_v14 = vmul.f32 0.2, %v1725_v5  ;;  %v7608_v15 = vpop.f32.mrb[38].mxu1  ;;  %7633 = vmatmul.mubr.msk.f32.gmra.mrb[50].mxu0 %vm580_vm3, %v1818_v11 }
 0x3a5   : > { %v1740_v18 = vadd.f32 %v7608_v15, %v8826_v32  ;;  %v1734_v19 = vpop.f32.mrb[39].mxu1  ;;  %v1820_v27 = vsel %vm1788_vm14, %v1730_v4, %v1804_v9  ;;  %v8869_v9 = vld [vmem:[%s10228_s4 + $0x5] ss:$0 sm:$0xff] }
 0x3a6   : > { %v1735_v22 = vadd.f32 %v8826_v32, %v1734_v19  ;;  %v1819_v23 = vsel %vm1787_vm15, %v1725_v5, %v1803_v14  ;;  %v6633_v5 = vld [vmem:[%s10225_s1 + $0x28] sm:$0xff] }
 0x3a7   : > { %v1806_v26 = vmul.f32 0.2, %v1740_v18  ;;  %7635 = vmatprep.mubr.msk.f32.mxu0 %vm580_vm3, %v1819_v23  ;;  %vm1790_vm1 = vcmp.gt.f32.partialorder %v1740_v18, 0.0 }
 0x3a8   : > { %vm1789_vm2 = vcmp.gt.f32.partialorder %v1735_v22, 0.0  ;;  %v1805_v34 = vmul.f32 0.2, %v1735_v22  ;;  %v7611_v50 = vpop.f32.mrb[40].mxu1  ;;  %7636 = vmatmul.mubr.msk.f32.gmra.mrb[52].mxu0 %vm580_vm3, %v1820_v27 }
 0x3a9   : > { %v1750_v51 = vadd.f32 %v7611_v50, %v8826_v32  ;;  %v1744_v52 = vpop.f32.mrb[41].mxu1  ;;  %v1822_v31 = vsel %vm1790_vm1, %v1740_v18, %v1806_v26 }
 0x3aa   : > { %v1745_v53 = vadd.f32 %v8826_v32, %v1744_v52  ;;  %v1821_v54 = vsel %vm1789_vm2, %v1735_v22, %v1805_v34 }
 0x3ab   : > { %v1808_v30 = vmul.f32 0.2, %v1750_v51  ;;  %7638 = vmatprep.mubr.msk.f32.mxu0 %vm580_vm3, %v1821_v54  ;;  %vm1792_vm4 = vcmp.gt.f32.partialorder %v1750_v51, 0.0 }
 0x3ac   : > { %vm1791_vm5 = vcmp.gt.f32.partialorder %v1745_v53, 0.0  ;;  %v1807_v55 = vmul.f32 0.2, %v1745_v53  ;;  %v7614_v56 = vpop.f32.mrb[42].mxu1  ;;  %7639 = vmatmul.mubr.msk.f32.gmra.mrb[54].mxu0 %vm580_vm3, %v1822_v31 }
 0x3ad   : > { %v1760_v57 = vadd.f32 %v7614_v56, %v8826_v32  ;;  %v1754_v58 = vpop.f32.mrb[43].mxu1  ;;  %v1824_v62 = vsel %vm1792_vm4, %v1750_v51, %v1808_v30 }
 0x3ae   : > { %v1755_v59 = vadd.f32 %v8826_v32, %v1754_v58  ;;  %v1823_v60 = vsel %vm1791_vm5, %v1745_v53, %v1807_v55 }
 0x3af   : > { %v1810_v61 = vmul.f32 0.2, %v1760_v57  ;;  %7641 = vmatprep.mubr.msk.f32.mxu0 %vm580_vm3, %v1823_v60  ;;  %vm1794_vm6 = vcmp.gt.f32.partialorder %v1760_v57, 0.0 }
 0x3b0   : > { %vm1793_vm7 = vcmp.gt.f32.partialorder %v1755_v59, 0.0  ;;  %v1809_v63 = vmul.f32 0.2, %v1755_v59  ;;  %v7617_v0 = vpop.f32.mrb[44].mxu1  ;;  %7642 = vmatmul.mubr.msk.f32.gmra.mrb[56].mxu0 %vm580_vm3, %v1824_v62 }
 0x3b1   : > { %v1770_v33 = vadd.f32 %v7617_v0, %v8826_v32  ;;  %v1764_v35 = vpop.f32.mrb[45].mxu1  ;;  %v1826_v39 = vsel %vm1794_vm6, %v1760_v57, %v1810_v61 }
 0x3b2   : > { %v1765_v36 = vadd.f32 %v8826_v32, %v1764_v35  ;;  %v1825_v37 = vsel %vm1793_vm7, %v1755_v59, %v1809_v63 }
 0x3b3   : > { %v1812_v38 = vmul.f32 0.2, %v1770_v33  ;;  %7644 = vmatprep.mubr.msk.f32.mxu0 %vm580_vm3, %v1825_v37  ;;  %vm1796_vm8 = vcmp.gt.f32.partialorder %v1770_v33, 0.0 }
 0x3b4   : > { %vm1795_vm9 = vcmp.gt.f32.partialorder %v1765_v36, 0.0  ;;  %v1811_v40 = vmul.f32 0.2, %v1765_v36  ;;  %v7620_v41 = vpop.f32.mrb[46].mxu1  ;;  %7645 = vmatmul.mubr.msk.f32.gmra.mrb[58].mxu0 %vm580_vm3, %v1826_v39 }
 0x3b5   : > { %v1780_v42 = vadd.f32 %v7620_v41, %v8826_v32  ;;  %v1774_v43 = vpop.f32.mrb[47].mxu1  ;;  %v1828_v17 = vsel %vm1796_vm8, %v1770_v33, %v1812_v38 }
 0x3b6   : > { %v1775_v44 = vadd.f32 %v8826_v32, %v1774_v43  ;;  %v1827_v45 = vsel %vm1795_vm9, %v1765_v36, %v1811_v40  ;;  %v6632_v32 = vld [vmem:[%s10225_s1 + $0x20] sm:$0xff] }
 0x3b7   : > { %v1814_v46 = vmul.f32 0.2, %v1780_v42  ;;  %7647 = vmatprep.mubr.msk.f32.mxu0 %vm580_vm3, %v1827_v45  ;;  %vm1798_vm10 = vcmp.gt.f32.partialorder %v1780_v42, 0.0  ;;  %v8237_v6 = vpack.c.bf16 %v6633_v5, %v6632_v32 }
 0x3b8   : > { %vm1797_vm11 = vcmp.gt.f32.partialorder %v1775_v44, 0.0  ;;  %v1813_v47 = vmul.f32 0.2, %v1775_v44  ;;  %7648 = vmatmul.mubr.msk.f32.gmra.mrb[60].mxu0 %vm580_vm3, %v1828_v17 }
 0x3b9   : > { %v1830_v49 = vsel %vm1798_vm10, %v1780_v42, %v1814_v46  ;;  %8238 = vmatprep.subr.bf16.mxu0 %v8237_v6 }
 0x3ba   : > { %v1829_v4 = vsel %vm1797_vm11, %v1775_v44, %v1813_v47  ;;  %8240 = vmatpush3.bf16.msra.mxu0 %v8237_v6 }
 0x3bb   : > { %7650 = vmatprep.mubr.msk.f32.mxu0 %vm580_vm3, %v1829_v4 }
 0x3bc   : > { %7651 = vmatmul.mubr.msk.f32.gmra.mrb[62].mxu0 %vm580_vm3, %v1830_v49 }
 0x473   : > { %v7631_v11 = vpop.f32.mrb[48].mxu0 }
 0x474   : > { %v1961_v14 = vadd.f32 %v7631_v11, %v8869_v9  ;;  %v1955_v15 = vpop.f32.mrb[49].mxu0 }
 0x475   : > { %v1956_v18 = vadd.f32 %v8869_v9, %v1955_v15 }
 0x476   : > { %v2051_v19 = vmul.f32 0.2, %v1961_v14  ;;  %vm2035_vm12 = vcmp.gt.f32.partialorder %v1961_v14, 0.0 }
 0x477   : > { %vm2034_vm13 = vcmp.gt.f32.partialorder %v1956_v18, 0.0  ;;  %v2050_v22 = vmul.f32 0.2, %v1956_v18  ;;  %v7634_v23 = vpop.f32.mrb[50].mxu0 }
 0x478   : > { %v1971_v26 = vadd.f32 %v7634_v23, %v8869_v9  ;;  %v1965_v27 = vpop.f32.mrb[51].mxu0  ;;  %v2067_v51 = vsel %vm2035_vm12, %v1961_v14, %v2051_v19 }
 0x479   : > { %v1966_v34 = vadd.f32 %v8869_v9, %v1965_v27  ;;  %v2066_v50 = vsel %vm2034_vm13, %v1956_v18, %v2050_v22 }
 0x47a   : > { %v2053_v52 = vmul.f32 0.2, %v1971_v26  ;;  %7661 = vmatprep.mubr.msk.f32.mxu1 %vm580_vm3, %v2066_v50  ;;  %vm2037_vm14 = vcmp.gt.f32.partialorder %v1971_v26, 0.0 }
 0x47b   : > { %vm2036_vm15 = vcmp.gt.f32.partialorder %v1966_v34, 0.0  ;;  %v2052_v53 = vmul.f32 0.2, %v1966_v34  ;;  %v7637_v54 = vpop.f32.mrb[52].mxu0  ;;  %7662 = vmatmul.mubr.msk.f32.vlgmr.msra.gmra.mrb[48].mxu1 %vm580_vm3, %v2067_v51 }
 0x47c   : > { %v1981_v30 = vadd.f32 %v7637_v54, %v8869_v9  ;;  %v1975_v31 = vpop.f32.mrb[53].mxu0  ;;  %v2069_v58 = vsel %vm2037_vm14, %v1971_v26, %v2053_v52 }
 0x47d   : > { %v1976_v55 = vadd.f32 %v8869_v9, %v1975_v31  ;;  %v2068_v56 = vsel %vm2036_vm15, %v1966_v34, %v2052_v53 }
 0x47e   : > { %v2055_v57 = vmul.f32 0.2, %v1981_v30  ;;  %7664 = vmatprep.mubr.msk.f32.mxu1 %vm580_vm3, %v2068_v56  ;;  %vm2039_vm1 = vcmp.gt.f32.partialorder %v1981_v30, 0.0  ;;  %v6653_v56 = vld [vmem:[%s10226_s2 + $0x90] sm:$0xff] }
 0x47f   : > { %vm2038_vm2 = vcmp.gt.f32.partialorder %v1976_v55, 0.0  ;;  %v2054_v59 = vmul.f32 0.2, %v1976_v55  ;;  %v7640_v60 = vpop.f32.mrb[54].mxu0  ;;  %7665 = vmatmul.mubr.msk.f32.gmra.mrb[50].mxu1 %vm580_vm3, %v2069_v58  ;;  %v6654_v58 = vld [vmem:[%s10226_s2 + $0x98] sm:$0xff] }
 0x480   : > { %v1991_v61 = vadd.f32 %v7640_v60, %v8869_v9  ;;  %v1985_v62 = vpop.f32.mrb[55].mxu0  ;;  %v2071_v35 = vsel %vm2039_vm1, %v1981_v30, %v2055_v57  ;;  %v8918_v60 = vld [vmem:[%s10229_s5] ss:$0 sm:$0xff] }
 0x481   : > { %v1986_v63 = vadd.f32 %v8869_v9, %v1985_v62  ;;  %v2070_v0 = vsel %vm2038_vm2, %v1976_v55, %v2054_v59  ;;  %v6652_v55 = vld [vmem:[%s10226_s2 + $0x88] sm:$0xff]  ;;  %v8245_v59 = vpack.c.bf16 %v6654_v58, %v6653_v56  ;;  %v8925_v62 = vld [vmem:[%s10230_s6 + $0x2] ss:$0 sm:$0xff]  ;;  %v1242_v58 = vadd.f32 %v8807_v13, %v8918_v60 }
 0x482   : > { %v2057_v33 = vmul.f32 0.2, %v1991_v61  ;;  %7667 = vmatprep.mubr.msk.f32.mxu1 %vm580_vm3, %v2070_v0  ;;  %vm2041_vm4 = vcmp.gt.f32.partialorder %v1991_v61, 0.0  ;;  %v8932_v0 = vld [vmem:[%s10229_s5 + $0x1] ss:$0 sm:$0xff] }
 0x483   : > { %vm2040_vm5 = vcmp.gt.f32.partialorder %v1986_v63, 0.0  ;;  %v2056_v36 = vmul.f32 0.2, %v1986_v63  ;;  %v7643_v37 = vpop.f32.mrb[56].mxu0  ;;  %7668 = vmatmul.mubr.msk.f32.gmra.mrb[52].mxu1 %vm580_vm3, %v2071_v35  ;;  %v1212_v35 = vadd.f32 %v8795_v2, %v8918_v60  ;;  %v8359_v2 = vld [vmem:[%s8448_s13 + $0x8] sm:$0xff] }
 0x484   : > { %v2001_v38 = vadd.f32 %v7643_v37, %v8869_v9  ;;  %v1995_v39 = vpop.f32.mrb[57].mxu0  ;;  %v2073_v43 = vsel %vm2041_vm4, %v1991_v61, %v2057_v33  ;;  %v1202_v61 = vadd.f32 %v8791_v1, %v8918_v60 }
 0x485   : > { %v1996_v40 = vadd.f32 %v8869_v9, %v1995_v39  ;;  %v2072_v41 = vsel %vm2040_vm5, %v1986_v63, %v2056_v36  ;;  %v1197_v63 = vadd.f32 %v8918_v60, %v8793_v48  ;;  %v1207_v36 = vadd.f32 %v8918_v60, %v8797_v3  ;;  %v8943_v48 = vld [vmem:[%s10230_s6 + $0x3] ss:$0 sm:$0xff] }
 0x486   : > { %v2059_v42 = vmul.f32 0.2, %v2001_v38  ;;  %7670 = vmatprep.mubr.msk.f32.mxu1 %vm580_vm3, %v2072_v41  ;;  %vm2043_vm6 = vcmp.gt.f32.partialorder %v2001_v38, 0.0  ;;  %v1280_v33 = vmul.f32 %v8925_v62, %v1202_v61  ;;  %v1217_v3 = vadd.f32 %v8918_v60, %v8801_v8 }
 0x487   : > { %vm2042_vm7 = vcmp.gt.f32.partialorder %v1996_v40, 0.0  ;;  %v2058_v44 = vmul.f32 0.2, %v1996_v40  ;;  %v7646_v45 = vpop.f32.mrb[58].mxu0  ;;  %7671 = vmatmul.mubr.msk.f32.gmra.mrb[54].mxu1 %vm580_vm3, %v2073_v43  ;;  %v1279_v1 = vmul.f32 %v8925_v62, %v1197_v63  ;;  %v1282_v43 = vmul.f32 %v8925_v62, %v1212_v35 }
 0x488   : > { %v2011_v46 = vadd.f32 %v7646_v45, %v8869_v9  ;;  %v2005_v17 = vpop.f32.mrb[59].mxu0  ;;  %v2075_v32 = vsel %vm2043_vm6, %v2001_v38, %v2059_v42  ;;  %v1296_v42 = vadd.f32 %v8359_v2, %v1280_v33  ;;  %v8360_v45 = vld [vmem:[%s8448_s13] sm:$0xff]  ;;  %v1237_v63 = vadd.f32 %v8918_v60, %v8809_v16 }
 0x489   : > { %v2006_v47 = vadd.f32 %v8869_v9, %v2005_v17  ;;  %v2074_v4 = vsel %vm2042_vm7, %v1996_v40, %v2058_v44  ;;  %v1222_v40 = vadd.f32 %v8799_v7, %v8918_v60  ;;  %v1281_v17 = vmul.f32 %v8925_v62, %v1207_v36 }
 0x48a   : > { %v2061_v49 = vmul.f32 0.2, %v2011_v46  ;;  %7673 = vmatprep.mubr.msk.f32.mxu1 %vm580_vm3, %v2074_v4  ;;  %vm2045_vm8 = vcmp.gt.f32.partialorder %v2011_v46, 0.0 }
 0x48b   : > { %vm2044_vm9 = vcmp.gt.f32.partialorder %v2006_v47, 0.0  ;;  %v2060_v5 = vmul.f32 0.2, %v2006_v47  ;;  %v7649_v6 = vpop.f32.mrb[60].mxu0  ;;  %7674 = vmatmul.mubr.msk.f32.gmra.mrb[56].mxu1 %vm580_vm3, %v2075_v32 }
 0x48c   : > { %v2021_v11 = vadd.f32 %v7649_v6, %v8869_v9  ;;  %v2015_v14 = vpop.f32.mrb[61].mxu0  ;;  %v2077_v22 = vsel %vm2045_vm8, %v2011_v46, %v2061_v49  ;;  %v1295_v46 = vadd.f32 %v8360_v45, %v1279_v1  ;;  %v8962_v49 = vld [vmem:[%s10230_s6 + $0x4] ss:$0 sm:$0xff]  ;;  %v1287_v45 = vmul.f32 %v8925_v62, %v1237_v63 }
 0x48d   : > { %v2016_v15 = vadd.f32 %v8869_v9, %v2015_v14  ;;  %v2076_v18 = vsel %vm2044_vm9, %v2006_v47, %v2060_v5  ;;  %v1284_v5 = vmul.f32 %v8925_v62, %v1222_v40  ;;  %v8361_v14 = vld [vmem:[%s8448_s13 + $0x18] sm:$0xff] }
 0x48e   : > { %v2063_v19 = vmul.f32 0.2, %v2021_v11  ;;  %7676 = vmatprep.mubr.msk.f32.mxu1 %vm580_vm3, %v2076_v18  ;;  %vm2047_vm10 = vcmp.gt.f32.partialorder %v2021_v11, 0.0  ;;  %v1283_v18 = vmul.f32 %v8925_v62, %v1217_v3 }
 0x48f   : > { %vm2046_vm11 = vcmp.gt.f32.partialorder %v2016_v15, 0.0  ;;  %v2062_v23 = vmul.f32 0.2, %v2016_v15  ;;  %v7652_v26 = vpop.f32.mrb[62].mxu0  ;;  %7677 = vmatmul.mubr.msk.f32.gmra.mrb[58].mxu1 %vm580_vm3, %v2077_v22 }
 0x490   : > { %v2031_v27 = vadd.f32 %v7652_v26, %v8869_v9  ;;  %v2025_v34 = vpop.f32.mrb[63].mxu0  ;;  %v2079_v53 = vsel %vm2047_vm10, %v2021_v11, %v2063_v19  ;;  %v1232_v19 = vadd.f32 %v8803_v10, %v8918_v60 }
 0x491   : > { %v2026_v50 = vadd.f32 %v8869_v9, %v2025_v34  ;;  %v2078_v51 = vsel %vm2046_vm11, %v2016_v15, %v2062_v23  ;;  %v6651_v9 = vld [vmem:[%s10226_s2 + $0x80] sm:$0xff]  ;;  %v1298_v15 = vadd.f32 %v8361_v14, %v1282_v43  ;;  %v8362_v23 = vld [vmem:[%s8448_s13 + $0x10] sm:$0xff]  ;;  %v1247_v43 = vadd.f32 %v8918_v60, %v8813_v21 }
 0x492   : > { %v2065_v52 = vmul.f32 0.2, %v2031_v27  ;;  %7679 = vmatprep.mubr.msk.f32.mxu1 %vm580_vm3, %v2078_v51  ;;  %vm2049_vm12 = vcmp.gt.f32.partialorder %v2031_v27, 0.0  ;;  %v8241_v57 = vpack.c.bf16 %v6652_v55, %v6651_v9  ;;  %v1297_v26 = vadd.f32 %v8362_v23, %v1281_v17  ;;  %v8364_v55 = vld [vmem:[%s8448_s13 + $0x20] sm:$0xff] }
 0x493   : > { %vm2048_vm13 = vcmp.gt.f32.partialorder %v2026_v50, 0.0  ;;  %v2064_v54 = vmul.f32 0.2, %v2026_v50  ;;  %7680 = vmatmul.mubr.msk.f32.gmra.mrb[60].mxu1 %vm580_vm3, %v2079_v53  ;;  %v1299_v56 = vadd.f32 %v8364_v55, %v1283_v18 }
 0x494   : > { %v2081_v31 = vsel %vm2049_vm12, %v2031_v27, %v2065_v52  ;;  %8242 = vmatprep.subr.bf16.mxu1 %v8241_v57  ;;  %v1227_v27 = vadd.f32 %v8918_v60, %v8805_v12 }
 0x495   : > { %v2080_v30 = vsel %vm2048_vm13, %v2026_v50, %v2064_v54  ;;  %8244 = vmatpush3.bf16.msra.mxu1 %v8241_v57  ;;  %v1286_v57 = vmul.f32 %v8925_v62, %v1232_v19  ;;  %v1289_v19 = vmul.f32 %v8925_v62, %v1247_v43  ;;  %v8372_v43 = vld [vmem:[%s8448_s13 + $0x60] sm:$0xff] }
 0x496   : > { %7682 = vmatprep.mubr.msk.f32.mxu1 %vm580_vm3, %v2080_v30  ;;  %8246 = vmatprep.subr.bf16.mxu1 %v8245_v59  ;;  %v8363_v30 = vld [vmem:[%s8448_s13 + $0x28] sm:$0xff]  ;;  %v1285_v61 = vmul.f32 %v8925_v62, %v1227_v27 }
 0x497   : > { %7683 = vmatmul.mubr.msk.f32.gmra.mrb[62].mxu1 %vm580_vm3, %v2081_v31  ;;  %v1300_v31 = vadd.f32 %v8363_v30, %v1284_v5 }
 0x499   : > { %8248 = vmatpush3.bf16.msra.mxu1 %v8245_v59 }
 0x54e   : > { %v7663_v37 = vpop.f32.mrb[48].mxu1 }
 0x54f   : > { %v2212_v38 = vadd.f32 %v7663_v37, %v8932_v0  ;;  %v2206_v39 = vpop.f32.mrb[49].mxu1 }
 0x550   : > { %v2207_v41 = vadd.f32 %v8932_v0, %v2206_v39  ;;  %v1252_v39 = vadd.f32 %v8811_v20, %v8918_v60 }
 0x551   : > { %v2290_v44 = vmul.f32 %v8943_v48, %v2212_v38 }
 0x552   : > { %v2289_v47 = vmul.f32 %v8943_v48, %v2207_v41  ;;  %v7666_v7 = vpop.f32.mrb[50].mxu1  ;;  %v8365_v41 = vld [vmem:[%s8448_s13 + $0x38] sm:$0xff]  ;;  %v1290_v5 = vmul.f32 %v8925_v62, %v1252_v39 }
 0x553   : > { %v8957_v4 = vadd.f32 %v2290_v44, %v1296_v42  ;;  %v2222_v32 = vadd.f32 %v7666_v7, %v8932_v0  ;;  %v2216_v8 = vpop.f32.mrb[51].mxu1  ;;  %v1302_v2 = vadd.f32 %v8365_v41, %v1286_v57  ;;  %v1288_v42 = vmul.f32 %v8925_v62, %v1242_v58  ;;  %v8366_v44 = vld [vmem:[%s8448_s13 + $0x30] sm:$0xff] }
 0x554   : > { %v8966_v6 = vadd.f32 %v2289_v47, %v1295_v46  ;;  %v2217_v11 = vadd.f32 %v8932_v0, %v2216_v8  ;;  %v1301_v20 = vadd.f32 %v8366_v44, %v1285_v61 }
 0x555   : > { %v2292_v22 = vmul.f32 %v8943_v48, %v2222_v32  ;;  %v2330_v52 = vmul.f32 %v8962_v49, %v8957_v4 }
 0x556   : > { %v2291_v34 = vmul.f32 %v8943_v48, %v2217_v11  ;;  %v7669_v50 = vpop.f32.mrb[52].mxu1  ;;  %v2329_v51 = vmul.f32 %v8962_v49, %v8966_v6 }
 0x557   : > { %v8982_v53 = vadd.f32 %v2292_v22, %v1298_v15  ;;  %v2232_v10 = vadd.f32 %v7669_v50, %v8932_v0  ;;  %v2226_v54 = vpop.f32.mrb[53].mxu1  ;;  %v8367_v15 = vld [vmem:[%s8448_s13 + $0x48] sm:$0xff]  ;;  %v1262_v22 = vadd.f32 %v8815_v24, %v8918_v60 }
 0x558   : > { %v8986_v9 = vadd.f32 %v2291_v34, %v1297_v26  ;;  %v2227_v12 = vadd.f32 %v8932_v0, %v2226_v54  ;;  %7689 = vmatprep.mubr.msk.f32.mxu0 %vm329_vm0, %v2329_v51  ;;  %v1304_v18 = vadd.f32 %v8367_v15, %v1288_v42  ;;  %v8368_v26 = vld [vmem:[%s8448_s13 + $0x40] sm:$0xff]  ;;  %v1257_v34 = vadd.f32 %v8918_v60, %v8817_v25 }
 0x559   : > { %v2294_v59 = vmul.f32 %v8943_v48, %v2232_v10  ;;  %7690 = vmatmul.mubr.msk.f32.vlgmr.msra.gmra.mrb[64].mxu0 %vm329_vm0, %v2330_v52  ;;  %v2332_v38 = vmul.f32 %v8962_v49, %v8982_v53  ;;  %v1303_v27 = vadd.f32 %v8368_v26, %v1287_v45  ;;  %v1292_v58 = vmul.f32 %v8925_v62, %v1262_v22 }
 0x55a   : > { %v2293_v33 = vmul.f32 %v8943_v48, %v2227_v12  ;;  %v7672_v35 = vpop.f32.mrb[54].mxu1  ;;  %v2331_v1 = vmul.f32 %v8962_v49, %v8986_v9  ;;  %v1291_v63 = vmul.f32 %v8925_v62, %v1257_v34 }
 0x55b   : > { %v9002_v36 = vadd.f32 %v2294_v59, %v1300_v31  ;;  %v2242_v13 = vadd.f32 %v7672_v35, %v8932_v0  ;;  %v2236_v37 = vpop.f32.mrb[55].mxu1  ;;  %v8369_v31 = vld [vmem:[%s8448_s13 + $0x58] sm:$0xff]  ;;  %v1272_v59 = vadd.f32 %v8819_v28, %v8918_v60 }
 0x55c   : > { %v9009_v40 = vadd.f32 %v2293_v33, %v1299_v56  ;;  %v2237_v16 = vadd.f32 %v8932_v0, %v2236_v37  ;;  %7692 = vmatprep.mubr.msk.f32.mxu0 %vm329_vm0, %v2331_v1  ;;  %v1306_v12 = vadd.f32 %v8369_v31, %v1290_v5  ;;  %v8370_v56 = vld [vmem:[%s8448_s13 + $0x50] sm:$0xff]  ;;  %v1267_v33 = vadd.f32 %v8918_v60, %v8821_v29  ;;  %v8371_v29 = vld [vmem:[%s8448_s13 + $0x68] sm:$0xff] }
 0x55d   : > { %v2296_v3 = vmul.f32 %v8943_v48, %v2242_v13  ;;  %7693 = vmatmul.mubr.msk.f32.gmra.mrb[66].mxu0 %vm329_vm0, %v2332_v38  ;;  %v2334_v8 = vmul.f32 %v8962_v49, %v9002_v36  ;;  %v1305_v57 = vadd.f32 %v8370_v56, %v1289_v19  ;;  %v1308_v60 = vadd.f32 %v8371_v29, %v1292_v58 }
 0x55e   : > { %v2295_v46 = vmul.f32 %v8943_v48, %v2237_v16  ;;  %v7675_v17 = vpop.f32.mrb[56].mxu1  ;;  %v2333_v47 = vmul.f32 %v8962_v49, %v9009_v40  ;;  %v1293_v44 = vmul.f32 %v8925_v62, %v1267_v33 }
 0x55f   : > { %v9024_v7 = vadd.f32 %v2296_v3, %v1302_v2  ;;  %v2252_v21 = vadd.f32 %v7675_v17, %v8932_v0  ;;  %v2246_v32 = vpop.f32.mrb[57].mxu1  ;;  %v1294_v2 = vmul.f32 %v8925_v62, %v1272_v59  ;;  %v1307_v3 = vadd.f32 %v8372_v43, %v1291_v63  ;;  %v8373_v62 = vld [vmem:[%s8448_s13 + $0x78] sm:$0xff] }
 0x560   : > { %v9030_v11 = vadd.f32 %v2295_v46, %v1301_v20  ;;  %v2247_v14 = vadd.f32 %v8932_v0, %v2246_v32  ;;  %7695 = vmatprep.mubr.msk.f32.mxu0 %vm329_vm0, %v2333_v47 }
 0x561   : > { %v2298_v23 = vmul.f32 %v8943_v48, %v2252_v21  ;;  %7696 = vmatmul.mubr.msk.f32.gmra.mrb[68].mxu0 %vm329_vm0, %v2334_v8  ;;  %v2336_v30 = vmul.f32 %v8962_v49, %v9024_v7 }
 0x562   : > { %v2297_v50 = vmul.f32 %v8943_v48, %v2247_v14  ;;  %v7678_v51 = vpop.f32.mrb[58].mxu1  ;;  %v2335_v52 = vmul.f32 %v8962_v49, %v9030_v11  ;;  %v1310_v14 = vadd.f32 %v8373_v62, %v1294_v2 }
 0x563   : > { %v9046_v10 = vadd.f32 %v2298_v23, %v1304_v18  ;;  %v2262_v24 = vadd.f32 %v7678_v51, %v8932_v0  ;;  %v2256_v54 = vpop.f32.mrb[59].mxu1  ;;  %v8374_v18 = vld [vmem:[%s8448_s13 + $0x70] sm:$0xff]  ;;  %v6673_v51 = vld [vmem:[%s10226_s2 + $0xa8] sm:$0xff] }
 0x564   : > { %v9052_v55 = vadd.f32 %v2297_v50, %v1303_v27  ;;  %v2257_v25 = vadd.f32 %v8932_v0, %v2256_v54  ;;  %7698 = vmatprep.mubr.msk.f32.mxu0 %vm329_vm0, %v2335_v52  ;;  %v1309_v19 = vadd.f32 %v8374_v18, %v1293_v44  ;;  %v6672_v50 = vld [vmem:[%s10226_s2 + $0xa0] sm:$0xff]  ;;  %v6674_v52 = vld [vmem:[%s10226_s2 + $0xb0] sm:$0xff] }
 0x565   : > { %v2300_v61 = vmul.f32 %v8943_v48, %v2262_v24  ;;  %7699 = vmatmul.mubr.msk.f32.gmra.mrb[70].mxu0 %vm329_vm0, %v2336_v30  ;;  %v2338_v39 = vmul.f32 %v8962_v49, %v9046_v10  ;;  %v8249_v24 = vpack.c.bf16 %v6673_v51, %v6672_v50  ;;  %v9131_v30 = vld [vmem:[%s10228_s4 + $0x6] ss:$0 sm:$0xff] }
 0x566   : > { %v2299_v35 = vmul.f32 %v8943_v48, %v2257_v25  ;;  %v7681_v1 = vpop.f32.mrb[60].mxu1  ;;  %v2337_v13 = vmul.f32 %v8962_v49, %v9052_v55 }
 0x567   : > { %v9068_v37 = vadd.f32 %v2300_v61, %v1306_v12  ;;  %v2272_v28 = vadd.f32 %v7681_v1, %v8932_v0  ;;  %v2266_v38 = vpop.f32.mrb[61].mxu1  ;;  %8250 = vmatprep.subr.bf16.mxu0 %v8249_v24 }
 0x568   : > { %v9073_v16 = vadd.f32 %v2299_v35, %v1305_v57  ;;  %v2267_v41 = vadd.f32 %v8932_v0, %v2266_v38  ;;  %7701 = vmatprep.mubr.msk.f32.mxu0 %vm329_vm0, %v2337_v13  ;;  %8252 = vmatpush3.bf16.msra.mxu0 %v8249_v24 }
 0x569   : > { %v2302_v42 = vmul.f32 %v8943_v48, %v2272_v28  ;;  %7702 = vmatmul.mubr.msk.f32.gmra.mrb[72].mxu0 %vm329_vm0, %v2338_v39  ;;  %v2340_v32 = vmul.f32 %v8962_v49, %v9068_v37 }
 0x56a   : > { %v2301_v20 = vmul.f32 %v8943_v48, %v2267_v41  ;;  %v7684_v45 = vpop.f32.mrb[62].mxu1  ;;  %v2339_v46 = vmul.f32 %v8962_v49, %v9073_v16 }
 0x56b   : > { %v9086_v17 = vadd.f32 %v2302_v42, %v1308_v60  ;;  %v2282_v47 = vadd.f32 %v7684_v45, %v8932_v0  ;;  %v2276_v21 = vpop.f32.mrb[63].mxu1 }
 0x56c   : > { %v9091_v8 = vadd.f32 %v2301_v20, %v1307_v3  ;;  %v2277_v5 = vadd.f32 %v8932_v0, %v2276_v21  ;;  %7704 = vmatprep.mubr.msk.f32.mxu0 %vm329_vm0, %v2339_v46 }
 0x56d   : > { %v2304_v15 = vmul.f32 %v8943_v48, %v2282_v47  ;;  %7705 = vmatmul.mubr.msk.f32.gmra.mrb[74].mxu0 %vm329_vm0, %v2340_v32  ;;  %v2342_v0 = vmul.f32 %v8962_v49, %v9086_v17 }
 0x56e   : > { %v2303_v22 = vmul.f32 %v8943_v48, %v2277_v5  ;;  %v2341_v23 = vmul.f32 %v8962_v49, %v9091_v8 }
 0x56f   : > { %v9102_v26 = vadd.f32 %v2304_v15, %v1310_v14 }
 0x570   : > { %v9106_v27 = vadd.f32 %v2303_v22, %v1309_v19  ;;  %7707 = vmatprep.mubr.msk.f32.mxu0 %vm329_vm0, %v2341_v23 }
 0x571   : > { %7708 = vmatmul.mubr.msk.f32.gmra.mrb[76].mxu0 %vm329_vm0, %v2342_v0  ;;  %v2344_v48 = vmul.f32 %v8962_v49, %v9102_v26 }
 0x572   : > { %v2343_v34 = vmul.f32 %v8962_v49, %v9106_v27  ;;  %v6675_v49 = vld [vmem:[%s10226_s2 + $0xb8] sm:$0xff] }
 0x573   : > { %v8253_v54 = vpack.c.bf16 %v6675_v49, %v6674_v52 }
 0x574   : > { %7710 = vmatprep.mubr.msk.f32.mxu0 %vm329_vm0, %v2343_v34 }
 0x575   : > { %7711 = vmatmul.mubr.msk.f32.gmra.mrb[78].mxu0 %vm329_vm0, %v2344_v48  ;;  %8254 = vmatprep.subr.bf16.mxu0 %v8253_v54 }
 0x576   : > { %8256 = vmatpush3.bf16.msra.mxu0 %v8253_v54 }
 0x62c   : > { %v7691_v31 = vpop.f32.mrb[64].mxu0 }
 0x62d   : > { %v2473_v12 = vadd.f32 %v7691_v31, %v9131_v30  ;;  %v2467_v25 = vpop.f32.mrb[65].mxu0 }
 0x62e   : > { %v2468_v56 = vadd.f32 %v9131_v30, %v2467_v25 }
 0x62f   : > { %v2563_v57 = vmul.f32 0.2, %v2473_v12  ;;  %vm2547_vm14 = vcmp.gt.f32.partialorder %v2473_v12, 0.0 }
 0x630   : > { %vm2546_vm15 = vcmp.gt.f32.partialorder %v2468_v56, 0.0  ;;  %v2562_v58 = vmul.f32 0.2, %v2468_v56  ;;  %v7694_v59 = vpop.f32.mrb[66].mxu0 }
 0x631   : > { %v2483_v61 = vadd.f32 %v7694_v59, %v9131_v30  ;;  %v2477_v63 = vpop.f32.mrb[67].mxu0  ;;  %v2579_v1 = vsel %vm2547_vm14, %v2473_v12, %v2563_v57 }
 0x632   : > { %v2478_v33 = vadd.f32 %v9131_v30, %v2477_v63  ;;  %v2578_v35 = vsel %vm2546_vm15, %v2468_v56, %v2562_v58 }
 0x633   : > { %v2565_v13 = vmul.f32 0.2, %v2483_v61  ;;  %7721 = vmatprep.mubr.msk.f32.mxu1 %vm580_vm3, %v2578_v35  ;;  %vm2549_vm1 = vcmp.gt.f32.partialorder %v2483_v61, 0.0 }
 0x634   : > { %vm2548_vm2 = vcmp.gt.f32.partialorder %v2478_v33, 0.0  ;;  %v2564_v28 = vmul.f32 0.2, %v2478_v33  ;;  %v7697_v38 = vpop.f32.mrb[68].mxu0  ;;  %7722 = vmatmul.mubr.msk.f32.vlgmr.msra.gmra.mrb[64].mxu1 %vm580_vm3, %v2579_v1 }
 0x635   : > { %v2493_v39 = vadd.f32 %v7697_v38, %v9131_v30  ;;  %v2487_v41 = vpop.f32.mrb[69].mxu0  ;;  %v2581_v42 = vsel %vm2549_vm1, %v2483_v61, %v2565_v13 }
 0x636   : > { %v2488_v29 = vadd.f32 %v9131_v30, %v2487_v41  ;;  %v2580_v60 = vsel %vm2548_vm2, %v2478_v33, %v2564_v28 }
 0x637   : > { %v2567_v2 = vmul.f32 0.2, %v2493_v39  ;;  %7724 = vmatprep.mubr.msk.f32.mxu1 %vm580_vm3, %v2580_v60  ;;  %vm2551_vm4 = vcmp.gt.f32.partialorder %v2493_v39, 0.0 }
 0x638   : > { %vm2550_vm5 = vcmp.gt.f32.partialorder %v2488_v29, 0.0  ;;  %v2566_v43 = vmul.f32 0.2, %v2488_v29  ;;  %v7700_v3 = vpop.f32.mrb[70].mxu0  ;;  %7725 = vmatmul.mubr.msk.f32.gmra.mrb[66].mxu1 %vm580_vm3, %v2581_v42  ;;  %v6694_v42 = vld [vmem:[%s10227_s3 + $0x48] sm:$0xff] }
 0x639   : > { %v2503_v44 = vadd.f32 %v7700_v3, %v9131_v30  ;;  %v2497_v20 = vpop.f32.mrb[71].mxu0  ;;  %v2583_v21 = vsel %vm2551_vm4, %v2493_v39, %v2567_v2  ;;  %v6693_v2 = vld [vmem:[%s10227_s3 + $0x40] sm:$0xff] }
 0x63a   : > { %v2498_v45 = vadd.f32 %v9131_v30, %v2497_v20  ;;  %v2582_v46 = vsel %vm2550_vm5, %v2488_v29, %v2566_v43  ;;  %v6717_v29 = vld [vmem:[%s10225_s1 + $0x38] sm:$0xff]  ;;  %v6695_v43 = vld [vmem:[%s10227_s3 + $0x50] sm:$0xff]  ;;  %v8257_v3 = vpack.c.bf16 %v6694_v42, %v6693_v2 }
 0x63b   : > { %v2569_v47 = vmul.f32 0.2, %v2503_v44  ;;  %7727 = vmatprep.mubr.msk.f32.mxu1 %vm580_vm3, %v2582_v46  ;;  %vm2553_vm6 = vcmp.gt.f32.partialorder %v2503_v44, 0.0 }
 0x63c   : > { %vm2552_vm7 = vcmp.gt.f32.partialorder %v2498_v45, 0.0  ;;  %v2568_v32 = vmul.f32 0.2, %v2498_v45  ;;  %v7703_v5 = vpop.f32.mrb[72].mxu0  ;;  %7728 = vmatmul.mubr.msk.f32.gmra.mrb[68].mxu1 %vm580_vm3, %v2583_v21  ;;  %8258 = vmatprep.subr.bf16.mxu1 %v8257_v3 }
 0x63d   : > { %v2513_v62 = vadd.f32 %v7703_v5, %v9131_v30  ;;  %v2507_v14 = vpop.f32.mrb[73].mxu0  ;;  %v2585_v22 = vsel %vm2553_vm6, %v2503_v44, %v2569_v47  ;;  %v6696_v44 = vld [vmem:[%s10227_s3 + $0x58] sm:$0xff]  ;;  %8260 = vmatpush3.bf16.msra.mxu1 %v8257_v3 }
 0x63e   : > { %v2508_v15 = vadd.f32 %v9131_v30, %v2507_v14  ;;  %v2584_v18 = vsel %vm2552_vm7, %v2498_v45, %v2568_v32  ;;  %v8261_v20 = vpack.c.bf16 %v6696_v44, %v6695_v43  ;;  %v9186_v45 = vld [vmem:[%s10228_s4 + $0x7] ss:$0 sm:$0xff] }
 0x63f   : > { %v2571_v19 = vmul.f32 0.2, %v2513_v62  ;;  %7730 = vmatprep.mubr.msk.f32.mxu1 %vm580_vm3, %v2584_v18  ;;  %vm2555_vm8 = vcmp.gt.f32.partialorder %v2513_v62, 0.0 }
 0x640   : > { %vm2554_vm9 = vcmp.gt.f32.partialorder %v2508_v15, 0.0  ;;  %v2570_v23 = vmul.f32 0.2, %v2508_v15  ;;  %v7706_v0 = vpop.f32.mrb[74].mxu0  ;;  %7731 = vmatmul.mubr.msk.f32.gmra.mrb[70].mxu1 %vm580_vm3, %v2585_v22  ;;  %8262 = vmatprep.subr.bf16.mxu1 %v8261_v20 }
 0x641   : > { %v2523_v34 = vadd.f32 %v7706_v0, %v9131_v30  ;;  %v2517_v48 = vpop.f32.mrb[75].mxu0  ;;  %v2587_v24 = vsel %vm2555_vm8, %v2513_v62, %v2571_v19  ;;  %8264 = vmatpush3.bf16.msra.mxu1 %v8261_v20 }
 0x642   : > { %v2518_v50 = vadd.f32 %v9131_v30, %v2517_v48  ;;  %v2586_v51 = vsel %vm2554_vm9, %v2508_v15, %v2570_v23 }
 0x643   : > { %v2573_v52 = vmul.f32 0.2, %v2523_v34  ;;  %7733 = vmatprep.mubr.msk.f32.mxu1 %vm580_vm3, %v2586_v51  ;;  %vm2557_vm10 = vcmp.gt.f32.partialorder %v2523_v34, 0.0 }
 0x644   : > { %vm2556_vm11 = vcmp.gt.f32.partialorder %v2518_v50, 0.0  ;;  %v2572_v49 = vmul.f32 0.2, %v2518_v50  ;;  %v7709_v54 = vpop.f32.mrb[76].mxu0  ;;  %7734 = vmatmul.mubr.msk.f32.gmra.mrb[72].mxu1 %vm580_vm3, %v2587_v24 }
 0x645   : > { %v2533_v31 = vadd.f32 %v7709_v54, %v9131_v30  ;;  %v2527_v12 = vpop.f32.mrb[77].mxu0  ;;  %v2589_v58 = vsel %vm2557_vm10, %v2523_v34, %v2573_v52 }
 0x646   : > { %v2528_v25 = vadd.f32 %v9131_v30, %v2527_v12  ;;  %v2588_v56 = vsel %vm2556_vm11, %v2518_v50, %v2572_v49 }
 0x647   : > { %v2575_v57 = vmul.f32 0.2, %v2533_v31  ;;  %7736 = vmatprep.mubr.msk.f32.mxu1 %vm580_vm3, %v2588_v56  ;;  %vm2559_vm12 = vcmp.gt.f32.partialorder %v2533_v31, 0.0 }
 0x648   : > { %vm2558_vm13 = vcmp.gt.f32.partialorder %v2528_v25, 0.0  ;;  %v2574_v59 = vmul.f32 0.2, %v2528_v25  ;;  %v7712_v61 = vpop.f32.mrb[78].mxu0  ;;  %7737 = vmatmul.mubr.msk.f32.gmra.mrb[74].mxu1 %vm580_vm3, %v2589_v58 }
 0x649   : > { %v2543_v63 = vadd.f32 %v7712_v61, %v9131_v30  ;;  %v2537_v33 = vpop.f32.mrb[79].mxu0  ;;  %v2591_v28 = vsel %vm2559_vm12, %v2533_v31, %v2575_v57 }
 0x64a   : > { %v2538_v35 = vadd.f32 %v9131_v30, %v2537_v33  ;;  %v2590_v1 = vsel %vm2558_vm13, %v2528_v25, %v2574_v59  ;;  %v6716_v30 = vld [vmem:[%s10225_s1 + $0x30] sm:$0xff] }
 0x64b   : > { %v2577_v13 = vmul.f32 0.2, %v2543_v63  ;;  %7739 = vmatprep.mubr.msk.f32.mxu1 %vm580_vm3, %v2590_v1  ;;  %vm2561_vm14 = vcmp.gt.f32.partialorder %v2543_v63, 0.0  ;;  %v8265_v60 = vpack.c.bf16 %v6717_v29, %v6716_v30 }
 0x64c   : > { %vm2560_vm15 = vcmp.gt.f32.partialorder %v2538_v35, 0.0  ;;  %v2576_v38 = vmul.f32 0.2, %v2538_v35  ;;  %7740 = vmatmul.mubr.msk.f32.gmra.mrb[76].mxu1 %vm580_vm3, %v2591_v28 }
 0x64d   : > { %v2593_v41 = vsel %vm2561_vm14, %v2543_v63, %v2577_v13  ;;  %8266 = vmatprep.subr.bf16.mxu0 %v8265_v60 }
 0x64e   : > { %v2592_v39 = vsel %vm2560_vm15, %v2538_v35, %v2576_v38 }
 0x64f   : > { %7742 = vmatprep.mubr.msk.f32.mxu1 %vm580_vm3, %v2592_v39 }
 0x650   : > { %7743 = vmatmul.mubr.msk.f32.gmra.mrb[78].mxu1 %vm580_vm3, %v2593_v41 }
 0x707   : > { %v7723_v46 = vpop.f32.mrb[64].mxu1 }
 0x708   : > { %v2724_v47 = vadd.f32 %v7723_v46, %v9186_v45  ;;  %v2718_v21 = vpop.f32.mrb[65].mxu1 }
 0x709   : > { %v2719_v32 = vadd.f32 %v9186_v45, %v2718_v21 }
 0x70a   : > { %v2814_v5 = vmul.f32 0.2, %v2724_v47  ;;  %vm2798_vm1 = vcmp.gt.f32.partialorder %v2724_v47, 0.0 }
 0x70b   : > { %vm2797_vm2 = vcmp.gt.f32.partialorder %v2719_v32, 0.0  ;;  %v2813_v62 = vmul.f32 0.2, %v2719_v32  ;;  %v7726_v14 = vpop.f32.mrb[66].mxu1 }
 0x70c   : > { %v2734_v15 = vadd.f32 %v7726_v14, %v9186_v45  ;;  %v2728_v18 = vpop.f32.mrb[67].mxu1  ;;  %v2830_v23 = vsel %vm2798_vm1, %v2724_v47, %v2814_v5 }
 0x70d   : > { %v2729_v19 = vadd.f32 %v9186_v45, %v2728_v18  ;;  %v2829_v22 = vsel %vm2797_vm2, %v2719_v32, %v2813_v62 }
 0x70e   : > { %v2816_v0 = vmul.f32 0.2, %v2734_v15  ;;  %7753 = vmatprep.mubr.msk.f32.mxu0 %vm580_vm3, %v2829_v22  ;;  %vm2800_vm4 = vcmp.gt.f32.partialorder %v2734_v15, 0.0 }
 0x70f   : > { %vm2799_vm5 = vcmp.gt.f32.partialorder %v2729_v19, 0.0  ;;  %v2815_v34 = vmul.f32 0.2, %v2729_v19  ;;  %v7729_v48 = vpop.f32.mrb[68].mxu1  ;;  %7754 = vmatmul.mubr.msk.f32.vlgmr.msra.gmra.mrb[80].mxu0 %vm580_vm3, %v2830_v23 }
 0x710   : > { %v2744_v50 = vadd.f32 %v7729_v48, %v9186_v45  ;;  %8268 = vmatpush3.bf16.msra.mxu0 %v8265_v60  ;;  %v2738_v51 = vpop.f32.mrb[69].mxu1  ;;  %v2832_v54 = vsel %vm2800_vm4, %v2734_v15, %v2816_v0  ;;  %v6715_v48 = vld [vmem:[%s10230_s6 + $0x5] ss:$0 sm:$0xff] }
 0x711   : > { %v2739_v52 = vadd.f32 %v9186_v45, %v2738_v51  ;;  %v2831_v24 = vsel %vm2799_vm5, %v2729_v19, %v2815_v34 }
 0x712   : > { %v2818_v49 = vmul.f32 0.2, %v2744_v50  ;;  %7756 = vmatprep.mubr.msk.f32.mxu0 %vm580_vm3, %v2831_v24  ;;  %vm2802_vm6 = vcmp.gt.f32.partialorder %v2744_v50, 0.0  ;;  %v3340_v24 = vmul.f32 %v6715_v48, %v8957_v4 }
 0x713   : > { %vm2801_vm7 = vcmp.gt.f32.partialorder %v2739_v52, 0.0  ;;  %v2817_v31 = vmul.f32 0.2, %v2739_v52  ;;  %v7732_v12 = vpop.f32.mrb[70].mxu1  ;;  %7757 = vmatmul.mubr.msk.f32.gmra.mrb[82].mxu0 %vm580_vm3, %v2832_v54  ;;  %v3342_v54 = vmul.f32 %v6715_v48, %v8982_v53 }
 0x714   : > { %v2754_v25 = vadd.f32 %v7732_v12, %v9186_v45  ;;  %v2748_v56 = vpop.f32.mrb[71].mxu1  ;;  %v2834_v61 = vsel %vm2802_vm6, %v2744_v50, %v2818_v49  ;;  %v3341_v49 = vmul.f32 %v6715_v48, %v8986_v9  ;;  %v3344_v12 = vmul.f32 %v6715_v48, %v9002_v36 }
 0x715   : > { %v2749_v57 = vadd.f32 %v9186_v45, %v2748_v56  ;;  %v2833_v58 = vsel %vm2801_vm7, %v2739_v52, %v2817_v31  ;;  %v3343_v31 = vmul.f32 %v6715_v48, %v9009_v40  ;;  %v3346_v56 = vmul.f32 %v6715_v48, %v9024_v7 }
 0x716   : > { %v2820_v59 = vmul.f32 0.2, %v2754_v25  ;;  %7759 = vmatprep.mubr.msk.f32.mxu0 %vm580_vm3, %v2833_v58  ;;  %vm2804_vm8 = vcmp.gt.f32.partialorder %v2754_v25, 0.0  ;;  %v3348_v58 = vmul.f32 %v6715_v48, %v9046_v10 }
 0x717   : > { %vm2803_vm9 = vcmp.gt.f32.partialorder %v2749_v57, 0.0  ;;  %v2819_v63 = vmul.f32 0.2, %v2749_v57  ;;  %v7735_v33 = vpop.f32.mrb[72].mxu1  ;;  %7760 = vmatmul.mubr.msk.f32.gmra.mrb[84].mxu0 %vm580_vm3, %v2834_v61  ;;  %v3350_v61 = vmul.f32 %v6715_v48, %v9068_v37 }
 0x718   : > { %v2764_v35 = vadd.f32 %v7735_v33, %v9186_v45  ;;  %v2758_v1 = vpop.f32.mrb[73].mxu1  ;;  %v2836_v39 = vsel %vm2804_vm8, %v2754_v25, %v2820_v59  ;;  %v3345_v25 = vmul.f32 %v6715_v48, %v9030_v11  ;;  %v3349_v59 = vmul.f32 %v6715_v48, %v9073_v16 }
 0x719   : > { %v2759_v13 = vadd.f32 %v9186_v45, %v2758_v1  ;;  %v2835_v28 = vsel %vm2803_vm9, %v2749_v57, %v2819_v63  ;;  %v3347_v57 = vmul.f32 %v6715_v48, %v9052_v55  ;;  %v3351_v63 = vmul.f32 %v6715_v48, %v9091_v8 }
 0x71a   : > { %v2822_v38 = vmul.f32 0.2, %v2764_v35  ;;  %7762 = vmatprep.mubr.msk.f32.mxu0 %vm580_vm3, %v2835_v28  ;;  %vm2806_vm10 = vcmp.gt.f32.partialorder %v2764_v35, 0.0  ;;  %v3352_v33 = vmul.f32 %v6715_v48, %v9086_v17  ;;  %v3354_v1 = vmul.f32 %v6715_v48, %v9102_v26  ;;  %v6736_v28 = vld [vmem:[%s10226_s2 + $0xc8] sm:$0xff] }
 0x71b   : > { %vm2805_vm11 = vcmp.gt.f32.partialorder %v2759_v13, 0.0  ;;  %v2821_v41 = vmul.f32 0.2, %v2759_v13  ;;  %v7738_v30 = vpop.f32.mrb[74].mxu1  ;;  %7763 = vmatmul.mubr.msk.f32.gmra.mrb[86].mxu0 %vm580_vm3, %v2836_v39  ;;  %v9264_v39 = vld [vmem:[%s10228_s4 + $0x8] ss:$0 sm:$0xff] }
 0x71c   : > { %v2774_v29 = vadd.f32 %v7738_v30, %v9186_v45  ;;  %v2768_v60 = vpop.f32.mrb[75].mxu1  ;;  %v2838_v3 = vsel %vm2806_vm10, %v2764_v35, %v2822_v38  ;;  %v3353_v35 = vmul.f32 %v6715_v48, %v9106_v27 }
 0x71d   : > { %v2769_v2 = vadd.f32 %v9186_v45, %v2768_v60  ;;  %v2837_v42 = vsel %vm2805_vm11, %v2759_v13, %v2821_v41  ;;  %v6735_v13 = vld [vmem:[%s10226_s2 + $0xc0] sm:$0xff] }
 0x71e   : > { %v2824_v43 = vmul.f32 0.2, %v2774_v29  ;;  %7765 = vmatprep.mubr.msk.f32.mxu0 %vm580_vm3, %v2837_v42  ;;  %vm2808_vm12 = vcmp.gt.f32.partialorder %v2774_v29, 0.0  ;;  %v8269_v38 = vpack.c.bf16 %v6736_v28, %v6735_v13  ;;  %v6737_v42 = vld [vmem:[%s10226_s2 + $0xd0] sm:$0xff] }
 0x71f   : > { %vm2807_vm13 = vcmp.gt.f32.partialorder %v2769_v2, 0.0  ;;  %v2823_v44 = vmul.f32 0.2, %v2769_v2  ;;  %v7741_v20 = vpop.f32.mrb[76].mxu1  ;;  %7766 = vmatmul.mubr.msk.f32.gmra.mrb[88].mxu0 %vm580_vm3, %v2838_v3 }
 0x720   : > { %v2784_v46 = vadd.f32 %v7741_v20, %v9186_v45  ;;  %v2778_v47 = vpop.f32.mrb[77].mxu1  ;;  %v2840_v62 = vsel %vm2808_vm12, %v2774_v29, %v2824_v43  ;;  %8270 = vmatprep.subr.bf16.mxu1 %v8269_v38  ;;  %v6738_v43 = vld [vmem:[%s10226_s2 + $0xd8] sm:$0xff] }
 0x721   : > { %v2779_v21 = vadd.f32 %v9186_v45, %v2778_v47  ;;  %v2839_v32 = vsel %vm2807_vm13, %v2769_v2, %v2823_v44 }
 0x722   : > { %v2826_v5 = vmul.f32 0.2, %v2784_v46  ;;  %7768 = vmatprep.mubr.msk.f32.mxu0 %vm580_vm3, %v2839_v32  ;;  %vm2810_vm14 = vcmp.gt.f32.partialorder %v2784_v46, 0.0  ;;  %v8273_v32 = vpack.c.bf16 %v6738_v43, %v6737_v42 }
 0x723   : > { %vm2809_vm15 = vcmp.gt.f32.partialorder %v2779_v21, 0.0  ;;  %v2825_v14 = vmul.f32 0.2, %v2779_v21  ;;  %v7744_v15 = vpop.f32.mrb[78].mxu1  ;;  %7769 = vmatmul.mubr.msk.f32.gmra.mrb[90].mxu0 %vm580_vm3, %v2840_v62 }
 0x724   : > { %v2794_v18 = vadd.f32 %v7744_v15, %v9186_v45  ;;  %v2788_v19 = vpop.f32.mrb[79].mxu1  ;;  %v2842_v34 = vsel %vm2810_vm14, %v2784_v46, %v2826_v5 }
 0x725   : > { %v2789_v22 = vadd.f32 %v9186_v45, %v2788_v19  ;;  %v2841_v23 = vsel %vm2809_vm15, %v2779_v21, %v2825_v14  ;;  %v3339_v45 = vmul.f32 %v6715_v48, %v8966_v6 }
 0x726   : > { %v2828_v0 = vmul.f32 0.2, %v2794_v18  ;;  %7771 = vmatprep.mubr.msk.f32.mxu0 %vm580_vm3, %v2841_v23  ;;  %vm2812_vm1 = vcmp.gt.f32.partialorder %v2794_v18, 0.0 }
 0x727   : > { %vm2811_vm2 = vcmp.gt.f32.partialorder %v2789_v22, 0.0  ;;  %v2827_v50 = vmul.f32 0.2, %v2789_v22  ;;  %7772 = vmatmul.mubr.msk.f32.gmra.mrb[92].mxu0 %vm580_vm3, %v2842_v34 }
 0x728   : > { %v2844_v52 = vsel %vm2812_vm1, %v2794_v18, %v2828_v0 }
 0x729   : > { %v2843_v51 = vsel %vm2811_vm2, %v2789_v22, %v2827_v50 }
 0x72a   : > { %7774 = vmatprep.mubr.msk.f32.mxu0 %vm580_vm3, %v2843_v51 }
 0x72b   : > { %7775 = vmatmul.mubr.msk.f32.gmra.mrb[94].mxu0 %vm580_vm3, %v2844_v52 }
 0x72c   : > { %7813 = vmatprep.mubr.msk.f32.mxu0 %vm329_vm0, %v3339_v45 }
 0x72f   : > { %7814 = vmatmul.mubr.msk.f32.vlgmr.msra.gmra.mrb[96].mxu0 %vm329_vm0, %v3340_v24 }
 0x730   : > { %7816 = vmatprep.mubr.msk.f32.mxu0 %vm329_vm0, %v3341_v49 }
 0x733   : > { %7817 = vmatmul.mubr.msk.f32.gmra.mrb[98].mxu0 %vm329_vm0, %v3342_v54 }
 0x734   : > { %7819 = vmatprep.mubr.msk.f32.mxu0 %vm329_vm0, %v3343_v31 }
 0x737   : > { %7820 = vmatmul.mubr.msk.f32.gmra.mrb[100].mxu0 %vm329_vm0, %v3344_v12 }
 0x738   : > { %7822 = vmatprep.mubr.msk.f32.mxu0 %vm329_vm0, %v3345_v25 }
 0x73b   : > { %7823 = vmatmul.mubr.msk.f32.gmra.mrb[102].mxu0 %vm329_vm0, %v3346_v56 }
 0x73c   : > { %7825 = vmatprep.mubr.msk.f32.mxu0 %vm329_vm0, %v3347_v57 }
 0x73f   : > { %7826 = vmatmul.mubr.msk.f32.gmra.mrb[104].mxu0 %vm329_vm0, %v3348_v58 }
 0x740   : > { %7828 = vmatprep.mubr.msk.f32.mxu0 %vm329_vm0, %v3349_v59 }
 0x743   : > { %7829 = vmatmul.mubr.msk.f32.gmra.mrb[106].mxu0 %vm329_vm0, %v3350_v61 }
 0x744   : > { %7831 = vmatprep.mubr.msk.f32.mxu0 %vm329_vm0, %v3351_v63 }
 0x747   : > { %7832 = vmatmul.mubr.msk.f32.gmra.mrb[108].mxu0 %vm329_vm0, %v3352_v33 }
 0x748   : > { %7834 = vmatprep.mubr.msk.f32.mxu0 %vm329_vm0, %v3353_v35 }
 0x74b   : > { %7835 = vmatmul.mubr.msk.f32.gmra.mrb[110].mxu0 %vm329_vm0, %v3354_v1 }
 0x7e2   : > { %v7755_v41 = vpop.f32.mrb[80].mxu0 }
 0x7e3   : > { %v2975_v30 = vadd.f32 %v7755_v41, %v9264_v39  ;;  %v2969_v29 = vpop.f32.mrb[81].mxu0 }
 0x7e4   : > { %v2970_v60 = vadd.f32 %v9264_v39, %v2969_v29 }
 0x7e5   : > { %v3065_v2 = vmul.f32 0.2, %v2975_v30  ;;  %vm3049_vm4 = vcmp.gt.f32.partialorder %v2975_v30, 0.0 }
 0x7e6   : > { %vm3048_vm5 = vcmp.gt.f32.partialorder %v2970_v60, 0.0  ;;  %v3064_v3 = vmul.f32 0.2, %v2970_v60  ;;  %v7758_v44 = vpop.f32.mrb[82].mxu0 }
 0x7e7   : > { %v2985_v20 = vadd.f32 %v7758_v44, %v9264_v39  ;;  %v2979_v46 = vpop.f32.mrb[83].mxu0  ;;  %v3081_v5 = vsel %vm3049_vm4, %v2975_v30, %v3065_v2 }
 0x7e8   : > { %v2980_v47 = vadd.f32 %v9264_v39, %v2979_v46  ;;  %v3080_v21 = vsel %vm3048_vm5, %v2970_v60, %v3064_v3 }
 0x7e9   : > { %v3067_v62 = vmul.f32 0.2, %v2985_v20  ;;  %7785 = vmatprep.mubr.msk.f32.mxu1 %vm580_vm3, %v3080_v21  ;;  %vm3051_vm6 = vcmp.gt.f32.partialorder %v2985_v20, 0.0 }
 0x7ea   : > { %vm3050_vm7 = vcmp.gt.f32.partialorder %v2980_v47, 0.0  ;;  %v3066_v14 = vmul.f32 0.2, %v2980_v47  ;;  %v7761_v15 = vpop.f32.mrb[84].mxu0  ;;  %7786 = vmatmul.mubr.msk.f32.vlgmr.msra.gmra.mrb[80].mxu1 %vm580_vm3, %v3081_v5 }
 0x7eb   : > { %v2995_v18 = vadd.f32 %v7761_v15, %v9264_v39  ;;  %8272 = vmatpush3.bf16.msra.mxu1 %v8269_v38  ;;  %v2989_v19 = vpop.f32.mrb[85].mxu0  ;;  %v3083_v34 = vsel %vm3051_vm6, %v2985_v20, %v3067_v62  ;;  %v9303_v62 = vld [vmem:[%s10228_s4 + $0x9] ss:$0 sm:$0xff] }
 0x7ec   : > { %v2990_v22 = vadd.f32 %v9264_v39, %v2989_v19  ;;  %v3082_v23 = vsel %vm3050_vm7, %v2980_v47, %v3066_v14  ;;  %8274 = vmatprep.subr.bf16.mxu1 %v8273_v32 }
 0x7ed   : > { %v3069_v0 = vmul.f32 0.2, %v2995_v18  ;;  %7788 = vmatprep.mubr.msk.f32.mxu1 %vm580_vm3, %v3082_v23  ;;  %vm3053_vm8 = vcmp.gt.f32.partialorder %v2995_v18, 0.0 }
 0x7ee   : > { %vm3052_vm9 = vcmp.gt.f32.partialorder %v2990_v22, 0.0  ;;  %v3068_v48 = vmul.f32 0.2, %v2990_v22  ;;  %v7764_v50 = vpop.f32.mrb[86].mxu0  ;;  %7789 = vmatmul.mubr.msk.f32.gmra.mrb[82].mxu1 %vm580_vm3, %v3083_v34 }
 0x7ef   : > { %v3005_v51 = vadd.f32 %v7764_v50, %v9264_v39  ;;  %v2999_v52 = vpop.f32.mrb[87].mxu0  ;;  %8276 = vmatpush3.bf16.msra.mxu1 %v8273_v32  ;;  %v3085_v54 = vsel %vm3053_vm8, %v2995_v18, %v3069_v0 }
 0x7f0   : > { %v3000_v45 = vadd.f32 %v9264_v39, %v2999_v52  ;;  %v3084_v24 = vsel %vm3052_vm9, %v2990_v22, %v3068_v48 }
 0x7f1   : > { %v3071_v49 = vmul.f32 0.2, %v3005_v51  ;;  %7791 = vmatprep.mubr.msk.f32.mxu1 %vm580_vm3, %v3084_v24  ;;  %vm3055_vm10 = vcmp.gt.f32.partialorder %v3005_v51, 0.0 }
 0x7f2   : > { %vm3054_vm11 = vcmp.gt.f32.partialorder %v3000_v45, 0.0  ;;  %v3070_v31 = vmul.f32 0.2, %v3000_v45  ;;  %v7767_v12 = vpop.f32.mrb[88].mxu0  ;;  %7792 = vmatmul.mubr.msk.f32.gmra.mrb[84].mxu1 %vm580_vm3, %v3085_v54 }
 0x7f3   : > { %v3015_v25 = vadd.f32 %v7767_v12, %v9264_v39  ;;  %v3009_v56 = vpop.f32.mrb[89].mxu0  ;;  %v3087_v61 = vsel %vm3055_vm10, %v3005_v51, %v3071_v49 }
 0x7f4   : > { %v3010_v57 = vadd.f32 %v9264_v39, %v3009_v56  ;;  %v3086_v58 = vsel %vm3054_vm11, %v3000_v45, %v3070_v31 }
 0x7f5   : > { %v3073_v59 = vmul.f32 0.2, %v3015_v25  ;;  %7794 = vmatprep.mubr.msk.f32.mxu1 %vm580_vm3, %v3086_v58  ;;  %vm3057_vm12 = vcmp.gt.f32.partialorder %v3015_v25, 0.0 }
 0x7f6   : > { %vm3056_vm13 = vcmp.gt.f32.partialorder %v3010_v57, 0.0  ;;  %v3072_v63 = vmul.f32 0.2, %v3010_v57  ;;  %v7770_v33 = vpop.f32.mrb[90].mxu0  ;;  %7795 = vmatmul.mubr.msk.f32.gmra.mrb[86].mxu1 %vm580_vm3, %v3087_v61 }
 0x7f7   : > { %v3025_v35 = vadd.f32 %v7770_v33, %v9264_v39  ;;  %v3019_v1 = vpop.f32.mrb[91].mxu0  ;;  %v3089_v41 = vsel %vm3057_vm12, %v3015_v25, %v3073_v59 }
 0x7f8   : > { %v3020_v13 = vadd.f32 %v9264_v39, %v3019_v1  ;;  %v3088_v28 = vsel %vm3056_vm13, %v3010_v57, %v3072_v63 }
 0x7f9   : > { %v3075_v38 = vmul.f32 0.2, %v3025_v35  ;;  %7797 = vmatprep.mubr.msk.f32.mxu1 %vm580_vm3, %v3088_v28  ;;  %vm3059_vm14 = vcmp.gt.f32.partialorder %v3025_v35, 0.0 }
 0x7fa   : > { %vm3058_vm15 = vcmp.gt.f32.partialorder %v3020_v13, 0.0  ;;  %v3074_v30 = vmul.f32 0.2, %v3020_v13  ;;  %v7773_v29 = vpop.f32.mrb[92].mxu0  ;;  %7798 = vmatmul.mubr.msk.f32.gmra.mrb[88].mxu1 %vm580_vm3, %v3089_v41 }
 0x7fb   : > { %v3035_v60 = vadd.f32 %v7773_v29, %v9264_v39  ;;  %v3029_v2 = vpop.f32.mrb[93].mxu0  ;;  %v3091_v44 = vsel %vm3059_vm14, %v3025_v35, %v3075_v38 }
 0x7fc   : > { %v3030_v42 = vadd.f32 %v9264_v39, %v3029_v2  ;;  %v3090_v43 = vsel %vm3058_vm15, %v3020_v13, %v3074_v30 }
 0x7fd   : > { %v3077_v3 = vmul.f32 0.2, %v3035_v60  ;;  %7800 = vmatprep.mubr.msk.f32.mxu1 %vm580_vm3, %v3090_v43  ;;  %vm3061_vm1 = vcmp.gt.f32.partialorder %v3035_v60, 0.0 }
 0x7fe   : > { %vm3060_vm2 = vcmp.gt.f32.partialorder %v3030_v42, 0.0  ;;  %v3076_v20 = vmul.f32 0.2, %v3030_v42  ;;  %v7776_v46 = vpop.f32.mrb[94].mxu0  ;;  %7801 = vmatmul.mubr.msk.f32.gmra.mrb[90].mxu1 %vm580_vm3, %v3091_v44 }
 0x7ff   : > { %v3045_v47 = vadd.f32 %v7776_v46, %v9264_v39  ;;  %v3039_v21 = vpop.f32.mrb[95].mxu0  ;;  %v3093_v15 = vsel %vm3061_vm1, %v3035_v60, %v3077_v3 }
 0x800   : > { %v3040_v32 = vadd.f32 %v9264_v39, %v3039_v21  ;;  %v3092_v5 = vsel %vm3060_vm2, %v3030_v42, %v3076_v20 }
 0x801   : > { %v3079_v14 = vmul.f32 0.2, %v3045_v47  ;;  %7803 = vmatprep.mubr.msk.f32.mxu1 %vm580_vm3, %v3092_v5  ;;  %vm3063_vm4 = vcmp.gt.f32.partialorder %v3045_v47, 0.0 }
 0x802   : > { %vm3062_vm5 = vcmp.gt.f32.partialorder %v3040_v32, 0.0  ;;  %v3078_v18 = vmul.f32 0.2, %v3040_v32  ;;  %7804 = vmatmul.mubr.msk.f32.gmra.mrb[92].mxu1 %vm580_vm3, %v3093_v15  ;;  %v7815_v19 = vpop.f32.mrb[96].mxu0 }
 0x803   : > { %v3483_v22 = vadd.f32 %v7815_v19, %v9303_v62  ;;  %v3477_v23 = vpop.f32.mrb[97].mxu0  ;;  %v3095_v48 = vsel %vm3063_vm4, %v3045_v47, %v3079_v14 }
 0x804   : > { %v3478_v39 = vadd.f32 %v9303_v62, %v3477_v23  ;;  %v3094_v0 = vsel %vm3062_vm5, %v3040_v32, %v3078_v18 }
 0x805   : > { %v3573_v34 = vmul.f32 0.2, %v3483_v22  ;;  %7806 = vmatprep.mubr.msk.f32.mxu1 %vm580_vm3, %v3094_v0  ;;  %vm3557_vm6 = vcmp.gt.f32.partialorder %v3483_v22, 0.0 }
 0x806   : > { %vm3556_vm7 = vcmp.gt.f32.partialorder %v3478_v39, 0.0  ;;  %v3572_v50 = vmul.f32 0.2, %v3478_v39  ;;  %7807 = vmatmul.mubr.msk.f32.gmra.mrb[94].mxu1 %vm580_vm3, %v3095_v48  ;;  %v7818_v51 = vpop.f32.mrb[98].mxu0 }
 0x807   : > { %v3493_v52 = vadd.f32 %v7818_v51, %v9303_v62  ;;  %v3487_v45 = vpop.f32.mrb[99].mxu0  ;;  %v3589_v54 = vsel %vm3557_vm6, %v3483_v22, %v3573_v34 }
 0x808   : > { %v3488_v24 = vadd.f32 %v9303_v62, %v3487_v45  ;;  %v3588_v49 = vsel %vm3556_vm7, %v3478_v39, %v3572_v50 }
 0x809   : > { %v3575_v31 = vmul.f32 0.2, %v3493_v52  ;;  %7845 = vmatprep.mubr.msk.f32.mxu1 %vm580_vm3, %v3588_v49  ;;  %vm3559_vm8 = vcmp.gt.f32.partialorder %v3493_v52, 0.0 }
 0x80a   : > { %vm3558_vm9 = vcmp.gt.f32.partialorder %v3488_v24, 0.0  ;;  %v3574_v12 = vmul.f32 0.2, %v3488_v24  ;;  %v7821_v25 = vpop.f32.mrb[100].mxu0  ;;  %7846 = vmatmul.mubr.msk.f32.vlgmr.msra.gmra.mrb[96].mxu1 %vm580_vm3, %v3589_v54 }
 0x80b   : > { %v3503_v56 = vadd.f32 %v7821_v25, %v9303_v62  ;;  %v3497_v57 = vpop.f32.mrb[101].mxu0  ;;  %v3591_v63 = vsel %vm3559_vm8, %v3493_v52, %v3575_v31 }
 0x80c   : > { %v3498_v58 = vadd.f32 %v9303_v62, %v3497_v57  ;;  %v3590_v59 = vsel %vm3558_vm9, %v3488_v24, %v3574_v12 }
 0x80d   : > { %v3577_v61 = vmul.f32 0.2, %v3503_v56  ;;  %7848 = vmatprep.mubr.msk.f32.mxu1 %vm580_vm3, %v3590_v59  ;;  %vm3561_vm10 = vcmp.gt.f32.partialorder %v3503_v56, 0.0 }
 0x80e   : > { %vm3560_vm11 = vcmp.gt.f32.partialorder %v3498_v58, 0.0  ;;  %v3576_v33 = vmul.f32 0.2, %v3498_v58  ;;  %v7824_v35 = vpop.f32.mrb[102].mxu0  ;;  %7849 = vmatmul.mubr.msk.f32.gmra.mrb[98].mxu1 %vm580_vm3, %v3591_v63  ;;  %v6759_v63 = vld [vmem:[%s10226_s2 + $0xf8] sm:$0xff] }
 0x80f   : > { %v3513_v1 = vadd.f32 %v7824_v35, %v9303_v62  ;;  %v3507_v13 = vpop.f32.mrb[103].mxu0  ;;  %v3593_v30 = vsel %vm3561_vm10, %v3503_v56, %v3577_v61  ;;  %v6758_v61 = vld [vmem:[%s10226_s2 + $0xf0] sm:$0xff]  ;;  %v6777_v35 = vld [vmem:[%s10227_s3 + $0x60] sm:$0xff] }
 0x810   : > { %v3508_v28 = vadd.f32 %v9303_v62, %v3507_v13  ;;  %v3592_v38 = vsel %vm3560_vm11, %v3498_v58, %v3576_v33  ;;  %v6757_v58 = vld [vmem:[%s10226_s2 + $0xe8] sm:$0xff]  ;;  %v8281_v33 = vpack.c.bf16 %v6759_v63, %v6758_v61  ;;  %v6779_v13 = vld [vmem:[%s10227_s3 + $0x70] sm:$0xff] }
 0x811   : > { %v3579_v41 = vmul.f32 0.2, %v3513_v1  ;;  %7851 = vmatprep.mubr.msk.f32.mxu1 %vm580_vm3, %v3592_v38  ;;  %vm3563_vm12 = vcmp.gt.f32.partialorder %v3513_v1, 0.0  ;;  %v6780_v38 = vld [vmem:[%s10227_s3 + $0x78] sm:$0xff] }
 0x812   : > { %vm3562_vm13 = vcmp.gt.f32.partialorder %v3508_v28, 0.0  ;;  %v3578_v29 = vmul.f32 0.2, %v3508_v28  ;;  %v7827_v60 = vpop.f32.mrb[104].mxu0  ;;  %7852 = vmatmul.mubr.msk.f32.gmra.mrb[100].mxu1 %vm580_vm3, %v3593_v30 }
 0x813   : > { %v3523_v2 = vadd.f32 %v7827_v60, %v9303_v62  ;;  %v3517_v42 = vpop.f32.mrb[105].mxu0  ;;  %v3595_v20 = vsel %vm3563_vm12, %v3513_v1, %v3579_v41  ;;  %v6778_v1 = vld [vmem:[%s10227_s3 + $0x68] sm:$0xff]  ;;  %v8289_v41 = vpack.c.bf16 %v6780_v38, %v6779_v13 }
 0x814   : > { %v3518_v43 = vadd.f32 %v9303_v62, %v3517_v42  ;;  %v3594_v3 = vsel %vm3562_vm13, %v3508_v28, %v3578_v29  ;;  %v8285_v28 = vpack.c.bf16 %v6778_v1, %v6777_v35 }
 0x815   : > { %v3581_v44 = vmul.f32 0.2, %v3523_v2  ;;  %7854 = vmatprep.mubr.msk.f32.mxu1 %vm580_vm3, %v3594_v3  ;;  %vm3565_vm14 = vcmp.gt.f32.partialorder %v3523_v2, 0.0 }
 0x816   : > { %vm3564_vm15 = vcmp.gt.f32.partialorder %v3518_v43, 0.0  ;;  %v3580_v46 = vmul.f32 0.2, %v3518_v43  ;;  %v7830_v47 = vpop.f32.mrb[106].mxu0  ;;  %7855 = vmatmul.mubr.msk.f32.gmra.mrb[102].mxu1 %vm580_vm3, %v3595_v20  ;;  %8286 = vmatprep.subr.bf16.mxu1 %v8285_v28 }
 0x817   : > { %v3533_v21 = vadd.f32 %v7830_v47, %v9303_v62  ;;  %v3527_v32 = vpop.f32.mrb[107].mxu0  ;;  %v3597_v18 = vsel %vm3565_vm14, %v3523_v2, %v3581_v44  ;;  %8288 = vmatpush3.bf16.msra.mxu1 %v8285_v28 }
 0x818   : > { %v3528_v5 = vadd.f32 %v9303_v62, %v3527_v32  ;;  %v3596_v14 = vsel %vm3564_vm15, %v3518_v43, %v3580_v46  ;;  %8290 = vmatprep.subr.bf16.mxu1 %v8289_v41 }
 0x819   : > { %v3583_v15 = vmul.f32 0.2, %v3533_v21  ;;  %7857 = vmatprep.mubr.msk.f32.mxu1 %vm580_vm3, %v3596_v14  ;;  %vm3567_vm1 = vcmp.gt.f32.partialorder %v3533_v21, 0.0 }
 0x81a   : > { %vm3566_vm2 = vcmp.gt.f32.partialorder %v3528_v5, 0.0  ;;  %v3582_v19 = vmul.f32 0.2, %v3528_v5  ;;  %v7833_v22 = vpop.f32.mrb[108].mxu0  ;;  %7858 = vmatmul.mubr.msk.f32.gmra.mrb[104].mxu1 %vm580_vm3, %v3597_v18  ;;  %v9400_v18 = vld [vmem:[%s10228_s4 + $0xa] ss:$0 sm:$0xff] }
 0x81b   : > { %v3543_v23 = vadd.f32 %v7833_v22, %v9303_v62  ;;  %v3537_v39 = vpop.f32.mrb[109].mxu0  ;;  %v3599_v50 = vsel %vm3567_vm1, %v3533_v21, %v3583_v15  ;;  %8292 = vmatpush3.bf16.msra.mxu1 %v8289_v41 }
 0x81c   : > { %v3538_v0 = vadd.f32 %v9303_v62, %v3537_v39  ;;  %v3598_v34 = vsel %vm3566_vm2, %v3528_v5, %v3582_v19 }
 0x81d   : > { %v3585_v48 = vmul.f32 0.2, %v3543_v23  ;;  %7860 = vmatprep.mubr.msk.f32.mxu1 %vm580_vm3, %v3598_v34  ;;  %vm3569_vm4 = vcmp.gt.f32.partialorder %v3543_v23, 0.0 }
 0x81e   : > { %vm3568_vm5 = vcmp.gt.f32.partialorder %v3538_v0, 0.0  ;;  %v3584_v51 = vmul.f32 0.2, %v3538_v0  ;;  %v7836_v52 = vpop.f32.mrb[110].mxu0  ;;  %7861 = vmatmul.mubr.msk.f32.gmra.mrb[106].mxu1 %vm580_vm3, %v3599_v50 }
 0x81f   : > { %v3553_v45 = vadd.f32 %v7836_v52, %v9303_v62  ;;  %v3547_v24 = vpop.f32.mrb[111].mxu0  ;;  %v3601_v12 = vsel %vm3569_vm4, %v3543_v23, %v3585_v48 }
 0x820   : > { %v3548_v49 = vadd.f32 %v9303_v62, %v3547_v24  ;;  %v3600_v54 = vsel %vm3568_vm5, %v3538_v0, %v3584_v51  ;;  %v6756_v62 = vld [vmem:[%s10226_s2 + $0xe0] sm:$0xff] }
 0x821   : > { %v3587_v31 = vmul.f32 0.2, %v3553_v45  ;;  %7863 = vmatprep.mubr.msk.f32.mxu1 %vm580_vm3, %v3600_v54  ;;  %vm3571_vm6 = vcmp.gt.f32.partialorder %v3553_v45, 0.0  ;;  %v8277_v59 = vpack.c.bf16 %v6757_v58, %v6756_v62 }
 0x822   : > { %vm3570_vm7 = vcmp.gt.f32.partialorder %v3548_v49, 0.0  ;;  %v3586_v25 = vmul.f32 0.2, %v3548_v49  ;;  %7864 = vmatmul.mubr.msk.f32.gmra.mrb[108].mxu1 %vm580_vm3, %v3601_v12 }
 0x823   : > { %v3603_v57 = vsel %vm3571_vm6, %v3553_v45, %v3587_v31  ;;  %8278 = vmatprep.subr.bf16.mxu0 %v8277_v59 }
 0x824   : > { %v3602_v56 = vsel %vm3570_vm7, %v3548_v49, %v3586_v25  ;;  %8280 = vmatpush3.bf16.msra.mxu0 %v8277_v59 }
 0x825   : > { %7866 = vmatprep.mubr.msk.f32.mxu1 %vm580_vm3, %v3602_v56  ;;  %8282 = vmatprep.subr.bf16.mxu0 %v8281_v33 }
 0x826   : > { %7867 = vmatmul.mubr.msk.f32.gmra.mrb[110].mxu1 %vm580_vm3, %v3603_v57 }
 0x828   : > { %8284 = vmatpush3.bf16.msra.mxu0 %v8281_v33 }
 0x8bd   : > { %v9365_v30 = vpop.f32.mrb[80].mxu1 }
 0x8be   : > { %v9367_v29 = vpop.f32.mrb[81].mxu1 }
 0x8c1   : > { %v9369_v60 = vpop.f32.mrb[82].mxu1 }
 0x8c2   : > { %v9371_v2 = vpop.f32.mrb[83].mxu1 }
 0x8c5   : > { %v9373_v42 = vpop.f32.mrb[84].mxu1 }
 0x8c6   : > { %v9375_v43 = vpop.f32.mrb[85].mxu1 }
 0x8c9   : > { %v9377_v3 = vpop.f32.mrb[86].mxu1 }
 0x8ca   : > { %v9379_v44 = vpop.f32.mrb[87].mxu1 }
 0x8cd   : > { %v9381_v20 = vpop.f32.mrb[88].mxu1 }
 0x8ce   : > { %v9383_v46 = vpop.f32.mrb[89].mxu1 }
 0x8d1   : > { %v9385_v47 = vpop.f32.mrb[90].mxu1 }
 0x8d2   : > { %v9387_v21 = vpop.f32.mrb[91].mxu1 }
 0x8d5   : > { %v9389_v32 = vpop.f32.mrb[92].mxu1 }
 0x8d6   : > { %v9391_v5 = vpop.f32.mrb[93].mxu1 }
 0x8d9   : > { %v9393_v14 = vpop.f32.mrb[94].mxu1 }
 0x8da   : > { %v9395_v15 = vpop.f32.mrb[95].mxu1 }
 0x8dd   : > { %v7847_v19 = vpop.f32.mrb[96].mxu1 }
 0x8de   : > { %v3734_v22 = vadd.f32 %v7847_v19, %v9400_v18  ;;  %v3728_v23 = vpop.f32.mrb[97].mxu1 }
 0x8df   : > { %v3729_v39 = vadd.f32 %v9400_v18, %v3728_v23 }
 0x8e0   : > { %v3824_v0 = vmul.f32 0.2, %v3734_v22  ;;  %vm3808_vm8 = vcmp.gt.f32.partialorder %v3734_v22, 0.0 }
 0x8e1   : > { %vm3807_vm9 = vcmp.gt.f32.partialorder %v3729_v39, 0.0  ;;  %v3823_v34 = vmul.f32 0.2, %v3729_v39  ;;  %v7850_v48 = vpop.f32.mrb[98].mxu1 }
 0x8e2   : > { %v3744_v50 = vadd.f32 %v7850_v48, %v9400_v18  ;;  %v3738_v51 = vpop.f32.mrb[99].mxu1  ;;  %v3840_v24 = vsel %vm3808_vm8, %v3734_v22, %v3824_v0 }
 0x8e3   : > { %v3739_v52 = vadd.f32 %v9400_v18, %v3738_v51  ;;  %v3839_v45 = vsel %vm3807_vm9, %v3729_v39, %v3823_v34 }
 0x8e4   : > { %v3826_v49 = vmul.f32 0.2, %v3744_v50  ;;  %7877 = vmatprep.mubr.msk.f32.mxu0 %vm580_vm3, %v3839_v45  ;;  %vm3810_vm10 = vcmp.gt.f32.partialorder %v3744_v50, 0.0 }
 0x8e5   : > { %vm3809_vm11 = vcmp.gt.f32.partialorder %v3739_v52, 0.0  ;;  %v3825_v54 = vmul.f32 0.2, %v3739_v52  ;;  %v7853_v31 = vpop.f32.mrb[100].mxu1  ;;  %7878 = vmatmul.mubr.msk.f32.vlgmr.msra.gmra.mrb[112].mxu0 %vm580_vm3, %v3840_v24 }
 0x8e6   : > { %v3754_v12 = vadd.f32 %v7853_v31, %v9400_v18  ;;  %v3748_v25 = vpop.f32.mrb[101].mxu1  ;;  %v3842_v58 = vsel %vm3810_vm10, %v3744_v50, %v3826_v49 }
 0x8e7   : > { %v3749_v56 = vadd.f32 %v9400_v18, %v3748_v25  ;;  %v3841_v57 = vsel %vm3809_vm11, %v3739_v52, %v3825_v54 }
 0x8e8   : > { %v3828_v62 = vmul.f32 0.2, %v3754_v12  ;;  %7880 = vmatprep.mubr.msk.f32.mxu0 %vm580_vm3, %v3841_v57  ;;  %vm3812_vm12 = vcmp.gt.f32.partialorder %v3754_v12, 0.0 }
 0x8e9   : > { %vm3811_vm13 = vcmp.gt.f32.partialorder %v3749_v56, 0.0  ;;  %v3827_v59 = vmul.f32 0.2, %v3749_v56  ;;  %v7856_v61 = vpop.f32.mrb[102].mxu1  ;;  %7881 = vmatmul.mubr.msk.f32.gmra.mrb[114].mxu0 %vm580_vm3, %v3842_v58 }
 0x8ea   : > { %v3764_v63 = vadd.f32 %v7856_v61, %v9400_v18  ;;  %v3758_v33 = vpop.f32.mrb[103].mxu1  ;;  %v3844_v28 = vsel %vm3812_vm12, %v3754_v12, %v3828_v62 }
 0x8eb   : > { %v3759_v35 = vadd.f32 %v9400_v18, %v3758_v33  ;;  %v3843_v1 = vsel %vm3811_vm13, %v3749_v56, %v3827_v59 }
 0x8ec   : > { %v3830_v13 = vmul.f32 0.2, %v3764_v63  ;;  %7883 = vmatprep.mubr.msk.f32.mxu0 %vm580_vm3, %v3843_v1  ;;  %vm3814_vm14 = vcmp.gt.f32.partialorder %v3764_v63, 0.0 }
 0x8ed   : > { %vm3813_vm15 = vcmp.gt.f32.partialorder %v3759_v35, 0.0  ;;  %v3829_v38 = vmul.f32 0.2, %v3759_v35  ;;  %v7859_v41 = vpop.f32.mrb[104].mxu1  ;;  %7884 = vmatmul.mubr.msk.f32.gmra.mrb[116].mxu0 %vm580_vm3, %v3844_v28 }
 0x8ee   : > { %v3774_v19 = vadd.f32 %v7859_v41, %v9400_v18  ;;  %v3768_v22 = vpop.f32.mrb[105].mxu1  ;;  %v3846_v34 = vsel %vm3814_vm14, %v3764_v63, %v3830_v13 }
 0x8ef   : > { %v3769_v23 = vadd.f32 %v9400_v18, %v3768_v22  ;;  %v3845_v39 = vsel %vm3813_vm15, %v3759_v35, %v3829_v38 }
 0x8f0   : > { %v3832_v0 = vmul.f32 0.2, %v3774_v19  ;;  %7886 = vmatprep.mubr.msk.f32.mxu0 %vm580_vm3, %v3845_v39  ;;  %vm3816_vm1 = vcmp.gt.f32.partialorder %v3774_v19, 0.0 }
 0x8f1   : > { %vm3815_vm2 = vcmp.gt.f32.partialorder %v3769_v23, 0.0  ;;  %v3831_v48 = vmul.f32 0.2, %v3769_v23  ;;  %v7862_v50 = vpop.f32.mrb[106].mxu1  ;;  %7887 = vmatmul.mubr.msk.f32.gmra.mrb[118].mxu0 %vm580_vm3, %v3846_v34 }
 0x8f2   : > { %v3784_v51 = vadd.f32 %v7862_v50, %v9400_v18  ;;  %v3778_v52 = vpop.f32.mrb[107].mxu1  ;;  %v3848_v54 = vsel %vm3816_vm1, %v3774_v19, %v3832_v0  ;;  %v9443_v0 = vld [vmem:[%s10228_s4 + $0xb] ss:$0 sm:$0xff] }
 0x8f3   : > { %v3779_v45 = vadd.f32 %v9400_v18, %v3778_v52  ;;  %v3847_v24 = vsel %vm3815_vm2, %v3769_v23, %v3831_v48  ;;  %v6801_v23 = vld [vmem:[%s10225_s1 + $0x48] sm:$0xff] }
 0x8f4   : > { %v3834_v49 = vmul.f32 0.2, %v3784_v51  ;;  %7889 = vmatprep.mubr.msk.f32.mxu0 %vm580_vm3, %v3847_v24  ;;  %vm3818_vm4 = vcmp.gt.f32.partialorder %v3784_v51, 0.0 }
 0x8f5   : > { %vm3817_vm5 = vcmp.gt.f32.partialorder %v3779_v45, 0.0  ;;  %v3833_v31 = vmul.f32 0.2, %v3779_v45  ;;  %v7865_v12 = vpop.f32.mrb[108].mxu1  ;;  %7890 = vmatmul.mubr.msk.f32.gmra.mrb[120].mxu0 %vm580_vm3, %v3848_v54 }
 0x8f6   : > { %v3794_v25 = vadd.f32 %v7865_v12, %v9400_v18  ;;  %v3788_v56 = vpop.f32.mrb[109].mxu1  ;;  %v3850_v59 = vsel %vm3818_vm4, %v3784_v51, %v3834_v49 }
 0x8f7   : > { %v3789_v57 = vadd.f32 %v9400_v18, %v3788_v56  ;;  %v3849_v62 = vsel %vm3817_vm5, %v3779_v45, %v3833_v31 }
 0x8f8   : > { %v3836_v58 = vmul.f32 0.2, %v3794_v25  ;;  %7892 = vmatprep.mubr.msk.f32.mxu0 %vm580_vm3, %v3849_v62  ;;  %vm3820_vm6 = vcmp.gt.f32.partialorder %v3794_v25, 0.0 }
 0x8f9   : > { %vm3819_vm7 = vcmp.gt.f32.partialorder %v3789_v57, 0.0  ;;  %v3835_v61 = vmul.f32 0.2, %v3789_v57  ;;  %v7868_v63 = vpop.f32.mrb[110].mxu1  ;;  %7893 = vmatmul.mubr.msk.f32.gmra.mrb[122].mxu0 %vm580_vm3, %v3850_v59 }
 0x8fa   : > { %v3804_v33 = vadd.f32 %v7868_v63, %v9400_v18  ;;  %v3798_v35 = vpop.f32.mrb[111].mxu1  ;;  %v3852_v38 = vsel %vm3820_vm6, %v3794_v25, %v3836_v58 }
 0x8fb   : > { %v3799_v1 = vadd.f32 %v9400_v18, %v3798_v35  ;;  %v3851_v13 = vsel %vm3819_vm7, %v3789_v57, %v3835_v61  ;;  %v6800_v18 = vld [vmem:[%s10225_s1 + $0x40] sm:$0xff] }
 0x8fc   : > { %v3838_v28 = vmul.f32 0.2, %v3804_v33  ;;  %7895 = vmatprep.mubr.msk.f32.mxu0 %vm580_vm3, %v3851_v13  ;;  %vm3822_vm8 = vcmp.gt.f32.partialorder %v3804_v33, 0.0  ;;  %v8293_v39 = vpack.c.bf16 %v6801_v23, %v6800_v18 }
 0x8fd   : > { %vm3821_vm9 = vcmp.gt.f32.partialorder %v3799_v1, 0.0  ;;  %v3837_v41 = vmul.f32 0.2, %v3799_v1  ;;  %7896 = vmatmul.mubr.msk.f32.gmra.mrb[124].mxu0 %vm580_vm3, %v3852_v38 }
 0x8fe   : > { %v3854_v22 = vsel %vm3822_vm8, %v3804_v33, %v3838_v28  ;;  %8294 = vmatprep.subr.bf16.mxu0 %v8293_v39 }
 0x8ff   : > { %v3853_v19 = vsel %vm3821_vm9, %v3799_v1, %v3837_v41  ;;  %8296 = vmatpush3.bf16.msra.mxu0 %v8293_v39 }
 0x900   : > { %7898 = vmatprep.mubr.msk.f32.mxu0 %vm580_vm3, %v3853_v19 }
 0x901   : > { %7899 = vmatmul.mubr.msk.f32.gmra.mrb[126].mxu0 %vm580_vm3, %v3854_v22 }
 0x9b8   : > { %v7879_v34 = vpop.f32.mrb[112].mxu0 }
 0x9b9   : > { %v3985_v48 = vadd.f32 %v7879_v34, %v9443_v0  ;;  %v3979_v50 = vpop.f32.mrb[113].mxu0 }
 0x9ba   : > { %v3980_v51 = vadd.f32 %v9443_v0, %v3979_v50 }
 0x9bb   : > { %v4075_v52 = vmul.f32 0.2, %v3985_v48  ;;  %vm4059_vm10 = vcmp.gt.f32.partialorder %v3985_v48, 0.0 }
 0x9bc   : > { %vm4058_vm11 = vcmp.gt.f32.partialorder %v3980_v51, 0.0  ;;  %v4074_v45 = vmul.f32 0.2, %v3980_v51  ;;  %v7882_v24 = vpop.f32.mrb[114].mxu0 }
 0x9bd   : > { %v3995_v49 = vadd.f32 %v7882_v24, %v9443_v0  ;;  %v3989_v54 = vpop.f32.mrb[115].mxu0  ;;  %v4091_v25 = vsel %vm4059_vm10, %v3985_v48, %v4075_v52 }
 0x9be   : > { %v3990_v31 = vadd.f32 %v9443_v0, %v3989_v54  ;;  %v4090_v12 = vsel %vm4058_vm11, %v3980_v51, %v4074_v45 }
 0x9bf   : > { %v4077_v56 = vmul.f32 0.2, %v3995_v49  ;;  %7909 = vmatprep.mubr.msk.f32.mxu1 %vm580_vm3, %v4090_v12  ;;  %vm4061_vm12 = vcmp.gt.f32.partialorder %v3995_v49, 0.0 }
 0x9c0   : > { %vm4060_vm13 = vcmp.gt.f32.partialorder %v3990_v31, 0.0  ;;  %v4076_v57 = vmul.f32 0.2, %v3990_v31  ;;  %v7885_v62 = vpop.f32.mrb[116].mxu0  ;;  %7910 = vmatmul.mubr.msk.f32.vlgmr.msra.gmra.mrb[112].mxu1 %vm580_vm3, %v4091_v25 }
 0x9c1   : > { %v4005_v58 = vadd.f32 %v7885_v62, %v9443_v0  ;;  %v3999_v59 = vpop.f32.mrb[117].mxu0  ;;  %v4093_v35 = vsel %vm4061_vm12, %v3995_v49, %v4077_v56 }
 0x9c2   : > { %v4000_v61 = vadd.f32 %v9443_v0, %v3999_v59  ;;  %v4092_v63 = vsel %vm4060_vm13, %v3990_v31, %v4076_v57 }
 0x9c3   : > { %v4079_v33 = vmul.f32 0.2, %v4005_v58  ;;  %7912 = vmatprep.mubr.msk.f32.mxu1 %vm580_vm3, %v4092_v63  ;;  %vm4063_vm14 = vcmp.gt.f32.partialorder %v4005_v58, 0.0 }
 0x9c4   : > { %vm4062_vm15 = vcmp.gt.f32.partialorder %v4000_v61, 0.0  ;;  %v4078_v1 = vmul.f32 0.2, %v4000_v61  ;;  %v7888_v13 = vpop.f32.mrb[118].mxu0  ;;  %7913 = vmatmul.mubr.msk.f32.gmra.mrb[114].mxu1 %vm580_vm3, %v4093_v35 }
 0x9c5   : > { %v4015_v28 = vadd.f32 %v7888_v13, %v9443_v0  ;;  %v4009_v38 = vpop.f32.mrb[119].mxu0  ;;  %v4095_v18 = vsel %vm4063_vm14, %v4005_v58, %v4079_v33 }
 0x9c6   : > { %v4010_v41 = vadd.f32 %v9443_v0, %v4009_v38  ;;  %v4094_v19 = vsel %vm4062_vm15, %v4000_v61, %v4078_v1 }
 0x9c7   : > { %v4081_v22 = vmul.f32 0.2, %v4015_v28  ;;  %7915 = vmatprep.mubr.msk.f32.mxu1 %vm580_vm3, %v4094_v19  ;;  %vm4065_vm1 = vcmp.gt.f32.partialorder %v4015_v28, 0.0 }
 0x9c8   : > { %vm4064_vm2 = vcmp.gt.f32.partialorder %v4010_v41, 0.0  ;;  %v4080_v23 = vmul.f32 0.2, %v4010_v41  ;;  %v7891_v39 = vpop.f32.mrb[120].mxu0  ;;  %7916 = vmatmul.mubr.msk.f32.gmra.mrb[116].mxu1 %vm580_vm3, %v4095_v18 }
 0x9c9   : > { %v4025_v34 = vadd.f32 %v7891_v39, %v9443_v0  ;;  %v4019_v48 = vpop.f32.mrb[121].mxu0  ;;  %v4097_v45 = vsel %vm4065_vm1, %v4015_v28, %v4081_v22 }
 0x9ca   : > { %v4020_v50 = vadd.f32 %v9443_v0, %v4019_v48  ;;  %v4096_v51 = vsel %vm4064_vm2, %v4010_v41, %v4080_v23 }
 0x9cb   : > { %v4083_v52 = vmul.f32 0.2, %v4025_v34  ;;  %7918 = vmatprep.mubr.msk.f32.mxu1 %vm580_vm3, %v4096_v51  ;;  %vm4067_vm4 = vcmp.gt.f32.partialorder %v4025_v34, 0.0  ;;  %v6821_v51 = vld [vmem:[%s10226_s2 + $0x110] sm:$0xff] }
 0x9cc   : > { %vm4066_vm5 = vcmp.gt.f32.partialorder %v4020_v50, 0.0  ;;  %v4082_v24 = vmul.f32 0.2, %v4020_v50  ;;  %v7894_v49 = vpop.f32.mrb[122].mxu0  ;;  %7919 = vmatmul.mubr.msk.f32.gmra.mrb[118].mxu1 %vm580_vm3, %v4097_v45  ;;  %v6822_v45 = vld [vmem:[%s10226_s2 + $0x118] sm:$0xff] }
 0x9cd   : > { %v4035_v54 = vadd.f32 %v7894_v49, %v9443_v0  ;;  %v4029_v31 = vpop.f32.mrb[123].mxu0  ;;  %v4099_v57 = vsel %vm4067_vm4, %v4025_v34, %v4083_v52  ;;  %v9492_v49 = vld [vmem:[%s10229_s5 + $0x2] ss:$0 sm:$0xff] }
 0x9ce   : > { %v4030_v12 = vadd.f32 %v9443_v0, %v4029_v31  ;;  %v4098_v25 = vsel %vm4066_vm5, %v4020_v50, %v4082_v24  ;;  %v6820_v50 = vld [vmem:[%s10226_s2 + $0x108] sm:$0xff]  ;;  %v8301_v24 = vpack.c.bf16 %v6822_v45, %v6821_v51  ;;  %v9499_v31 = vld [vmem:[%s10230_s6 + $0x6] ss:$0 sm:$0xff] }
 0x9cf   : > { %v4085_v56 = vmul.f32 0.2, %v4035_v54  ;;  %7921 = vmatprep.mubr.msk.f32.mxu1 %vm580_vm3, %v4098_v25  ;;  %vm4069_vm6 = vcmp.gt.f32.partialorder %v4035_v54, 0.0  ;;  %v9506_v25 = vld [vmem:[%s10229_s5 + $0x3] ss:$0 sm:$0xff] }
 0x9d0   : > { %vm4068_vm7 = vcmp.gt.f32.partialorder %v4030_v12, 0.0  ;;  %v4084_v62 = vmul.f32 0.2, %v4030_v12  ;;  %v7897_v58 = vpop.f32.mrb[124].mxu0  ;;  %7922 = vmatmul.mubr.msk.f32.gmra.mrb[120].mxu1 %vm580_vm3, %v4099_v57  ;;  %v3236_v57 = vadd.f32 %v9369_v60, %v9492_v49 }
 0x9d1   : > { %v4045_v59 = vadd.f32 %v7897_v58, %v9443_v0  ;;  %v4039_v61 = vpop.f32.mrb[125].mxu0  ;;  %v4101_v1 = vsel %vm4069_vm6, %v4035_v54, %v4085_v56  ;;  %v3226_v54 = vadd.f32 %v9365_v30, %v9492_v49  ;;  %v9517_v58 = vld [vmem:[%s10230_s6 + $0x7] ss:$0 sm:$0xff] }
 0x9d2   : > { %v4040_v63 = vadd.f32 %v9443_v0, %v4039_v61  ;;  %v4100_v33 = vsel %vm4068_vm7, %v4030_v12, %v4084_v62  ;;  %v3221_v12 = vadd.f32 %v9492_v49, %v9367_v29  ;;  %v3231_v62 = vadd.f32 %v9492_v49, %v9371_v2 }
 0x9d3   : > { %v4087_v35 = vmul.f32 0.2, %v4045_v59  ;;  %7924 = vmatprep.mubr.msk.f32.mxu1 %vm580_vm3, %v4100_v33  ;;  %vm4071_vm8 = vcmp.gt.f32.partialorder %v4045_v59, 0.0  ;;  %v3304_v56 = vmul.f32 %v9499_v31, %v3226_v54  ;;  %v3241_v2 = vadd.f32 %v9492_v49, %v9375_v43 }
 0x9d4   : > { %vm4070_vm9 = vcmp.gt.f32.partialorder %v4040_v63, 0.0  ;;  %v4086_v13 = vmul.f32 0.2, %v4040_v63  ;;  %v7900_v28 = vpop.f32.mrb[126].mxu0  ;;  %7925 = vmatmul.mubr.msk.f32.gmra.mrb[122].mxu1 %vm580_vm3, %v4101_v1  ;;  %v3303_v30 = vmul.f32 %v9499_v31, %v3221_v12 }
 0x9d5   : > { %v4055_v38 = vadd.f32 %v7900_v28, %v9443_v0  ;;  %v4049_v41 = vpop.f32.mrb[127].mxu0  ;;  %v4103_v23 = vsel %vm4071_vm8, %v4045_v59, %v4087_v35  ;;  %v3320_v60 = vadd.f32 %v3304_v56, %v8957_v4  ;;  %v3306_v35 = vmul.f32 %v9499_v31, %v3236_v57  ;;  %v9536_v4 = vld [vmem:[%s10230_s6 + $0x8] ss:$0 sm:$0xff] }
 0x9d6   : > { %v4050_v19 = vadd.f32 %v9443_v0, %v4049_v41  ;;  %v4102_v22 = vsel %vm4070_vm9, %v4040_v63, %v4086_v13  ;;  %v6819_v0 = vld [vmem:[%s10226_s2 + $0x100] sm:$0xff]  ;;  %v3246_v63 = vadd.f32 %v9373_v42, %v9492_v49  ;;  %v3319_v13 = vadd.f32 %v3303_v30, %v8966_v6 }
 0x9d7   : > { %v4089_v18 = vmul.f32 0.2, %v4055_v38  ;;  %7927 = vmatprep.mubr.msk.f32.mxu1 %vm580_vm3, %v4102_v22  ;;  %vm4073_vm10 = vcmp.gt.f32.partialorder %v4055_v38, 0.0  ;;  %v8297_v52 = vpack.c.bf16 %v6820_v50, %v6819_v0  ;;  %v3305_v28 = vmul.f32 %v9499_v31, %v3231_v62 }
 0x9d8   : > { %vm4072_vm11 = vcmp.gt.f32.partialorder %v4050_v19, 0.0  ;;  %v4088_v39 = vmul.f32 0.2, %v4050_v19  ;;  %7928 = vmatmul.mubr.msk.f32.gmra.mrb[124].mxu1 %vm580_vm3, %v4103_v23  ;;  %v3308_v43 = vmul.f32 %v9499_v31, %v3246_v63  ;;  %v3322_v23 = vadd.f32 %v3306_v35, %v8982_v53 }
 0x9d9   : > { %v4105_v48 = vsel %vm4073_vm10, %v4055_v38, %v4089_v18  ;;  %8298 = vmatprep.subr.bf16.mxu1 %v8297_v52  ;;  %v3321_v0 = vadd.f32 %v3305_v28, %v8986_v9  ;;  %v3251_v50 = vadd.f32 %v9492_v49, %v9379_v44  ;;  %v3266_v30 = vadd.f32 %v9381_v20, %v9492_v49 }
 0x9da   : > { %v4104_v34 = vsel %vm4072_vm11, %v4050_v19, %v4088_v39  ;;  %8300 = vmatpush3.bf16.msra.mxu1 %v8297_v52  ;;  %v3307_v39 = vmul.f32 %v9499_v31, %v3241_v2  ;;  %v3324_v12 = vadd.f32 %v3308_v43, %v9002_v36  ;;  %v3261_v36 = vadd.f32 %v9492_v49, %v9383_v46 }
 0x9db   : > { %7930 = vmatprep.mubr.msk.f32.mxu1 %vm580_vm3, %v4104_v34  ;;  %8302 = vmatprep.subr.bf16.mxu1 %v8301_v24  ;;  %v3256_v34 = vadd.f32 %v9377_v3, %v9492_v49  ;;  %v3276_v35 = vadd.f32 %v9385_v47, %v9492_v49  ;;  %v3271_v28 = vadd.f32 %v9492_v49, %v9387_v21 }
 0x9dc   : > { %7931 = vmatmul.mubr.msk.f32.gmra.mrb[126].mxu1 %vm580_vm3, %v4105_v48  ;;  %v3323_v56 = vadd.f32 %v3307_v39, %v9009_v40  ;;  %v3311_v47 = vmul.f32 %v9499_v31, %v3261_v36 }
 0x9dd   : > { %v3310_v57 = vmul.f32 %v9499_v31, %v3256_v34  ;;  %v3314_v39 = vmul.f32 %v9499_v31, %v3276_v35 }
 0x9de   : > { %8304 = vmatpush3.bf16.msra.mxu1 %v8301_v24 }
 0xa93   : > { %v7911_v29 = vpop.f32.mrb[112].mxu1 }
 0xa94   : > { %v4236_v59 = vadd.f32 %v7911_v29, %v9506_v25  ;;  %v4230_v61 = vpop.f32.mrb[113].mxu1  ;;  %v3309_v29 = vmul.f32 %v9499_v31, %v3251_v50  ;;  %v3286_v50 = vadd.f32 %v9389_v32, %v9492_v49 }
 0xa95   : > { %v4231_v33 = vadd.f32 %v9506_v25, %v4230_v61 }
 0xa96   : > { %v4314_v1 = vmul.f32 %v9517_v58, %v4236_v59 }
 0xa97   : > { %v4313_v38 = vmul.f32 %v9517_v58, %v4231_v33  ;;  %v7914_v41 = vpop.f32.mrb[114].mxu1 }
 0xa98   : > { %v9531_v19 = vadd.f32 %v4314_v1, %v3320_v60  ;;  %v4246_v42 = vadd.f32 %v7914_v41, %v9506_v25  ;;  %v4240_v22 = vpop.f32.mrb[115].mxu1  ;;  %v3326_v1 = vadd.f32 %v3310_v57, %v9024_v7  ;;  %v3325_v41 = vadd.f32 %v3309_v29, %v9030_v11 }
 0xa99   : > { %v9540_v18 = vadd.f32 %v4313_v38, %v3319_v13  ;;  %v4241_v6 = vadd.f32 %v9506_v25, %v4240_v22  ;;  %v3312_v13 = vmul.f32 %v9499_v31, %v3266_v30  ;;  %v3316_v30 = vmul.f32 %v9499_v31, %v3286_v50  ;;  %v6842_v50 = vld [vmem:[%s10226_s2 + $0x130] sm:$0xff] }
 0xa9a   : > { %v4316_v48 = vmul.f32 %v9517_v58, %v4246_v42  ;;  %v4354_v53 = vmul.f32 %v9536_v4, %v9531_v19 }
 0xa9b   : > { %v4315_v51 = vmul.f32 %v9517_v58, %v4241_v6  ;;  %v7917_v52 = vpop.f32.mrb[116].mxu1  ;;  %v4353_v45 = vmul.f32 %v9536_v4, %v9540_v18 }
 0xa9c   : > { %v9556_v24 = vadd.f32 %v4316_v48, %v3322_v23  ;;  %v4256_v3 = vadd.f32 %v7917_v52, %v9506_v25  ;;  %v4250_v54 = vpop.f32.mrb[117].mxu1  ;;  %v3328_v48 = vadd.f32 %v3312_v13, %v9046_v10  ;;  %v3327_v52 = vadd.f32 %v3311_v47, %v9052_v55 }
 0xa9d   : > { %v9560_v9 = vadd.f32 %v4315_v51, %v3321_v0  ;;  %v4251_v44 = vadd.f32 %v9506_v25, %v4250_v54  ;;  %7937 = vmatprep.mubr.msk.f32.mxu0 %vm329_vm0, %v4353_v45  ;;  %v3313_v0 = vmul.f32 %v9499_v31, %v3271_v28  ;;  %v3281_v45 = vadd.f32 %v9492_v49, %v9391_v5 }
 0xa9e   : > { %v4318_v62 = vmul.f32 %v9517_v58, %v4256_v3  ;;  %7938 = vmatmul.mubr.msk.f32.vlgmr.msra.gmra.mrb[128].mxu0 %vm329_vm0, %v4354_v53  ;;  %v4356_v60 = vmul.f32 %v9536_v4, %v9556_v24 }
 0xa9f   : > { %v4317_v59 = vmul.f32 %v9517_v58, %v4251_v44  ;;  %v7920_v61 = vpop.f32.mrb[118].mxu1  ;;  %v4355_v40 = vmul.f32 %v9536_v4, %v9560_v9  ;;  %v3329_v57 = vadd.f32 %v3313_v0, %v9073_v16  ;;  %v3315_v36 = vmul.f32 %v9499_v31, %v3281_v45  ;;  %v6841_v0 = vld [vmem:[%s10226_s2 + $0x128] sm:$0xff] }
 0xaa0   : > { %v9576_v63 = vadd.f32 %v4318_v62, %v3324_v12  ;;  %v4266_v33 = vadd.f32 %v7920_v61, %v9506_v25  ;;  %v4260_v20 = vpop.f32.mrb[119].mxu1  ;;  %v3296_v62 = vadd.f32 %v9393_v14, %v9492_v49  ;;  %v9705_v45 = vld [vmem:[%s10228_s4 + $0xc] ss:$0 sm:$0xff] }
 0xaa1   : > { %v9583_v2 = vadd.f32 %v4317_v59, %v3323_v56  ;;  %v4261_v46 = vadd.f32 %v9506_v25, %v4260_v20  ;;  %7940 = vmatprep.mubr.msk.f32.mxu0 %vm329_vm0, %v4355_v40  ;;  %v3330_v56 = vadd.f32 %v3314_v39, %v9068_v37  ;;  %v3291_v37 = vadd.f32 %v9492_v49, %v9395_v15 }
 0xaa2   : > { %v4320_v38 = vmul.f32 %v9517_v58, %v4266_v33  ;;  %7941 = vmatmul.mubr.msk.f32.gmra.mrb[130].mxu0 %vm329_vm0, %v4356_v60  ;;  %v4358_v21 = vmul.f32 %v9536_v4, %v9576_v63  ;;  %v3332_v15 = vadd.f32 %v3316_v30, %v9086_v17  ;;  %v3318_v49 = vmul.f32 %v9499_v31, %v3296_v62 }
 0xaa3   : > { %v4319_v42 = vmul.f32 %v9517_v58, %v4261_v46  ;;  %v7923_v22 = vpop.f32.mrb[120].mxu1  ;;  %v4357_v43 = vmul.f32 %v9536_v4, %v9583_v2  ;;  %v3317_v13 = vmul.f32 %v9499_v31, %v3291_v37 }
 0xaa4   : > { %v9598_v7 = vadd.f32 %v4320_v38, %v3326_v1  ;;  %v4276_v6 = vadd.f32 %v7923_v22, %v9506_v25  ;;  %v4270_v23 = vpop.f32.mrb[121].mxu1  ;;  %v3331_v1 = vadd.f32 %v3315_v36, %v9091_v8  ;;  %v3334_v31 = vadd.f32 %v3318_v49, %v9102_v26 }
 0xaa5   : > { %v9604_v34 = vadd.f32 %v4319_v42, %v3325_v41  ;;  %v4271_v11 = vadd.f32 %v9506_v25, %v4270_v23  ;;  %7943 = vmatprep.mubr.msk.f32.mxu0 %vm329_vm0, %v4357_v43  ;;  %v3333_v23 = vadd.f32 %v3317_v13, %v9106_v27 }
 0xaa6   : > { %v4322_v51 = vmul.f32 %v9517_v58, %v4276_v6  ;;  %7944 = vmatmul.mubr.msk.f32.gmra.mrb[132].mxu0 %vm329_vm0, %v4358_v21  ;;  %v4360_v44 = vmul.f32 %v9536_v4, %v9598_v7 }
 0xaa7   : > { %v4321_v53 = vmul.f32 %v9517_v58, %v4271_v11  ;;  %v7926_v3 = vpop.f32.mrb[122].mxu1  ;;  %v4359_v10 = vmul.f32 %v9536_v4, %v9604_v34 }
 0xaa8   : > { %v9620_v54 = vadd.f32 %v4322_v51, %v3328_v48  ;;  %v4286_v12 = vadd.f32 %v7926_v3, %v9506_v25  ;;  %v4280_v32 = vpop.f32.mrb[123].mxu1 }
 0xaa9   : > { %v9626_v55 = vadd.f32 %v4321_v53, %v3327_v52  ;;  %v4281_v5 = vadd.f32 %v9506_v25, %v4280_v32  ;;  %7946 = vmatprep.mubr.msk.f32.mxu0 %vm329_vm0, %v4359_v10 }
 0xaaa   : > { %v4324_v29 = vmul.f32 %v9517_v58, %v4286_v12  ;;  %7947 = vmatmul.mubr.msk.f32.gmra.mrb[134].mxu0 %vm329_vm0, %v4360_v44  ;;  %v4362_v20 = vmul.f32 %v9536_v4, %v9620_v54 }
 0xaab   : > { %v4323_v59 = vmul.f32 %v9517_v58, %v4281_v5  ;;  %v7929_v61 = vpop.f32.mrb[124].mxu1  ;;  %v4361_v16 = vmul.f32 %v9536_v4, %v9626_v55 }
 0xaac   : > { %v9642_v40 = vadd.f32 %v4324_v29, %v3330_v56  ;;  %v4296_v33 = vadd.f32 %v7929_v61, %v9506_v25  ;;  %v4290_v14 = vpop.f32.mrb[125].mxu1 }
 0xaad   : > { %v9647_v60 = vadd.f32 %v4323_v59, %v3329_v57  ;;  %v4291_v35 = vadd.f32 %v9506_v25, %v4290_v14  ;;  %7949 = vmatprep.mubr.msk.f32.mxu0 %vm329_vm0, %v4361_v16 }
 0xaae   : > { %v4326_v46 = vmul.f32 %v9517_v58, %v4296_v33  ;;  %7950 = vmatmul.mubr.msk.f32.gmra.mrb[136].mxu0 %vm329_vm0, %v4362_v20  ;;  %v4364_v22 = vmul.f32 %v9536_v4, %v9642_v40 }
 0xaaf   : > { %v4325_v28 = vmul.f32 %v9517_v58, %v4291_v35  ;;  %v7932_v38 = vpop.f32.mrb[126].mxu1  ;;  %v4363_v41 = vmul.f32 %v9536_v4, %v9647_v60 }
 0xab0   : > { %v9660_v47 = vadd.f32 %v4326_v46, %v3332_v15  ;;  %v4306_v17 = vadd.f32 %v7932_v38, %v9506_v25  ;;  %v4300_v42 = vpop.f32.mrb[127].mxu1 }
 0xab1   : > { %v9665_v43 = vadd.f32 %v4325_v28, %v3331_v1  ;;  %v4301_v8 = vadd.f32 %v9506_v25, %v4300_v42  ;;  %7952 = vmatprep.mubr.msk.f32.mxu0 %vm329_vm0, %v4363_v41 }
 0xab2   : > { %v4328_v6 = vmul.f32 %v9517_v58, %v4306_v17  ;;  %7953 = vmatmul.mubr.msk.f32.gmra.mrb[138].mxu0 %vm329_vm0, %v4364_v22  ;;  %v4366_v25 = vmul.f32 %v9536_v4, %v9660_v47 }
 0xab3   : > { %v4327_v21 = vmul.f32 %v9517_v58, %v4301_v8  ;;  %v4365_v39 = vmul.f32 %v9536_v4, %v9665_v43  ;;  %v6840_v58 = vld [vmem:[%s10226_s2 + $0x120] sm:$0xff] }
 0xab4   : > { %v9676_v11 = vadd.f32 %v4328_v6, %v3334_v31  ;;  %v8305_v51 = vpack.c.bf16 %v6841_v0, %v6840_v58 }
 0xab5   : > { %v9680_v48 = vadd.f32 %v4327_v21, %v3333_v23  ;;  %7955 = vmatprep.mubr.msk.f32.mxu0 %vm329_vm0, %v4365_v39 }
 0xab6   : > { %7956 = vmatmul.mubr.msk.f32.gmra.mrb[140].mxu0 %vm329_vm0, %v4366_v25  ;;  %v4368_v27 = vmul.f32 %v9536_v4, %v9676_v11  ;;  %8306 = vmatprep.subr.bf16.mxu0 %v8305_v51 }
 0xab7   : > { %v4367_v26 = vmul.f32 %v9536_v4, %v9680_v48  ;;  %v6843_v4 = vld [vmem:[%s10226_s2 + $0x138] sm:$0xff]  ;;  %8308 = vmatpush3.bf16.msra.mxu0 %v8305_v51 }
 0xab8   : > { %v8309_v52 = vpack.c.bf16 %v6843_v4, %v6842_v50 }
 0xab9   : > { %7958 = vmatprep.mubr.msk.f32.mxu0 %vm329_vm0, %v4367_v26 }
 0xaba   : > { %7959 = vmatmul.mubr.msk.f32.gmra.mrb[142].mxu0 %vm329_vm0, %v4368_v27  ;;  %8310 = vmatprep.subr.bf16.mxu0 %v8309_v52 }
 0xabb   : > { %8312 = vmatpush3.bf16.msra.mxu0 %v8309_v52 }
 0xb71   : > { %v7939_v53 = vpop.f32.mrb[128].mxu0 }
 0xb72   : > { %v4497_v3 = vadd.f32 %v7939_v53, %v9705_v45  ;;  %v4491_v10 = vpop.f32.mrb[129].mxu0 }
 0xb73   : > { %v4492_v12 = vadd.f32 %v9705_v45, %v4491_v10 }
 0xb74   : > { %v4587_v32 = vmul.f32 0.2, %v4497_v3  ;;  %vm4571_vm12 = vcmp.gt.f32.partialorder %v4497_v3, 0.0 }
 0xb75   : > { %vm4570_vm13 = vcmp.gt.f32.partialorder %v4492_v12, 0.0  ;;  %v4586_v44 = vmul.f32 0.2, %v4492_v12  ;;  %v7942_v56 = vpop.f32.mrb[130].mxu0 }
 0xb76   : > { %v4507_v5 = vadd.f32 %v7942_v56, %v9705_v45  ;;  %v4501_v57 = vpop.f32.mrb[131].mxu0  ;;  %v4603_v29 = vsel %vm4571_vm12, %v4497_v3, %v4587_v32 }
 0xb77   : > { %v4502_v30 = vadd.f32 %v9705_v45, %v4501_v57  ;;  %v4602_v62 = vsel %vm4570_vm13, %v4492_v12, %v4586_v44 }
 0xb78   : > { %v4589_v36 = vmul.f32 0.2, %v4507_v5  ;;  %7969 = vmatprep.mubr.msk.f32.mxu1 %vm580_vm3, %v4602_v62  ;;  %vm4573_vm14 = vcmp.gt.f32.partialorder %v4507_v5, 0.0 }
 0xb79   : > { %vm4572_vm15 = vcmp.gt.f32.partialorder %v4502_v30, 0.0  ;;  %v4588_v37 = vmul.f32 0.2, %v4502_v30  ;;  %v7945_v59 = vpop.f32.mrb[132].mxu0  ;;  %7970 = vmatmul.mubr.msk.f32.vlgmr.msra.gmra.mrb[128].mxu1 %vm580_vm3, %v4603_v29 }
 0xb7a   : > { %v4517_v61 = vadd.f32 %v7945_v59, %v9705_v45  ;;  %v4511_v16 = vpop.f32.mrb[133].mxu0  ;;  %v4605_v35 = vsel %vm4573_vm14, %v4507_v5, %v4589_v36 }
 0xb7b   : > { %v4512_v33 = vadd.f32 %v9705_v45, %v4511_v16  ;;  %v4604_v14 = vsel %vm4572_vm15, %v4502_v30, %v4588_v37 }
 0xb7c   : > { %v4591_v20 = vmul.f32 0.2, %v4517_v61  ;;  %7972 = vmatprep.mubr.msk.f32.mxu1 %vm580_vm3, %v4604_v14  ;;  %vm4575_vm1 = vcmp.gt.f32.partialorder %v4517_v61, 0.0 }
 0xb7d   : > { %vm4574_vm2 = vcmp.gt.f32.partialorder %v4512_v33, 0.0  ;;  %v4590_v15 = vmul.f32 0.2, %v4512_v33  ;;  %v7948_v49 = vpop.f32.mrb[134].mxu0  ;;  %7973 = vmatmul.mubr.msk.f32.gmra.mrb[130].mxu1 %vm580_vm3, %v4605_v35  ;;  %v6862_v35 = vld [vmem:[%s10227_s3 + $0x88] sm:$0xff] }
 0xb7e   : > { %v4527_v46 = vadd.f32 %v7948_v49, %v9705_v45  ;;  %v4521_v1 = vpop.f32.mrb[135].mxu0  ;;  %v4607_v41 = vsel %vm4575_vm1, %v4517_v61, %v4591_v20  ;;  %v6861_v20 = vld [vmem:[%s10227_s3 + $0x80] sm:$0xff] }
 0xb7f   : > { %v4522_v13 = vadd.f32 %v9705_v45, %v4521_v1  ;;  %v4606_v28 = vsel %vm4574_vm2, %v4512_v33, %v4590_v15  ;;  %v6885_v33 = vld [vmem:[%s10225_s1 + $0x58] sm:$0xff]  ;;  %v6863_v15 = vld [vmem:[%s10227_s3 + $0x90] sm:$0xff]  ;;  %v8313_v49 = vpack.c.bf16 %v6862_v35, %v6861_v20 }
 0xb80   : > { %v4593_v38 = vmul.f32 0.2, %v4527_v46  ;;  %7975 = vmatprep.mubr.msk.f32.mxu1 %vm580_vm3, %v4606_v28  ;;  %vm4577_vm4 = vcmp.gt.f32.partialorder %v4527_v46, 0.0 }
 0xb81   : > { %vm4576_vm5 = vcmp.gt.f32.partialorder %v4522_v13, 0.0  ;;  %v4592_v17 = vmul.f32 0.2, %v4522_v13  ;;  %v7951_v42 = vpop.f32.mrb[136].mxu0  ;;  %7976 = vmatmul.mubr.msk.f32.gmra.mrb[132].mxu1 %vm580_vm3, %v4607_v41  ;;  %8314 = vmatprep.subr.bf16.mxu1 %v8313_v49 }
 0xb82   : > { %v4537_v22 = vadd.f32 %v7951_v42, %v9705_v45  ;;  %v4531_v8 = vpop.f32.mrb[137].mxu0  ;;  %v4609_v21 = vsel %vm4577_vm4, %v4527_v46, %v4593_v38  ;;  %v6864_v46 = vld [vmem:[%s10227_s3 + $0x98] sm:$0xff]  ;;  %8316 = vmatpush3.bf16.msra.mxu1 %v8313_v49 }
 0xb83   : > { %v4532_v31 = vadd.f32 %v9705_v45, %v4531_v8  ;;  %v4608_v6 = vsel %vm4576_vm5, %v4522_v13, %v4592_v17  ;;  %v8317_v1 = vpack.c.bf16 %v6864_v46, %v6863_v15  ;;  %v9760_v13 = vld [vmem:[%s10228_s4 + $0xd] ss:$0 sm:$0xff] }
 0xb84   : > { %v4595_v23 = vmul.f32 0.2, %v4537_v22  ;;  %7978 = vmatprep.mubr.msk.f32.mxu1 %vm580_vm3, %v4608_v6  ;;  %vm4579_vm6 = vcmp.gt.f32.partialorder %v4537_v22, 0.0 }
 0xb85   : > { %vm4578_vm7 = vcmp.gt.f32.partialorder %v4532_v31, 0.0  ;;  %v4594_v39 = vmul.f32 0.2, %v4532_v31  ;;  %v7954_v25 = vpop.f32.mrb[138].mxu0  ;;  %7979 = vmatmul.mubr.msk.f32.gmra.mrb[134].mxu1 %vm580_vm3, %v4609_v21  ;;  %8318 = vmatprep.subr.bf16.mxu1 %v8317_v1 }
 0xb86   : > { %v4547_v26 = vadd.f32 %v7954_v25, %v9705_v45  ;;  %v4541_v27 = vpop.f32.mrb[139].mxu0  ;;  %v4611_v51 = vsel %vm4579_vm6, %v4537_v22, %v4595_v23  ;;  %8320 = vmatpush3.bf16.msra.mxu1 %v8317_v1 }
 0xb87   : > { %v4542_v58 = vadd.f32 %v9705_v45, %v4541_v27  ;;  %v4610_v0 = vsel %vm4578_vm7, %v4532_v31, %v4594_v39 }
 0xb88   : > { %v4597_v50 = vmul.f32 0.2, %v4547_v26  ;;  %7981 = vmatprep.mubr.msk.f32.mxu1 %vm580_vm3, %v4610_v0  ;;  %vm4581_vm8 = vcmp.gt.f32.partialorder %v4547_v26, 0.0 }
 0xb89   : > { %vm4580_vm9 = vcmp.gt.f32.partialorder %v4542_v58, 0.0  ;;  %v4596_v4 = vmul.f32 0.2, %v4542_v58  ;;  %v7957_v52 = vpop.f32.mrb[140].mxu0  ;;  %7982 = vmatmul.mubr.msk.f32.gmra.mrb[136].mxu1 %vm580_vm3, %v4611_v51 }
 0xb8a   : > { %v4557_v53 = vadd.f32 %v7957_v52, %v9705_v45  ;;  %v4551_v3 = vpop.f32.mrb[141].mxu0  ;;  %v4613_v44 = vsel %vm4581_vm8, %v4547_v26, %v4597_v50 }
 0xb8b   : > { %v4552_v10 = vadd.f32 %v9705_v45, %v4551_v3  ;;  %v4612_v12 = vsel %vm4580_vm9, %v4542_v58, %v4596_v4 }
 0xb8c   : > { %v4599_v32 = vmul.f32 0.2, %v4557_v53  ;;  %7984 = vmatprep.mubr.msk.f32.mxu1 %vm580_vm3, %v4612_v12  ;;  %vm4583_vm10 = vcmp.gt.f32.partialorder %v4557_v53, 0.0 }
 0xb8d   : > { %vm4582_vm11 = vcmp.gt.f32.partialorder %v4552_v10, 0.0  ;;  %v4598_v56 = vmul.f32 0.2, %v4552_v10  ;;  %v7960_v5 = vpop.f32.mrb[142].mxu0  ;;  %7985 = vmatmul.mubr.msk.f32.gmra.mrb[138].mxu1 %vm580_vm3, %v4613_v44 }
 0xb8e   : > { %v4567_v57 = vadd.f32 %v7960_v5, %v9705_v45  ;;  %v4561_v30 = vpop.f32.mrb[143].mxu0  ;;  %v4615_v37 = vsel %vm4583_vm10, %v4557_v53, %v4599_v32 }
 0xb8f   : > { %v4562_v62 = vadd.f32 %v9705_v45, %v4561_v30  ;;  %v4614_v29 = vsel %vm4582_vm11, %v4552_v10, %v4598_v56  ;;  %v6884_v45 = vld [vmem:[%s10225_s1 + $0x50] sm:$0xff] }
 0xb90   : > { %v4601_v36 = vmul.f32 0.2, %v4567_v57  ;;  %7987 = vmatprep.mubr.msk.f32.mxu1 %vm580_vm3, %v4614_v29  ;;  %vm4585_vm12 = vcmp.gt.f32.partialorder %v4567_v57, 0.0  ;;  %v8321_v14 = vpack.c.bf16 %v6885_v33, %v6884_v45 }
 0xb91   : > { %vm4584_vm13 = vcmp.gt.f32.partialorder %v4562_v62, 0.0  ;;  %v4600_v59 = vmul.f32 0.2, %v4562_v62  ;;  %7988 = vmatmul.mubr.msk.f32.gmra.mrb[140].mxu1 %vm580_vm3, %v4615_v37 }
 0xb92   : > { %v4617_v16 = vsel %vm4585_vm12, %v4567_v57, %v4601_v36  ;;  %8322 = vmatprep.subr.bf16.mxu0 %v8321_v14 }
 0xb93   : > { %v4616_v61 = vsel %vm4584_vm13, %v4562_v62, %v4600_v59 }
 0xb94   : > { %7990 = vmatprep.mubr.msk.f32.mxu1 %vm580_vm3, %v4616_v61 }
 0xb95   : > { %7991 = vmatmul.mubr.msk.f32.gmra.mrb[142].mxu1 %vm580_vm3, %v4617_v16 }
 0xc4c   : > { %v7971_v28 = vpop.f32.mrb[128].mxu1 }
 0xc4d   : > { %v4748_v38 = vadd.f32 %v7971_v28, %v9760_v13  ;;  %v4742_v41 = vpop.f32.mrb[129].mxu1 }
 0xc4e   : > { %v4743_v17 = vadd.f32 %v9760_v13, %v4742_v41 }
 0xc4f   : > { %v4838_v42 = vmul.f32 0.2, %v4748_v38  ;;  %vm4822_vm14 = vcmp.gt.f32.partialorder %v4748_v38, 0.0 }
 0xc50   : > { %vm4821_vm15 = vcmp.gt.f32.partialorder %v4743_v17, 0.0  ;;  %v4837_v22 = vmul.f32 0.2, %v4743_v17  ;;  %v7974_v8 = vpop.f32.mrb[130].mxu1 }
 0xc51   : > { %v4758_v31 = vadd.f32 %v7974_v8, %v9760_v13  ;;  %v4752_v6 = vpop.f32.mrb[131].mxu1  ;;  %v4854_v39 = vsel %vm4822_vm14, %v4748_v38, %v4838_v42 }
 0xc52   : > { %v4753_v23 = vadd.f32 %v9760_v13, %v4752_v6  ;;  %v4853_v21 = vsel %vm4821_vm15, %v4743_v17, %v4837_v22 }
 0xc53   : > { %v4840_v25 = vmul.f32 0.2, %v4758_v31  ;;  %8001 = vmatprep.mubr.msk.f32.mxu0 %vm580_vm3, %v4853_v21  ;;  %vm4824_vm1 = vcmp.gt.f32.partialorder %v4758_v31, 0.0 }
 0xc54   : > { %vm4823_vm2 = vcmp.gt.f32.partialorder %v4753_v23, 0.0  ;;  %v4839_v26 = vmul.f32 0.2, %v4753_v23  ;;  %v7977_v27 = vpop.f32.mrb[132].mxu1  ;;  %8002 = vmatmul.mubr.msk.f32.vlgmr.msra.gmra.mrb[144].mxu0 %vm580_vm3, %v4854_v39 }
 0xc55   : > { %v4768_v58 = vadd.f32 %v7977_v27, %v9760_v13  ;;  %8324 = vmatpush3.bf16.msra.mxu0 %v8321_v14  ;;  %v4762_v0 = vpop.f32.mrb[133].mxu1  ;;  %v4856_v52 = vsel %vm4824_vm1, %v4758_v31, %v4840_v25  ;;  %v6883_v27 = vld [vmem:[%s10230_s6 + $0x9] ss:$0 sm:$0xff] }
 0xc56   : > { %v4763_v50 = vadd.f32 %v9760_v13, %v4762_v0  ;;  %v4855_v51 = vsel %vm4823_vm2, %v4753_v23, %v4839_v26 }
 0xc57   : > { %v4842_v4 = vmul.f32 0.2, %v4768_v58  ;;  %8004 = vmatprep.mubr.msk.f32.mxu0 %vm580_vm3, %v4855_v51  ;;  %vm4826_vm4 = vcmp.gt.f32.partialorder %v4768_v58, 0.0  ;;  %v5364_v51 = vmul.f32 %v6883_v27, %v9531_v19 }
 0xc58   : > { %vm4825_vm5 = vcmp.gt.f32.partialorder %v4763_v50, 0.0  ;;  %v4841_v53 = vmul.f32 0.2, %v4763_v50  ;;  %v7980_v3 = vpop.f32.mrb[134].mxu1  ;;  %8005 = vmatmul.mubr.msk.f32.gmra.mrb[146].mxu0 %vm580_vm3, %v4856_v52  ;;  %v5366_v52 = vmul.f32 %v6883_v27, %v9556_v24 }
 0xc59   : > { %v4778_v10 = vadd.f32 %v7980_v3, %v9760_v13  ;;  %v4772_v12 = vpop.f32.mrb[135].mxu1  ;;  %v4858_v5 = vsel %vm4826_vm4, %v4768_v58, %v4842_v4  ;;  %v5365_v4 = vmul.f32 %v6883_v27, %v9560_v9  ;;  %v5368_v3 = vmul.f32 %v6883_v27, %v9576_v63 }
 0xc5a   : > { %v4773_v32 = vadd.f32 %v9760_v13, %v4772_v12  ;;  %v4857_v44 = vsel %vm4825_vm5, %v4763_v50, %v4841_v53  ;;  %v5367_v53 = vmul.f32 %v6883_v27, %v9583_v2  ;;  %v5370_v12 = vmul.f32 %v6883_v27, %v9598_v7 }
 0xc5b   : > { %v4844_v56 = vmul.f32 0.2, %v4778_v10  ;;  %8007 = vmatprep.mubr.msk.f32.mxu0 %vm580_vm3, %v4857_v44  ;;  %vm4828_vm6 = vcmp.gt.f32.partialorder %v4778_v10, 0.0  ;;  %v5372_v44 = vmul.f32 %v6883_v27, %v9620_v54 }
 0xc5c   : > { %vm4827_vm7 = vcmp.gt.f32.partialorder %v4773_v32, 0.0  ;;  %v4843_v57 = vmul.f32 0.2, %v4773_v32  ;;  %v7983_v30 = vpop.f32.mrb[136].mxu1  ;;  %8008 = vmatmul.mubr.msk.f32.gmra.mrb[148].mxu0 %vm580_vm3, %v4858_v5  ;;  %v5374_v5 = vmul.f32 %v6883_v27, %v9642_v40 }
 0xc5d   : > { %v4788_v62 = vadd.f32 %v7983_v30, %v9760_v13  ;;  %v4782_v29 = vpop.f32.mrb[137].mxu1  ;;  %v4860_v61 = vsel %vm4828_vm6, %v4778_v10, %v4844_v56  ;;  %v5369_v10 = vmul.f32 %v6883_v27, %v9604_v34  ;;  %v5373_v56 = vmul.f32 %v6883_v27, %v9647_v60 }
 0xc5e   : > { %v4783_v36 = vadd.f32 %v9760_v13, %v4782_v29  ;;  %v4859_v37 = vsel %vm4827_vm7, %v4773_v32, %v4843_v57  ;;  %v5371_v32 = vmul.f32 %v6883_v27, %v9626_v55  ;;  %v5375_v57 = vmul.f32 %v6883_v27, %v9665_v43 }
 0xc5f   : > { %v4846_v59 = vmul.f32 0.2, %v4788_v62  ;;  %8010 = vmatprep.mubr.msk.f32.mxu0 %vm580_vm3, %v4859_v37  ;;  %vm4830_vm8 = vcmp.gt.f32.partialorder %v4788_v62, 0.0  ;;  %v5376_v30 = vmul.f32 %v6883_v27, %v9660_v47  ;;  %v5378_v29 = vmul.f32 %v6883_v27, %v9676_v11  ;;  %v6904_v37 = vld [vmem:[%s10226_s2 + $0x148] sm:$0xff] }
 0xc60   : > { %vm4829_vm9 = vcmp.gt.f32.partialorder %v4783_v36, 0.0  ;;  %v4845_v16 = vmul.f32 0.2, %v4783_v36  ;;  %v7986_v45 = vpop.f32.mrb[138].mxu1  ;;  %8011 = vmatmul.mubr.msk.f32.gmra.mrb[150].mxu0 %vm580_vm3, %v4860_v61  ;;  %v9838_v61 = vld [vmem:[%s10228_s4 + $0xe] ss:$0 sm:$0xff] }
 0xc61   : > { %v4798_v33 = vadd.f32 %v7986_v45, %v9760_v13  ;;  %v4792_v14 = vpop.f32.mrb[139].mxu1  ;;  %v4862_v49 = vsel %vm4830_vm8, %v4788_v62, %v4846_v59  ;;  %v5377_v62 = vmul.f32 %v6883_v27, %v9680_v48 }
 0xc62   : > { %v4793_v20 = vadd.f32 %v9760_v13, %v4792_v14  ;;  %v4861_v35 = vsel %vm4829_vm9, %v4783_v36, %v4845_v16  ;;  %v6903_v36 = vld [vmem:[%s10226_s2 + $0x140] sm:$0xff] }
 0xc63   : > { %v4848_v15 = vmul.f32 0.2, %v4798_v33  ;;  %8013 = vmatprep.mubr.msk.f32.mxu0 %vm580_vm3, %v4861_v35  ;;  %vm4832_vm10 = vcmp.gt.f32.partialorder %v4798_v33, 0.0  ;;  %v8325_v59 = vpack.c.bf16 %v6904_v37, %v6903_v36  ;;  %v6905_v35 = vld [vmem:[%s10226_s2 + $0x150] sm:$0xff] }
 0xc64   : > { %vm4831_vm11 = vcmp.gt.f32.partialorder %v4793_v20, 0.0  ;;  %v4847_v46 = vmul.f32 0.2, %v4793_v20  ;;  %v7989_v1 = vpop.f32.mrb[140].mxu1  ;;  %8014 = vmatmul.mubr.msk.f32.gmra.mrb[152].mxu0 %vm580_vm3, %v4862_v49 }
 0xc65   : > { %v4808_v28 = vadd.f32 %v7989_v1, %v9760_v13  ;;  %v4802_v38 = vpop.f32.mrb[141].mxu1  ;;  %v4864_v22 = vsel %vm4832_vm10, %v4798_v33, %v4848_v15  ;;  %8326 = vmatprep.subr.bf16.mxu1 %v8325_v59  ;;  %v6906_v15 = vld [vmem:[%s10226_s2 + $0x158] sm:$0xff] }
 0xc66   : > { %v4803_v41 = vadd.f32 %v9760_v13, %v4802_v38  ;;  %v4863_v17 = vsel %vm4831_vm11, %v4793_v20, %v4847_v46 }
 0xc67   : > { %v4850_v42 = vmul.f32 0.2, %v4808_v28  ;;  %8016 = vmatprep.mubr.msk.f32.mxu0 %vm580_vm3, %v4863_v17  ;;  %vm4834_vm12 = vcmp.gt.f32.partialorder %v4808_v28, 0.0  ;;  %v8329_v17 = vpack.c.bf16 %v6906_v15, %v6905_v35 }
 0xc68   : > { %vm4833_vm13 = vcmp.gt.f32.partialorder %v4803_v41, 0.0  ;;  %v4849_v8 = vmul.f32 0.2, %v4803_v41  ;;  %v7992_v31 = vpop.f32.mrb[142].mxu1  ;;  %8017 = vmatmul.mubr.msk.f32.gmra.mrb[154].mxu0 %vm580_vm3, %v4864_v22 }
 0xc69   : > { %v4818_v6 = vadd.f32 %v7992_v31, %v9760_v13  ;;  %v4812_v23 = vpop.f32.mrb[143].mxu1  ;;  %v4866_v26 = vsel %vm4834_vm12, %v4808_v28, %v4850_v42 }
 0xc6a   : > { %v4813_v21 = vadd.f32 %v9760_v13, %v4812_v23  ;;  %v4865_v39 = vsel %vm4833_vm13, %v4803_v41, %v4849_v8  ;;  %v5363_v13 = vmul.f32 %v6883_v27, %v9540_v18 }
 0xc6b   : > { %v4852_v25 = vmul.f32 0.2, %v4818_v6  ;;  %8019 = vmatprep.mubr.msk.f32.mxu0 %vm580_vm3, %v4865_v39  ;;  %vm4836_vm14 = vcmp.gt.f32.partialorder %v4818_v6, 0.0 }
 0xc6c   : > { %vm4835_vm15 = vcmp.gt.f32.partialorder %v4813_v21, 0.0  ;;  %v4851_v58 = vmul.f32 0.2, %v4813_v21  ;;  %8020 = vmatmul.mubr.msk.f32.gmra.mrb[156].mxu0 %vm580_vm3, %v4866_v26 }
 0xc6d   : > { %v4868_v50 = vsel %vm4836_vm14, %v4818_v6, %v4852_v25 }
 0xc6e   : > { %v4867_v0 = vsel %vm4835_vm15, %v4813_v21, %v4851_v58 }
 0xc6f   : > { %8022 = vmatprep.mubr.msk.f32.mxu0 %vm580_vm3, %v4867_v0 }
 0xc70   : > { %8023 = vmatmul.mubr.msk.f32.gmra.mrb[158].mxu0 %vm580_vm3, %v4868_v50 }
 0xc71   : > { %8061 = vmatprep.mubr.msk.f32.mxu0 %vm329_vm0, %v5363_v13 }
 0xc74   : > { %8062 = vmatmul.mubr.msk.f32.vlgmr.msra.gmra.mrb[160].mxu0 %vm329_vm0, %v5364_v51 }
 0xc75   : > { %8064 = vmatprep.mubr.msk.f32.mxu0 %vm329_vm0, %v5365_v4 }
 0xc78   : > { %8065 = vmatmul.mubr.msk.f32.gmra.mrb[162].mxu0 %vm329_vm0, %v5366_v52 }
 0xc79   : > { %8067 = vmatprep.mubr.msk.f32.mxu0 %vm329_vm0, %v5367_v53 }
 0xc7c   : > { %8068 = vmatmul.mubr.msk.f32.gmra.mrb[164].mxu0 %vm329_vm0, %v5368_v3 }
 0xc7d   : > { %8070 = vmatprep.mubr.msk.f32.mxu0 %vm329_vm0, %v5369_v10 }
 0xc80   : > { %8071 = vmatmul.mubr.msk.f32.gmra.mrb[166].mxu0 %vm329_vm0, %v5370_v12 }
 0xc81   : > { %8073 = vmatprep.mubr.msk.f32.mxu0 %vm329_vm0, %v5371_v32 }
 0xc84   : > { %8074 = vmatmul.mubr.msk.f32.gmra.mrb[168].mxu0 %vm329_vm0, %v5372_v44 }
 0xc85   : > { %8076 = vmatprep.mubr.msk.f32.mxu0 %vm329_vm0, %v5373_v56 }
 0xc88   : > { %8077 = vmatmul.mubr.msk.f32.gmra.mrb[170].mxu0 %vm329_vm0, %v5374_v5 }
 0xc89   : > { %8079 = vmatprep.mubr.msk.f32.mxu0 %vm329_vm0, %v5375_v57 }
 0xc8c   : > { %8080 = vmatmul.mubr.msk.f32.gmra.mrb[172].mxu0 %vm329_vm0, %v5376_v30 }
 0xc8d   : > { %8082 = vmatprep.mubr.msk.f32.mxu0 %vm329_vm0, %v5377_v62 }
 0xc90   : > { %8083 = vmatmul.mubr.msk.f32.gmra.mrb[174].mxu0 %vm329_vm0, %v5378_v29 }
 0xd27   : > { %v8003_v16 = vpop.f32.mrb[144].mxu0 }
 0xd28   : > { %v4999_v45 = vadd.f32 %v8003_v16, %v9838_v61  ;;  %v4993_v33 = vpop.f32.mrb[145].mxu0 }
 0xd29   : > { %v4994_v14 = vadd.f32 %v9838_v61, %v4993_v33 }
 0xd2a   : > { %v5089_v20 = vmul.f32 0.2, %v4999_v45  ;;  %vm5073_vm1 = vcmp.gt.f32.partialorder %v4999_v45, 0.0 }
 0xd2b   : > { %vm5072_vm2 = vcmp.gt.f32.partialorder %v4994_v14, 0.0  ;;  %v5088_v49 = vmul.f32 0.2, %v4994_v14  ;;  %v8006_v46 = vpop.f32.mrb[146].mxu0 }
 0xd2c   : > { %v5009_v1 = vadd.f32 %v8006_v46, %v9838_v61  ;;  %v5003_v28 = vpop.f32.mrb[147].mxu0  ;;  %v5105_v42 = vsel %vm5073_vm1, %v4999_v45, %v5089_v20 }
 0xd2d   : > { %v5004_v38 = vadd.f32 %v9838_v61, %v5003_v28  ;;  %v5104_v41 = vsel %vm5072_vm2, %v4994_v14, %v5088_v49 }
 0xd2e   : > { %v5091_v22 = vmul.f32 0.2, %v5009_v1  ;;  %8033 = vmatprep.mubr.msk.f32.mxu1 %vm580_vm3, %v5104_v41  ;;  %vm5075_vm4 = vcmp.gt.f32.partialorder %v5009_v1, 0.0 }
 0xd2f   : > { %vm5074_vm5 = vcmp.gt.f32.partialorder %v5004_v38, 0.0  ;;  %v5090_v8 = vmul.f32 0.2, %v5004_v38  ;;  %v8009_v31 = vpop.f32.mrb[148].mxu0  ;;  %8034 = vmatmul.mubr.msk.f32.vlgmr.msra.gmra.mrb[144].mxu1 %vm580_vm3, %v5105_v42 }
 0xd30   : > { %v5019_v6 = vadd.f32 %v8009_v31, %v9838_v61  ;;  %8328 = vmatpush3.bf16.msra.mxu1 %v8325_v59  ;;  %v5013_v23 = vpop.f32.mrb[149].mxu0  ;;  %v5107_v26 = vsel %vm5075_vm4, %v5009_v1, %v5091_v22  ;;  %v9877_v22 = vld [vmem:[%s10228_s4 + $0xf] ss:$0 sm:$0xff] }
 0xd31   : > { %v5014_v21 = vadd.f32 %v9838_v61, %v5013_v23  ;;  %v5106_v39 = vsel %vm5074_vm5, %v5004_v38, %v5090_v8  ;;  %8330 = vmatprep.subr.bf16.mxu1 %v8329_v17 }
 0xd32   : > { %v5093_v25 = vmul.f32 0.2, %v5019_v6  ;;  %8036 = vmatprep.mubr.msk.f32.mxu1 %vm580_vm3, %v5106_v39  ;;  %vm5077_vm6 = vcmp.gt.f32.partialorder %v5019_v6, 0.0 }
 0xd33   : > { %vm5076_vm7 = vcmp.gt.f32.partialorder %v5014_v21, 0.0  ;;  %v5092_v27 = vmul.f32 0.2, %v5014_v21  ;;  %v8012_v58 = vpop.f32.mrb[150].mxu0  ;;  %8037 = vmatmul.mubr.msk.f32.gmra.mrb[146].mxu1 %vm580_vm3, %v5107_v26 }
 0xd34   : > { %v5029_v0 = vadd.f32 %v8012_v58, %v9838_v61  ;;  %v5023_v50 = vpop.f32.mrb[151].mxu0  ;;  %8332 = vmatpush3.bf16.msra.mxu1 %v8329_v17  ;;  %v5109_v52 = vsel %vm5077_vm6, %v5019_v6, %v5093_v25 }
 0xd35   : > { %v5024_v13 = vadd.f32 %v9838_v61, %v5023_v50  ;;  %v5108_v51 = vsel %vm5076_vm7, %v5014_v21, %v5092_v27 }
 0xd36   : > { %v5095_v4 = vmul.f32 0.2, %v5029_v0  ;;  %8039 = vmatprep.mubr.msk.f32.mxu1 %vm580_vm3, %v5108_v51  ;;  %vm5079_vm8 = vcmp.gt.f32.partialorder %v5029_v0, 0.0 }
 0xd37   : > { %vm5078_vm9 = vcmp.gt.f32.partialorder %v5024_v13, 0.0  ;;  %v5094_v53 = vmul.f32 0.2, %v5024_v13  ;;  %v8015_v3 = vpop.f32.mrb[152].mxu0  ;;  %8040 = vmatmul.mubr.msk.f32.gmra.mrb[148].mxu1 %vm580_vm3, %v5109_v52 }
 0xd38   : > { %v5039_v10 = vadd.f32 %v8015_v3, %v9838_v61  ;;  %v5033_v12 = vpop.f32.mrb[153].mxu0  ;;  %v5111_v5 = vsel %vm5079_vm8, %v5029_v0, %v5095_v4 }
 0xd39   : > { %v5034_v32 = vadd.f32 %v9838_v61, %v5033_v12  ;;  %v5110_v44 = vsel %vm5078_vm9, %v5024_v13, %v5094_v53 }
 0xd3a   : > { %v5097_v56 = vmul.f32 0.2, %v5039_v10  ;;  %8042 = vmatprep.mubr.msk.f32.mxu1 %vm580_vm3, %v5110_v44  ;;  %vm5081_vm10 = vcmp.gt.f32.partialorder %v5039_v10, 0.0 }
 0xd3b   : > { %vm5080_vm11 = vcmp.gt.f32.partialorder %v5034_v32, 0.0  ;;  %v5096_v57 = vmul.f32 0.2, %v5034_v32  ;;  %v8018_v30 = vpop.f32.mrb[154].mxu0  ;;  %8043 = vmatmul.mubr.msk.f32.gmra.mrb[150].mxu1 %vm580_vm3, %v5111_v5 }
 0xd3c   : > { %v5049_v62 = vadd.f32 %v8018_v30, %v9838_v61  ;;  %v5043_v29 = vpop.f32.mrb[155].mxu0  ;;  %v5113_v16 = vsel %vm5081_vm10, %v5039_v10, %v5097_v56 }
 0xd3d   : > { %v5044_v36 = vadd.f32 %v9838_v61, %v5043_v29  ;;  %v5112_v37 = vsel %vm5080_vm11, %v5034_v32, %v5096_v57 }
 0xd3e   : > { %v5099_v59 = vmul.f32 0.2, %v5049_v62  ;;  %8045 = vmatprep.mubr.msk.f32.mxu1 %vm580_vm3, %v5112_v37  ;;  %vm5083_vm12 = vcmp.gt.f32.partialorder %v5049_v62, 0.0 }
 0xd3f   : > { %vm5082_vm13 = vcmp.gt.f32.partialorder %v5044_v36, 0.0  ;;  %v5098_v45 = vmul.f32 0.2, %v5044_v36  ;;  %v8021_v33 = vpop.f32.mrb[156].mxu0  ;;  %8046 = vmatmul.mubr.msk.f32.gmra.mrb[152].mxu1 %vm580_vm3, %v5113_v16 }
 0xd40   : > { %v5059_v14 = vadd.f32 %v8021_v33, %v9838_v61  ;;  %v5053_v20 = vpop.f32.mrb[157].mxu0  ;;  %v5115_v46 = vsel %vm5083_vm12, %v5049_v62, %v5099_v59 }
 0xd41   : > { %v5054_v35 = vadd.f32 %v9838_v61, %v5053_v20  ;;  %v5114_v15 = vsel %vm5082_vm13, %v5044_v36, %v5098_v45 }
 0xd42   : > { %v5101_v49 = vmul.f32 0.2, %v5059_v14  ;;  %8048 = vmatprep.mubr.msk.f32.mxu1 %vm580_vm3, %v5114_v15  ;;  %vm5085_vm14 = vcmp.gt.f32.partialorder %v5059_v14, 0.0 }
 0xd43   : > { %vm5084_vm15 = vcmp.gt.f32.partialorder %v5054_v35, 0.0  ;;  %v5100_v1 = vmul.f32 0.2, %v5054_v35  ;;  %v8024_v28 = vpop.f32.mrb[158].mxu0  ;;  %8049 = vmatmul.mubr.msk.f32.gmra.mrb[154].mxu1 %vm580_vm3, %v5115_v46 }
 0xd44   : > { %v5069_v38 = vadd.f32 %v8024_v28, %v9838_v61  ;;  %v5063_v41 = vpop.f32.mrb[159].mxu0  ;;  %v5117_v31 = vsel %vm5085_vm14, %v5059_v14, %v5101_v49 }
 0xd45   : > { %v5064_v17 = vadd.f32 %v9838_v61, %v5063_v41  ;;  %v5116_v42 = vsel %vm5084_vm15, %v5054_v35, %v5100_v1 }
 0xd46   : > { %v5103_v8 = vmul.f32 0.2, %v5069_v38  ;;  %8051 = vmatprep.mubr.msk.f32.mxu1 %vm580_vm3, %v5116_v42  ;;  %vm5087_vm1 = vcmp.gt.f32.partialorder %v5069_v38, 0.0 }
 0xd47   : > { %vm5086_vm2 = vcmp.gt.f32.partialorder %v5064_v17, 0.0  ;;  %v5102_v6 = vmul.f32 0.2, %v5064_v17  ;;  %8052 = vmatmul.mubr.msk.f32.gmra.mrb[156].mxu1 %vm580_vm3, %v5117_v31  ;;  %v8063_v23 = vpop.f32.mrb[160].mxu0 }
 0xd48   : > { %v5507_v21 = vadd.f32 %v8063_v23, %v9877_v22  ;;  %v5501_v39 = vpop.f32.mrb[161].mxu0  ;;  %v5119_v27 = vsel %vm5087_vm1, %v5069_v38, %v5103_v8 }
 0xd49   : > { %v5502_v61 = vadd.f32 %v9877_v22, %v5501_v39  ;;  %v5118_v25 = vsel %vm5086_vm2, %v5064_v17, %v5102_v6 }
 0xd4a   : > { %v5597_v26 = vmul.f32 0.2, %v5507_v21  ;;  %8054 = vmatprep.mubr.msk.f32.mxu1 %vm580_vm3, %v5118_v25  ;;  %vm5581_vm4 = vcmp.gt.f32.partialorder %v5507_v21, 0.0 }
 0xd4b   : > { %vm5580_vm5 = vcmp.gt.f32.partialorder %v5502_v61, 0.0  ;;  %v5596_v58 = vmul.f32 0.2, %v5502_v61  ;;  %8055 = vmatmul.mubr.msk.f32.gmra.mrb[158].mxu1 %vm580_vm3, %v5119_v27  ;;  %v8066_v0 = vpop.f32.mrb[162].mxu0 }
 0xd4c   : > { %v5517_v50 = vadd.f32 %v8066_v0, %v9877_v22  ;;  %v5511_v13 = vpop.f32.mrb[163].mxu0  ;;  %v5613_v52 = vsel %vm5581_vm4, %v5507_v21, %v5597_v26 }
 0xd4d   : > { %v5512_v51 = vadd.f32 %v9877_v22, %v5511_v13  ;;  %v5612_v4 = vsel %vm5580_vm5, %v5502_v61, %v5596_v58 }
 0xd4e   : > { %v5599_v53 = vmul.f32 0.2, %v5517_v50  ;;  %8093 = vmatprep.mubr.msk.f32.mxu1 %vm580_vm3, %v5612_v4  ;;  %vm5583_vm6 = vcmp.gt.f32.partialorder %v5517_v50, 0.0 }
 0xd4f   : > { %vm5582_vm7 = vcmp.gt.f32.partialorder %v5512_v51, 0.0  ;;  %v5598_v3 = vmul.f32 0.2, %v5512_v51  ;;  %v8069_v10 = vpop.f32.mrb[164].mxu0  ;;  %8094 = vmatmul.mubr.msk.f32.vlgmr.msra.gmra.mrb[160].mxu1 %vm580_vm3, %v5613_v52 }
 0xd50   : > { %v5527_v12 = vadd.f32 %v8069_v10, %v9877_v22  ;;  %v5521_v32 = vpop.f32.mrb[165].mxu0  ;;  %v5615_v57 = vsel %vm5583_vm6, %v5517_v50, %v5599_v53 }
 0xd51   : > { %v5522_v44 = vadd.f32 %v9877_v22, %v5521_v32  ;;  %v5614_v56 = vsel %vm5582_vm7, %v5512_v51, %v5598_v3 }
 0xd52   : > { %v5601_v5 = vmul.f32 0.2, %v5527_v12  ;;  %8096 = vmatprep.mubr.msk.f32.mxu1 %vm580_vm3, %v5614_v56  ;;  %vm5585_vm8 = vcmp.gt.f32.partialorder %v5527_v12, 0.0 }
 0xd53   : > { %vm5584_vm9 = vcmp.gt.f32.partialorder %v5522_v44, 0.0  ;;  %v5600_v30 = vmul.f32 0.2, %v5522_v44  ;;  %v8072_v62 = vpop.f32.mrb[166].mxu0  ;;  %8097 = vmatmul.mubr.msk.f32.gmra.mrb[162].mxu1 %vm580_vm3, %v5615_v57  ;;  %v6927_v57 = vld [vmem:[%s10226_s2 + $0x178] sm:$0xff] }
 0xd54   : > { %v5537_v29 = vadd.f32 %v8072_v62, %v9877_v22  ;;  %v5531_v36 = vpop.f32.mrb[167].mxu0  ;;  %v5617_v45 = vsel %vm5585_vm8, %v5527_v12, %v5601_v5  ;;  %v6926_v5 = vld [vmem:[%s10226_s2 + $0x170] sm:$0xff]  ;;  %v6945_v62 = vld [vmem:[%s10227_s3 + $0xa0] sm:$0xff] }
 0xd55   : > { %v5532_v37 = vadd.f32 %v9877_v22, %v5531_v36  ;;  %v5616_v59 = vsel %vm5584_vm9, %v5522_v44, %v5600_v30  ;;  %v6925_v44 = vld [vmem:[%s10226_s2 + $0x168] sm:$0xff]  ;;  %v8337_v30 = vpack.c.bf16 %v6927_v57, %v6926_v5  ;;  %v6947_v36 = vld [vmem:[%s10227_s3 + $0xb0] sm:$0xff] }
 0xd56   : > { %v5603_v16 = vmul.f32 0.2, %v5537_v29  ;;  %8099 = vmatprep.mubr.msk.f32.mxu1 %vm580_vm3, %v5616_v59  ;;  %vm5587_vm10 = vcmp.gt.f32.partialorder %v5537_v29, 0.0  ;;  %v6948_v59 = vld [vmem:[%s10227_s3 + $0xb8] sm:$0xff] }
 0xd57   : > { %vm5586_vm11 = vcmp.gt.f32.partialorder %v5532_v37, 0.0  ;;  %v5602_v33 = vmul.f32 0.2, %v5532_v37  ;;  %v8075_v14 = vpop.f32.mrb[168].mxu0  ;;  %8100 = vmatmul.mubr.msk.f32.gmra.mrb[164].mxu1 %vm580_vm3, %v5617_v45 }
 0xd58   : > { %v5547_v20 = vadd.f32 %v8075_v14, %v9877_v22  ;;  %v5541_v35 = vpop.f32.mrb[169].mxu0  ;;  %v5619_v1 = vsel %vm5587_vm10, %v5537_v29, %v5603_v16  ;;  %v6946_v29 = vld [vmem:[%s10227_s3 + $0xa8] sm:$0xff]  ;;  %v8345_v16 = vpack.c.bf16 %v6948_v59, %v6947_v36 }
 0xd59   : > { %v5542_v15 = vadd.f32 %v9877_v22, %v5541_v35  ;;  %v5618_v49 = vsel %vm5586_vm11, %v5532_v37, %v5602_v33  ;;  %v8341_v37 = vpack.c.bf16 %v6946_v29, %v6945_v62 }
 0xd5a   : > { %v5605_v46 = vmul.f32 0.2, %v5547_v20  ;;  %8102 = vmatprep.mubr.msk.f32.mxu1 %vm580_vm3, %v5618_v49  ;;  %vm5589_vm12 = vcmp.gt.f32.partialorder %v5547_v20, 0.0 }
 0xd5b   : > { %vm5588_vm13 = vcmp.gt.f32.partialorder %v5542_v15, 0.0  ;;  %v5604_v28 = vmul.f32 0.2, %v5542_v15  ;;  %v8078_v38 = vpop.f32.mrb[170].mxu0  ;;  %8103 = vmatmul.mubr.msk.f32.gmra.mrb[166].mxu1 %vm580_vm3, %v5619_v1  ;;  %8342 = vmatprep.subr.bf16.mxu1 %v8341_v37 }
 0xd5c   : > { %v5557_v41 = vadd.f32 %v8078_v38, %v9877_v22  ;;  %v5551_v17 = vpop.f32.mrb[171].mxu0  ;;  %v5621_v6 = vsel %vm5589_vm12, %v5547_v20, %v5605_v46  ;;  %8344 = vmatpush3.bf16.msra.mxu1 %v8341_v37 }
 0xd5d   : > { %v5552_v42 = vadd.f32 %v9877_v22, %v5551_v17  ;;  %v5620_v8 = vsel %vm5588_vm13, %v5542_v15, %v5604_v28  ;;  %8346 = vmatprep.subr.bf16.mxu1 %v8345_v16 }
 0xd5e   : > { %v5607_v31 = vmul.f32 0.2, %v5557_v41  ;;  %8105 = vmatprep.mubr.msk.f32.mxu1 %vm580_vm3, %v5620_v8  ;;  %vm5591_vm14 = vcmp.gt.f32.partialorder %v5557_v41, 0.0 }
 0xd5f   : > { %vm5590_vm15 = vcmp.gt.f32.partialorder %v5552_v42, 0.0  ;;  %v5606_v23 = vmul.f32 0.2, %v5552_v42  ;;  %v8081_v21 = vpop.f32.mrb[172].mxu0  ;;  %8106 = vmatmul.mubr.msk.f32.gmra.mrb[168].mxu1 %vm580_vm3, %v5621_v6  ;;  %v9974_v6 = vld [vmem:[%s10228_s4 + $0x10] ss:$0 sm:$0xff] }
 0xd60   : > { %v5567_v39 = vadd.f32 %v8081_v21, %v9877_v22  ;;  %v5561_v61 = vpop.f32.mrb[173].mxu0  ;;  %v5623_v58 = vsel %vm5591_vm14, %v5557_v41, %v5607_v31  ;;  %8348 = vmatpush3.bf16.msra.mxu1 %v8345_v16 }
 0xd61   : > { %v5562_v25 = vadd.f32 %v9877_v22, %v5561_v61  ;;  %v5622_v26 = vsel %vm5590_vm15, %v5552_v42, %v5606_v23 }
 0xd62   : > { %v5609_v27 = vmul.f32 0.2, %v5567_v39  ;;  %8108 = vmatprep.mubr.msk.f32.mxu1 %vm580_vm3, %v5622_v26  ;;  %vm5593_vm1 = vcmp.gt.f32.partialorder %v5567_v39, 0.0 }
 0xd63   : > { %vm5592_vm2 = vcmp.gt.f32.partialorder %v5562_v25, 0.0  ;;  %v5608_v0 = vmul.f32 0.2, %v5562_v25  ;;  %v8084_v50 = vpop.f32.mrb[174].mxu0  ;;  %8109 = vmatmul.mubr.msk.f32.gmra.mrb[170].mxu1 %vm580_vm3, %v5623_v58 }
 0xd64   : > { %v5577_v13 = vadd.f32 %v8084_v50, %v9877_v22  ;;  %v5571_v51 = vpop.f32.mrb[175].mxu0  ;;  %v5625_v3 = vsel %vm5593_vm1, %v5567_v39, %v5609_v27 }
 0xd65   : > { %v5572_v4 = vadd.f32 %v9877_v22, %v5571_v51  ;;  %v5624_v52 = vsel %vm5592_vm2, %v5562_v25, %v5608_v0  ;;  %v6924_v22 = vld [vmem:[%s10226_s2 + $0x160] sm:$0xff] }
 0xd66   : > { %v5611_v53 = vmul.f32 0.2, %v5577_v13  ;;  %8111 = vmatprep.mubr.msk.f32.mxu1 %vm580_vm3, %v5624_v52  ;;  %vm5595_vm4 = vcmp.gt.f32.partialorder %v5577_v13, 0.0  ;;  %v8333_v56 = vpack.c.bf16 %v6925_v44, %v6924_v22 }
 0xd67   : > { %vm5594_vm5 = vcmp.gt.f32.partialorder %v5572_v4, 0.0  ;;  %v5610_v10 = vmul.f32 0.2, %v5572_v4  ;;  %8112 = vmatmul.mubr.msk.f32.gmra.mrb[172].mxu1 %vm580_vm3, %v5625_v3 }
 0xd68   : > { %v5627_v32 = vsel %vm5595_vm4, %v5577_v13, %v5611_v53  ;;  %8334 = vmatprep.subr.bf16.mxu0 %v8333_v56 }
 0xd69   : > { %v5626_v12 = vsel %vm5594_vm5, %v5572_v4, %v5610_v10  ;;  %8336 = vmatpush3.bf16.msra.mxu0 %v8333_v56 }
 0xd6a   : > { %8114 = vmatprep.mubr.msk.f32.mxu1 %vm580_vm3, %v5626_v12  ;;  %8338 = vmatprep.subr.bf16.mxu0 %v8337_v30 }
 0xd6b   : > { %8115 = vmatmul.mubr.msk.f32.gmra.mrb[174].mxu1 %vm580_vm3, %v5627_v32 }
 0xd6d   : > { %8340 = vmatpush3.bf16.msra.mxu0 %v8337_v30 }
 0xe02   : > { %v9939_v45 = vpop.f32.mrb[144].mxu1 }
 0xe03   : > { %v9941_v33 = vpop.f32.mrb[145].mxu1 }
 0xe06   : > { %v9943_v14 = vpop.f32.mrb[146].mxu1 }
 0xe07   : > { %v9945_v20 = vpop.f32.mrb[147].mxu1 }
 0xe0a   : > { %v9947_v35 = vpop.f32.mrb[148].mxu1 }
 0xe0b   : > { %v9949_v15 = vpop.f32.mrb[149].mxu1 }
 0xe0e   : > { %v9951_v49 = vpop.f32.mrb[150].mxu1 }
 0xe0f   : > { %v9953_v46 = vpop.f32.mrb[151].mxu1 }
 0xe12   : > { %v9955_v1 = vpop.f32.mrb[152].mxu1 }
 0xe13   : > { %v9957_v28 = vpop.f32.mrb[153].mxu1 }
 0xe16   : > { %v9959_v38 = vpop.f32.mrb[154].mxu1 }
 0xe17   : > { %v9961_v41 = vpop.f32.mrb[155].mxu1 }
 0xe1a   : > { %v9963_v17 = vpop.f32.mrb[156].mxu1 }
 0xe1b   : > { %v9965_v42 = vpop.f32.mrb[157].mxu1 }
 0xe1e   : > { %v9967_v8 = vpop.f32.mrb[158].mxu1 }
 0xe1f   : > { %v9969_v31 = vpop.f32.mrb[159].mxu1 }
 0xe22   : > { %v8095_v23 = vpop.f32.mrb[160].mxu1 }
 0xe23   : > { %v5758_v21 = vadd.f32 %v8095_v23, %v9974_v6  ;;  %v5752_v39 = vpop.f32.mrb[161].mxu1 }
 0xe24   : > { %v5753_v61 = vadd.f32 %v9974_v6, %v5752_v39 }
 0xe25   : > { %v5848_v25 = vmul.f32 0.2, %v5758_v21  ;;  %vm5832_vm6 = vcmp.gt.f32.partialorder %v5758_v21, 0.0 }
 0xe26   : > { %vm5831_vm7 = vcmp.gt.f32.partialorder %v5753_v61, 0.0  ;;  %v5847_v26 = vmul.f32 0.2, %v5753_v61  ;;  %v8098_v27 = vpop.f32.mrb[162].mxu1 }
 0xe27   : > { %v5768_v58 = vadd.f32 %v8098_v27, %v9974_v6  ;;  %v5762_v0 = vpop.f32.mrb[163].mxu1  ;;  %v5864_v51 = vsel %vm5832_vm6, %v5758_v21, %v5848_v25 }
 0xe28   : > { %v5763_v50 = vadd.f32 %v9974_v6, %v5762_v0  ;;  %v5863_v13 = vsel %vm5831_vm7, %v5753_v61, %v5847_v26 }
 0xe29   : > { %v5850_v4 = vmul.f32 0.2, %v5768_v58  ;;  %8125 = vmatprep.mubr.msk.f32.mxu0 %vm580_vm3, %v5863_v13  ;;  %vm5834_vm8 = vcmp.gt.f32.partialorder %v5768_v58, 0.0 }
 0xe2a   : > { %vm5833_vm9 = vcmp.gt.f32.partialorder %v5763_v50, 0.0  ;;  %v5849_v52 = vmul.f32 0.2, %v5763_v50  ;;  %v8101_v53 = vpop.f32.mrb[164].mxu1  ;;  %8126 = vmatmul.mubr.msk.f32.vlgmr.msra.gmra.mrb[176].mxu0 %vm580_vm3, %v5864_v51 }
 0xe2b   : > { %v5778_v3 = vadd.f32 %v8101_v53, %v9974_v6  ;;  %v5772_v10 = vpop.f32.mrb[165].mxu1  ;;  %v5866_v44 = vsel %vm5834_vm8, %v5768_v58, %v5850_v4 }
 0xe2c   : > { %v5773_v12 = vadd.f32 %v9974_v6, %v5772_v10  ;;  %v5865_v32 = vsel %vm5833_vm9, %v5763_v50, %v5849_v52 }
 0xe2d   : > { %v5852_v22 = vmul.f32 0.2, %v5778_v3  ;;  %8128 = vmatprep.mubr.msk.f32.mxu0 %vm580_vm3, %v5865_v32  ;;  %vm5836_vm10 = vcmp.gt.f32.partialorder %v5778_v3, 0.0 }
 0xe2e   : > { %vm5835_vm11 = vcmp.gt.f32.partialorder %v5773_v12, 0.0  ;;  %v5851_v56 = vmul.f32 0.2, %v5773_v12  ;;  %v8104_v5 = vpop.f32.mrb[166].mxu1  ;;  %8129 = vmatmul.mubr.msk.f32.gmra.mrb[178].mxu0 %vm580_vm3, %v5866_v44 }
 0xe2f   : > { %v5788_v57 = vadd.f32 %v8104_v5, %v9974_v6  ;;  %v5782_v30 = vpop.f32.mrb[167].mxu1  ;;  %v5868_v37 = vsel %vm5836_vm10, %v5778_v3, %v5852_v22 }
 0xe30   : > { %v5783_v62 = vadd.f32 %v9974_v6, %v5782_v30  ;;  %v5867_v29 = vsel %vm5835_vm11, %v5773_v12, %v5851_v56 }
 0xe31   : > { %v5854_v36 = vmul.f32 0.2, %v5788_v57  ;;  %8131 = vmatprep.mubr.msk.f32.mxu0 %vm580_vm3, %v5867_v29  ;;  %vm5838_vm12 = vcmp.gt.f32.partialorder %v5788_v57, 0.0 }
 0xe32   : > { %vm5837_vm13 = vcmp.gt.f32.partialorder %v5783_v62, 0.0  ;;  %v5853_v59 = vmul.f32 0.2, %v5783_v62  ;;  %v8107_v16 = vpop.f32.mrb[168].mxu1  ;;  %8132 = vmatmul.mubr.msk.f32.gmra.mrb[180].mxu0 %vm580_vm3, %v5868_v37 }
 0xe33   : > { %v5798_v23 = vadd.f32 %v8107_v16, %v9974_v6  ;;  %v5792_v21 = vpop.f32.mrb[169].mxu1  ;;  %v5870_v26 = vsel %vm5838_vm12, %v5788_v57, %v5854_v36 }
 0xe34   : > { %v5793_v39 = vadd.f32 %v9974_v6, %v5792_v21  ;;  %v5869_v61 = vsel %vm5837_vm13, %v5783_v62, %v5853_v59 }
 0xe35   : > { %v5856_v25 = vmul.f32 0.2, %v5798_v23  ;;  %8134 = vmatprep.mubr.msk.f32.mxu0 %vm580_vm3, %v5869_v61  ;;  %vm5840_vm14 = vcmp.gt.f32.partialorder %v5798_v23, 0.0 }
 0xe36   : > { %vm5839_vm15 = vcmp.gt.f32.partialorder %v5793_v39, 0.0  ;;  %v5855_v27 = vmul.f32 0.2, %v5793_v39  ;;  %v8110_v58 = vpop.f32.mrb[170].mxu1  ;;  %8135 = vmatmul.mubr.msk.f32.gmra.mrb[182].mxu0 %vm580_vm3, %v5870_v26 }
 0xe37   : > { %v5808_v0 = vadd.f32 %v8110_v58, %v9974_v6  ;;  %v5802_v50 = vpop.f32.mrb[171].mxu1  ;;  %v5872_v52 = vsel %vm5840_vm14, %v5798_v23, %v5856_v25 }
 0xe38   : > { %v5803_v13 = vadd.f32 %v9974_v6, %v5802_v50  ;;  %v5871_v51 = vsel %vm5839_vm15, %v5793_v39, %v5855_v27 }
 0xe39   : > { %v5858_v4 = vmul.f32 0.2, %v5808_v0  ;;  %8137 = vmatprep.mubr.msk.f32.mxu0 %vm580_vm3, %v5871_v51  ;;  %vm5842_vm1 = vcmp.gt.f32.partialorder %v5808_v0, 0.0 }
 0xe3a   : > { %vm5841_vm2 = vcmp.gt.f32.partialorder %v5803_v13, 0.0  ;;  %v5857_v53 = vmul.f32 0.2, %v5803_v13  ;;  %v8113_v3 = vpop.f32.mrb[172].mxu1  ;;  %8138 = vmatmul.mubr.msk.f32.gmra.mrb[184].mxu0 %vm580_vm3, %v5872_v52 }
 0xe3b   : > { %v5818_v10 = vadd.f32 %v8113_v3, %v9974_v6  ;;  %v5812_v12 = vpop.f32.mrb[173].mxu1  ;;  %v5874_v56 = vsel %vm5842_vm1, %v5808_v0, %v5858_v4 }
 0xe3c   : > { %v5813_v32 = vadd.f32 %v9974_v6, %v5812_v12  ;;  %v5873_v22 = vsel %vm5841_vm2, %v5803_v13, %v5857_v53 }
 0xe3d   : > { %v5860_v44 = vmul.f32 0.2, %v5818_v10  ;;  %8140 = vmatprep.mubr.msk.f32.mxu0 %vm580_vm3, %v5873_v22  ;;  %vm5844_vm4 = vcmp.gt.f32.partialorder %v5818_v10, 0.0 }
 0xe3e   : > { %vm5843_vm5 = vcmp.gt.f32.partialorder %v5813_v32, 0.0  ;;  %v5859_v5 = vmul.f32 0.2, %v5813_v32  ;;  %v8116_v57 = vpop.f32.mrb[174].mxu1  ;;  %8141 = vmatmul.mubr.msk.f32.gmra.mrb[186].mxu0 %vm580_vm3, %v5874_v56 }
 0xe3f   : > { %v5828_v30 = vadd.f32 %v8116_v57, %v9974_v6  ;;  %v5822_v62 = vpop.f32.mrb[175].mxu1  ;;  %v5876_v59 = vsel %vm5844_vm4, %v5818_v10, %v5860_v44 }
 0xe40   : > { %v5823_v29 = vadd.f32 %v9974_v6, %v5822_v62  ;;  %v5875_v36 = vsel %vm5843_vm5, %v5813_v32, %v5859_v5  ;;  %v10011_v6 = vld [vmem:[%s10228_s4 + $0x11] ss:$0 sm:$0xff] }
 0xe41   : > { %v5862_v37 = vmul.f32 0.2, %v5828_v30  ;;  %8143 = vmatprep.mubr.msk.f32.mxu0 %vm580_vm3, %v5875_v36  ;;  %vm5846_vm6 = vcmp.gt.f32.partialorder %v5828_v30, 0.0 }
 0xe42   : > { %vm5845_vm7 = vcmp.gt.f32.partialorder %v5823_v29, 0.0  ;;  %v5861_v16 = vmul.f32 0.2, %v5823_v29  ;;  %8144 = vmatmul.mubr.msk.f32.gmra.mrb[188].mxu0 %vm580_vm3, %v5876_v59 }
 0xe43   : > { %v5878_v21 = vsel %vm5846_vm6, %v5828_v30, %v5862_v37 }
 0xe44   : > { %v5877_v23 = vsel %vm5845_vm7, %v5823_v29, %v5861_v16 }
 0xe45   : > { %8146 = vmatprep.mubr.msk.f32.mxu0 %vm580_vm3, %v5877_v23 }
 0xe46   : > { %8147 = vmatmul.mubr.msk.f32.gmra.mrb[190].mxu0 %vm580_vm3, %v5878_v21 }
 0xefd   : > { %v8127_v39 = vpop.f32.mrb[176].mxu0 }
 0xefe   : > { %v6009_v61 = vadd.f32 %v8127_v39, %v10011_v6  ;;  %v6003_v25 = vpop.f32.mrb[177].mxu0 }
 0xeff   : > { %v6004_v26 = vadd.f32 %v10011_v6, %v6003_v25 }
 0xf00   : > { %v6099_v27 = vmul.f32 0.2, %v6009_v61  ;;  %vm6083_vm8 = vcmp.gt.f32.partialorder %v6009_v61, 0.0 }
 0xf01   : > { %vm6082_vm9 = vcmp.gt.f32.partialorder %v6004_v26, 0.0  ;;  %v6098_v58 = vmul.f32 0.2, %v6004_v26  ;;  %v8130_v0 = vpop.f32.mrb[178].mxu0 }
 0xf02   : > { %v6019_v50 = vadd.f32 %v8130_v0, %v10011_v6  ;;  %v6013_v13 = vpop.f32.mrb[179].mxu0  ;;  %v6115_v52 = vsel %vm6083_vm8, %v6009_v61, %v6099_v27 }
 0xf03   : > { %v6014_v51 = vadd.f32 %v10011_v6, %v6013_v13  ;;  %v6114_v4 = vsel %vm6082_vm9, %v6004_v26, %v6098_v58 }
 0xf04   : > { %v6101_v53 = vmul.f32 0.2, %v6019_v50  ;;  %8157 = vmatprep.mubr.msk.f32.mxu1 %vm580_vm3, %v6114_v4  ;;  %vm6085_vm10 = vcmp.gt.f32.partialorder %v6019_v50, 0.0 }
 0xf05   : > { %vm6084_vm11 = vcmp.gt.f32.partialorder %v6014_v51, 0.0  ;;  %v6100_v3 = vmul.f32 0.2, %v6014_v51  ;;  %v8133_v10 = vpop.f32.mrb[180].mxu0  ;;  %8158 = vmatmul.mubr.msk.f32.vlgmr.msra.gmra.mrb[176].mxu1 %vm580_vm3, %v6115_v52 }
 0xf06   : > { %v6029_v12 = vadd.f32 %v8133_v10, %v10011_v6  ;;  %v6023_v32 = vpop.f32.mrb[181].mxu0  ;;  %v6117_v5 = vsel %vm6085_vm10, %v6019_v50, %v6101_v53 }
 0xf07   : > { %v6024_v22 = vadd.f32 %v10011_v6, %v6023_v32  ;;  %v6116_v44 = vsel %vm6084_vm11, %v6014_v51, %v6100_v3 }
 0xf08   : > { %v6103_v56 = vmul.f32 0.2, %v6029_v12  ;;  %8160 = vmatprep.mubr.msk.f32.mxu1 %vm580_vm3, %v6116_v44  ;;  %vm6087_vm12 = vcmp.gt.f32.partialorder %v6029_v12, 0.0 }
 0xf09   : > { %vm6086_vm13 = vcmp.gt.f32.partialorder %v6024_v22, 0.0  ;;  %v6102_v57 = vmul.f32 0.2, %v6024_v22  ;;  %v8136_v30 = vpop.f32.mrb[182].mxu0  ;;  %8161 = vmatmul.mubr.msk.f32.gmra.mrb[178].mxu1 %vm580_vm3, %v6117_v5 }
 0xf0a   : > { %v6039_v62 = vadd.f32 %v8136_v30, %v10011_v6  ;;  %v6033_v29 = vpop.f32.mrb[183].mxu0  ;;  %v6119_v16 = vsel %vm6087_vm12, %v6029_v12, %v6103_v56 }
 0xf0b   : > { %v6034_v36 = vadd.f32 %v10011_v6, %v6033_v29  ;;  %v6118_v37 = vsel %vm6086_vm13, %v6024_v22, %v6102_v57 }
 0xf0c   : > { %v6105_v59 = vmul.f32 0.2, %v6039_v62  ;;  %8163 = vmatprep.mubr.msk.f32.mxu1 %vm580_vm3, %v6118_v37  ;;  %vm6089_vm14 = vcmp.gt.f32.partialorder %v6039_v62, 0.0 }
 0xf0d   : > { %vm6088_vm15 = vcmp.gt.f32.partialorder %v6034_v36, 0.0  ;;  %v6104_v23 = vmul.f32 0.2, %v6034_v36  ;;  %v8139_v21 = vpop.f32.mrb[184].mxu0  ;;  %8164 = vmatmul.mubr.msk.f32.gmra.mrb[180].mxu1 %vm580_vm3, %v6119_v16 }
 0xf0e   : > { %v6049_v39 = vadd.f32 %v8139_v21, %v10011_v6  ;;  %v6043_v61 = vpop.f32.mrb[185].mxu0  ;;  %v6121_v58 = vsel %vm6089_vm14, %v6039_v62, %v6105_v59 }
 0xf0f   : > { %v6044_v25 = vadd.f32 %v10011_v6, %v6043_v61  ;;  %v6120_v26 = vsel %vm6088_vm15, %v6034_v36, %v6104_v23 }
 0xf10   : > { %v6107_v27 = vmul.f32 0.2, %v6049_v39  ;;  %8166 = vmatprep.mubr.msk.f32.mxu1 %vm580_vm3, %v6120_v26  ;;  %vm6091_vm1 = vcmp.gt.f32.partialorder %v6049_v39, 0.0  ;;  %v6372_v26 = vlaneseq }
 0xf11   : > { %vm6090_vm2 = vcmp.gt.f32.partialorder %v6044_v25, 0.0  ;;  %v6106_v0 = vmul.f32 0.2, %v6044_v25  ;;  %v8142_v50 = vpop.f32.mrb[186].mxu0  ;;  %8167 = vmatmul.mubr.msk.f32.gmra.mrb[182].mxu1 %vm580_vm3, %v6121_v58 }
 0xf12   : > { %v6059_v13 = vadd.f32 %v8142_v50, %v10011_v6  ;;  %v6053_v51 = vpop.f32.mrb[187].mxu0  ;;  %v6123_v3 = vsel %vm6091_vm1, %v6049_v39, %v6107_v27  ;;  %v10051_v27 = vld [vmem:[%s10229_s5 + $0x4] ss:$0 sm:$0xff]  ;;  %v10058_v50 = vld [vmem:[%s10230_s6 + $0xa] ss:$0 sm:$0xff] }
 0xf13   : > { %v6054_v4 = vadd.f32 %v10011_v6, %v6053_v51  ;;  %v6122_v52 = vsel %vm6090_vm2, %v6044_v25, %v6106_v0  ;;  %v5250_v58 = vadd.f32 %v9939_v45, %v10051_v27  ;;  %v6373_v0 = vshrl.u32 %v6372_v26, 7  ;;  %v10065_v51 = vld [vmem:[%s10229_s5 + $0x5] ss:$0 sm:$0xff] }
 0xf14   : > { %v6109_v53 = vmul.f32 0.2, %v6059_v13  ;;  %8169 = vmatprep.mubr.msk.f32.mxu1 %vm580_vm3, %v6122_v52  ;;  %vm6093_vm4 = vcmp.gt.f32.partialorder %v6059_v13, 0.0  ;;  %v5260_v52 = vadd.f32 %v9943_v14, %v10051_v27  ;;  %v5270_v14 = vadd.f32 %v9947_v35, %v10051_v27 }
 0xf15   : > { %vm6092_vm5 = vcmp.gt.f32.partialorder %v6054_v4, 0.0  ;;  %v6108_v10 = vmul.f32 0.2, %v6054_v4  ;;  %v8145_v12 = vpop.f32.mrb[188].mxu0  ;;  %8170 = vmatmul.mubr.msk.f32.gmra.mrb[184].mxu1 %vm580_vm3, %v6123_v3  ;;  %v6374_v45 = vsub.s32 0, %v6373_v0  ;;  %v5275_v26 = vadd.f32 %v10051_v27, %v9953_v46 }
 0xf16   : > { %v6069_v32 = vadd.f32 %v8145_v12, %v10011_v6  ;;  %v6063_v22 = vpop.f32.mrb[189].mxu0  ;;  %v6125_v57 = vsel %vm6093_vm4, %v6059_v13, %v6109_v53  ;;  %v5245_v13 = vadd.f32 %v10051_v27, %v9941_v33  ;;  %v10076_v33 = vld [vmem:[%s10230_s6 + $0xb] ss:$0 sm:$0xff] }
 0xf17   : > { %v6064_v44 = vadd.f32 %v10011_v6, %v6063_v22  ;;  %v6124_v56 = vsel %vm6092_vm5, %v6054_v4, %v6108_v10  ;;  %v5328_v4 = vmul.f32 %v10058_v50, %v5250_v58  ;;  %v5255_v10 = vadd.f32 %v10051_v27, %v9945_v20 }
 0xf18   : > { %v6111_v5 = vmul.f32 0.2, %v6069_v32  ;;  %8172 = vmatprep.mubr.msk.f32.mxu1 %vm580_vm3, %v6124_v56  ;;  %vm6095_vm6 = vcmp.gt.f32.partialorder %v6069_v32, 0.0  ;;  %v5327_v3 = vmul.f32 %v10058_v50, %v5245_v13 }
 0xf19   : > { %vm6094_vm7 = vcmp.gt.f32.partialorder %v6064_v44, 0.0  ;;  %v6110_v30 = vmul.f32 0.2, %v6064_v44  ;;  %v8148_v62 = vpop.f32.mrb[190].mxu0  ;;  %8173 = vmatmul.mubr.msk.f32.gmra.mrb[186].mxu1 %vm580_vm3, %v6125_v57  ;;  %v5344_v20 = vadd.f32 %v5328_v4, %v9531_v19  ;;  %v5332_v19 = vmul.f32 %v10058_v50, %v5270_v14 }
 0xf1a   : > { %v6079_v29 = vadd.f32 %v8148_v62, %v10011_v6  ;;  %v6073_v36 = vpop.f32.mrb[191].mxu0  ;;  %v6127_v23 = vsel %vm6095_vm6, %v6069_v32, %v6111_v5  ;;  %v5330_v5 = vmul.f32 %v10058_v50, %v5260_v52  ;;  %v5343_v62 = vadd.f32 %v5327_v3, %v9540_v18 }
 0xf1b   : > { %v6074_v37 = vadd.f32 %v10011_v6, %v6073_v36  ;;  %v6126_v59 = vsel %vm6094_vm7, %v6064_v44, %v6110_v30  ;;  %v6369_v6 = vld [vmem:[%s10230_s6 + $0xc] sm:$0x1]  ;;  %v5265_v44 = vadd.f32 %v10051_v27, %v9949_v15  ;;  %v5348_v52 = vadd.f32 %v5332_v19, %v9576_v63 }
 0xf1c   : > { %v6113_v16 = vmul.f32 0.2, %v6079_v29  ;;  %8175 = vmatprep.mubr.msk.f32.mxu1 %vm580_vm3, %v6126_v59  ;;  %vm6097_vm8 = vcmp.gt.f32.partialorder %v6079_v29, 0.0  ;;  %v6370_v25 = vmul.f32 1.442695, %v6369_v6  ;;  %v5290_v3 = vadd.f32 %v9955_v1, %v10051_v27 }
 0xf1d   : > { %vm6096_vm9 = vcmp.gt.f32.partialorder %v6074_v37, 0.0  ;;  %v6112_v21 = vmul.f32 0.2, %v6074_v37  ;;  %8176 = vmatmul.mubr.msk.f32.gmra.mrb[188].mxu1 %vm580_vm3, %v6127_v23  ;;  %v5331_v18 = vmul.f32 %v10058_v50, %v5265_v44  ;;  %v5285_v63 = vadd.f32 %v10051_v27, %v9957_v28 }
 0xf1e   : > { %v6129_v61 = vsel %vm6097_vm8, %v6079_v29, %v6113_v16  ;;  %8357 = vpow2.f32 %v6370_v25  ;;  %v5329_v29 = vmul.f32 %v10058_v50, %v5255_v10 }
 0xf1f   : > { %v6128_v39 = vsel %vm6096_vm9, %v6074_v37, %v6112_v21  ;;  %v5346_v21 = vadd.f32 %v5330_v5, %v9556_v24  ;;  %v5295_v5 = vadd.f32 %v10051_v27, %v9961_v41 }
 0xf20   : > { %8178 = vmatprep.mubr.msk.f32.mxu1 %vm580_vm3, %v6128_v39  ;;  %v5280_v39 = vadd.f32 %v9951_v49, %v10051_v27  ;;  %v5345_v25 = vadd.f32 %v5329_v29, %v9560_v9  ;;  %v5336_v29 = vmul.f32 %v10058_v50, %v5290_v3 }
 0xf21   : > { %8179 = vmatmul.mubr.msk.f32.gmra.mrb[190].mxu1 %vm580_vm3, %v6129_v61 }
 0xf28   : > { %v8358_v53 = vpop.eup %8357 }
 0xf29   : > { %v10087_v30 = vrot.slane %v8358_v53, %v6374_v45  ;;  %v5347_v45 = vadd.f32 %v5331_v18, %v9583_v2  ;;  %v5334_v53 = vmul.f32 %v10058_v50, %v5280_v39  ;;  %v5352_v39 = vadd.f32 %v5336_v29, %v9620_v54 }
 0xfd8   : > { %v8159_v12 = vpop.f32.mrb[176].mxu1 }
 0xfd9   : > { %v6260_v32 = vadd.f32 %v8159_v12, %v10065_v51  ;;  %v6254_v22 = vpop.f32.mrb[177].mxu1 }
 0xfda   : > { %v6255_v56 = vadd.f32 %v10065_v51, %v6254_v22 }
 0xfdb   : > { %v6338_v57 = vmul.f32 %v10076_v33, %v6260_v32  ;;  %v5333_v32 = vmul.f32 %v10058_v50, %v5275_v26 }
 0xfdc   : > { %v6337_v36 = vmul.f32 %v10076_v33, %v6255_v56  ;;  %v8162_v35 = vpop.f32.mrb[178].mxu1 }
 0xfdd   : > { %v6354_v37 = vadd.f32 %v6338_v57, %v5344_v20  ;;  %v6270_v15 = vadd.f32 %v8162_v35, %v10065_v51  ;;  %v6264_v59 = vpop.f32.mrb[179].mxu1  ;;  %v5300_v20 = vadd.f32 %v9959_v38, %v10051_v27  ;;  %v5335_v38 = vmul.f32 %v10058_v50, %v5285_v63 }
 0xfde   : > { %v6353_v16 = vadd.f32 %v6337_v36, %v5343_v62  ;;  %v6265_v23 = vadd.f32 %v10065_v51, %v6264_v59  ;;  %v5350_v62 = vadd.f32 %v5334_v53, %v9598_v7 }
 0xfdf   : > { %v6377_v61 = vmul.f32 %v10087_v30, %v6354_v37  ;;  %v6340_v6 = vmul.f32 %v10076_v33, %v6270_v15  ;;  %v5349_v37 = vadd.f32 %v5333_v32, %v9604_v34  ;;  %v5351_v26 = vadd.f32 %v5335_v38, %v9626_v55 }
 0xfe0   : > { %v6376_v58 = vmul.f32 %v10087_v30, %v6353_v16  ;;  %v6339_v0 = vmul.f32 %v10076_v33, %v6265_v23  ;;  %v8165_v13 = vpop.f32.mrb[180].mxu1  ;;  %v5338_v16 = vmul.f32 %v10058_v50, %v5300_v20  ;;  %v5337_v23 = vmul.f32 %v10058_v50, %v5295_v5 }
 0xfe1   : > { %6393 = vst.msk [vmem:[%s10098_s16 + $0x8] sm:$0xff] %vm329_vm0, %v6377_v61  ;;  %v6356_v24 = vadd.f32 %v6340_v6, %v5346_v21  ;;  %v6280_v4 = vadd.f32 %v8165_v13, %v10065_v51  ;;  %v6274_v49 = vpop.f32.mrb[181].mxu1  ;;  %v5310_v61 = vadd.f32 %v9963_v17, %v10051_v27 }
 0xfe2   : > { %6392 = vst.msk [vmem:[%s10098_s16] sm:$0xff] %vm329_vm0, %v6376_v58  ;;  %v6355_v9 = vadd.f32 %v6339_v0, %v5345_v25  ;;  %v6275_v46 = vadd.f32 %v10065_v51, %v6274_v49  ;;  %v5305_v58 = vadd.f32 %v10051_v27, %v9965_v42  ;;  %v5354_v49 = vadd.f32 %v5338_v16, %v9642_v40 }
 0xfe3   : > { %v6379_v10 = vmul.f32 %v10087_v30, %v6356_v24  ;;  %v6342_v12 = vmul.f32 %v10076_v33, %v6280_v4  ;;  %v5315_v40 = vadd.f32 %v10051_v27, %v9969_v31 }
 0xfe4   : > { %v6378_v2 = vmul.f32 %v10087_v30, %v6355_v9  ;;  %v6341_v22 = vmul.f32 %v10076_v33, %v6275_v46  ;;  %v8168_v14 = vpop.f32.mrb[182].mxu1  ;;  %v5320_v9 = vadd.f32 %v9967_v8, %v10051_v27  ;;  %v5339_v3 = vmul.f32 %v10058_v50, %v5305_v58 }
 0xfe5   : > { %6395 = vst.msk [vmem:[%s10098_s16 + $0x18] sm:$0xff] %vm329_vm0, %v6379_v10  ;;  %v6358_v44 = vadd.f32 %v6342_v12, %v5348_v52  ;;  %v6290_v56 = vadd.f32 %v8168_v14, %v10065_v51  ;;  %v6284_v1 = vpop.f32.mrb[183].mxu1  ;;  %v5353_v52 = vadd.f32 %v5337_v23, %v9647_v60 }
 0xfe6   : > { %6394 = vst.msk [vmem:[%s10098_s16 + $0x10] sm:$0xff] %vm329_vm0, %v6378_v2  ;;  %v6357_v28 = vadd.f32 %v6341_v22, %v5347_v45  ;;  %v6285_v57 = vadd.f32 %v10065_v51, %v6284_v1  ;;  %v5340_v45 = vmul.f32 %v10058_v50, %v5310_v61  ;;  %v5342_v27 = vmul.f32 %v10058_v50, %v5320_v9 }
 0xfe7   : > { %v6381_v36 = vmul.f32 %v10087_v30, %v6358_v44  ;;  %v6344_v35 = vmul.f32 %v10076_v33, %v6290_v56  ;;  %v5355_v56 = vadd.f32 %v5339_v3, %v9665_v43  ;;  %v5341_v1 = vmul.f32 %v10058_v50, %v5315_v40 }
 0xfe8   : > { %v6380_v41 = vmul.f32 %v10087_v30, %v6357_v28  ;;  %v6343_v15 = vmul.f32 %v10076_v33, %v6285_v57  ;;  %v8171_v59 = vpop.f32.mrb[184].mxu1  ;;  %v5356_v31 = vadd.f32 %v5340_v45, %v9660_v47  ;;  %v5358_v29 = vadd.f32 %v5342_v27, %v9676_v11 }
 0xfe9   : > { %6397 = vst.msk [vmem:[%s10098_s16 + $0x28] sm:$0xff] %vm329_vm0, %v6381_v36  ;;  %v6360_v19 = vadd.f32 %v6344_v35, %v5350_v62  ;;  %v6300_v7 = vadd.f32 %v8171_v59, %v10065_v51  ;;  %v6294_v18 = vpop.f32.mrb[185].mxu1 }
 0xfea   : > { %6396 = vst.msk [vmem:[%s10098_s16 + $0x20] sm:$0xff] %vm329_vm0, %v6380_v41  ;;  %v6359_v34 = vadd.f32 %v6343_v15, %v5349_v37  ;;  %v6295_v21 = vadd.f32 %v10065_v51, %v6294_v18  ;;  %v5357_v37 = vadd.f32 %v5341_v1, %v9680_v48 }
 0xfeb   : > { %v6383_v6 = vmul.f32 %v10087_v30, %v6360_v19  ;;  %v6346_v25 = vmul.f32 %v10076_v33, %v6300_v7 }
 0xfec   : > { %v6382_v0 = vmul.f32 %v10087_v30, %v6359_v34  ;;  %v6345_v13 = vmul.f32 %v10076_v33, %v6295_v21  ;;  %v8174_v24 = vpop.f32.mrb[186].mxu1 }
 0xfed   : > { %6399 = vst.msk [vmem:[%s10098_s16 + $0x38] sm:$0xff] %vm329_vm0, %v6383_v6  ;;  %v6362_v54 = vadd.f32 %v6346_v25, %v5352_v39  ;;  %v6310_v4 = vadd.f32 %v8174_v24, %v10065_v51  ;;  %v6304_v17 = vpop.f32.mrb[187].mxu1 }
 0xfee   : > { %6398 = vst.msk [vmem:[%s10098_s16 + $0x30] sm:$0xff] %vm329_vm0, %v6382_v0  ;;  %v6361_v55 = vadd.f32 %v6345_v13, %v5351_v26  ;;  %v6305_v42 = vadd.f32 %v10065_v51, %v6304_v17 }
 0xfef   : > { %v6385_v46 = vmul.f32 %v10087_v30, %v6362_v54  ;;  %v6348_v53 = vmul.f32 %v10076_v33, %v6310_v4 }
 0xff0   : > { %v6384_v60 = vmul.f32 %v10087_v30, %v6361_v55  ;;  %v6347_v10 = vmul.f32 %v10076_v33, %v6305_v42  ;;  %v8177_v12 = vpop.f32.mrb[188].mxu1 }
 0xff1   : > { %6401 = vst.msk [vmem:[%s10098_s16 + $0x48] sm:$0xff] %vm329_vm0, %v6385_v46  ;;  %v6364_v32 = vadd.f32 %v6348_v53, %v5354_v49  ;;  %v6320_v8 = vadd.f32 %v8177_v12, %v10065_v51  ;;  %v6314_v63 = vpop.f32.mrb[189].mxu1 }
 0xff2   : > { %6400 = vst.msk [vmem:[%s10098_s16 + $0x40] sm:$0xff] %vm329_vm0, %v6384_v60  ;;  %v6363_v2 = vadd.f32 %v6347_v10, %v5353_v52  ;;  %v6315_v22 = vadd.f32 %v10065_v51, %v6314_v63 }
 0xff3   : > { %v6387_v14 = vmul.f32 %v10087_v30, %v6364_v32  ;;  %v6350_v44 = vmul.f32 %v10076_v33, %v6320_v8 }
 0xff4   : > { %v6386_v20 = vmul.f32 %v10087_v30, %v6363_v2  ;;  %v6349_v5 = vmul.f32 %v10076_v33, %v6315_v22  ;;  %v8180_v28 = vpop.f32.mrb[190].mxu1 }
 0xff5   : > { %6403 = vst.msk [vmem:[%s10098_s16 + $0x58] sm:$0xff] %vm329_vm0, %v6387_v14  ;;  %v6366_v47 = vadd.f32 %v6350_v44, %v5356_v31  ;;  %v6330_v57 = vadd.f32 %v8180_v28, %v10065_v51  ;;  %v6324_v62 = vpop.f32.mrb[191].mxu1 }
 0xff6   : > { %6402 = vst.msk [vmem:[%s10098_s16 + $0x50] sm:$0xff] %vm329_vm0, %v6386_v20  ;;  %v6365_v43 = vadd.f32 %v6349_v5, %v5355_v56  ;;  %v6325_v50 = vadd.f32 %v10065_v51, %v6324_v62 }
 0xff7   : > { %v6389_v36 = vmul.f32 %v10087_v30, %v6366_v47  ;;  %v6352_v35 = vmul.f32 %v10076_v33, %v6330_v57 }
 0xff8   : > { %v6388_v38 = vmul.f32 %v10087_v30, %v6365_v43  ;;  %v6351_v41 = vmul.f32 %v10076_v33, %v6325_v50 }
 0xff9   : > { %6405 = vst.msk [vmem:[%s10098_s16 + $0x68] sm:$0xff] %vm329_vm0, %v6389_v36  ;;  %v6368_v15 = vadd.f32 %v6352_v35, %v5358_v29 }
 0xffa   : > { %6404 = vst.msk [vmem:[%s10098_s16 + $0x60] sm:$0xff] %vm329_vm0, %v6388_v38  ;;  %v6367_v59 = vadd.f32 %v6351_v41, %v5357_v37 }
 0xffb   : > { %v6391_v51 = vmul.f32 %v10087_v30, %v6368_v15 }
 0xffc   : > { %v6390_v11 = vmul.f32 %v10087_v30, %v6367_v59 }
 0xffd   : > { %6407 = vst.msk [vmem:[%s10098_s16 + $0x78] sm:$0xff] %vm329_vm0, %v6391_v51 }
 0xffe   : > { %6406 = vst.msk [vmem:[%s10098_s16 + $0x70] sm:$0xff] %vm329_vm0, %v6390_v11 }
 0xfff PF: > { %s17_s24 = sadd.s32 1, %s8381_s24  }
0x1000   : > { %p14_p4 = scmp.ge.s32.totalorder %s17_s24, 4  }
0x1002   :  { %16 = sbr.rel (!%p14_p4) target bundleno = 1 (0x1), region = 99 }

</bundles_post_ra>
